<compile_context>
chip_gen: v7x
topology: tpu7x:2x2x1
jax: 0.10.0
libtpu: 0.0.40
codegen_flags: <defaults>
</compile_context>

<pallas_src>
import jax
import jax.numpy as jnp
from jax import lax
from jax.experimental import pallas as pl
from jax.experimental.pallas import tpu as pltpu

LEAKY_SLOPE = 0.01   # nn.LeakyReLU default
GN_EPS = 1e-5        # nn.GroupNorm default


def down_kernel(x_ref, w1_ref, gamma_ref, beta_ref, w2_ref, out_ref,
                pad1_ref, pad2_ref, col1_ref, col2_ref):
    # x_ref block: (1, Hp, 2, Wp, 2*Cin) -- pre-pool image, 2x2 windows split out
    Hp = x_ref.shape[1]
    Wp = x_ref.shape[3]
    Cin = x_ref.shape[4] // 2
    Cmid = w1_ref.shape[1]      # w1_ref: (9*Cin, Cmid)
    Cout = w2_ref.shape[1]      # w2_ref: (9*Cmid, Cout)
    cdt = pad1_ref.dtype        # matmul operand dtype (bf16)

    # ---- MaxPool2d(2) ----
    xr = x_ref[0]                                       # (Hp, 2, Wp, 2*Cin)
    a = jnp.maximum(xr[:, 0], xr[:, 1])                 # max over row pairs  -> (Hp, Wp, 2*Cin)
    pooled = jnp.maximum(a[:, :, :Cin], a[:, :, Cin:])  # max over col pairs  -> (Hp, Wp, Cin)

    # ---- Conv2d(Cin -> Cmid, k=3, pad=1, no bias): im2col + single MXU matmul ----
    # Zero only the halo border (interior is fully overwritten every step).
    zrow1 = jnp.zeros((1, Wp + 2, Cin), cdt)
    zcol1 = jnp.zeros((Hp, 1, Cin), cdt)
    pad1_ref[0:1, :, :] = zrow1
    pad1_ref[Hp + 1:Hp + 2, :, :] = zrow1
    pad1_ref[1:Hp + 1, 0:1, :] = zcol1
    pad1_ref[1:Hp + 1, Wp + 1:Wp + 2, :] = zcol1
    pad1_ref[1:Hp + 1, 1:Wp + 1, :] = pooled.astype(cdt)

    for dy in range(3):
        for dx in range(3):
            t = dy * 3 + dx
            col1_ref[:, t * Cin:(t + 1) * Cin] = (
                pad1_ref[dy:dy + Hp, dx:dx + Wp, :].reshape(Hp * Wp, Cin))

    h = jnp.dot(col1_ref[...], w1_ref[...],
                preferred_element_type=jnp.float32)      # (Hp*Wp, Cmid), f32 acc

    # ---- GroupNorm(num_groups=1, num_channels=Cmid), affine -- fused stats ----
    n = Hp * Wp * Cmid
    s = jnp.sum(h)
    s2 = jnp.sum(h * h)
    mean = s / n
    var = s2 / n - mean * mean
    inv = lax.rsqrt(var + GN_EPS)
    h = (h - mean) * inv * gamma_ref[...] + beta_ref[...]

    # ---- LeakyReLU ----
    h = jnp.where(h >= 0, h, LEAKY_SLOPE * h)

    # ---- Conv2d(Cmid -> Cout, k=3, pad=1, no bias): im2col + single MXU matmul ----
    zrow2 = jnp.zeros((1, Wp + 2, Cmid), cdt)
    zcol2 = jnp.zeros((Hp, 1, Cmid), cdt)
    pad2_ref[0:1, :, :] = zrow2
    pad2_ref[Hp + 1:Hp + 2, :, :] = zrow2
    pad2_ref[1:Hp + 1, 0:1, :] = zcol2
    pad2_ref[1:Hp + 1, Wp + 1:Wp + 2, :] = zcol2
    pad2_ref[1:Hp + 1, 1:Wp + 1, :] = h.reshape(Hp, Wp, Cmid).astype(cdt)

    for dy in range(3):
        for dx in range(3):
            t = dy * 3 + dx
            col2_ref[:, t * Cmid:(t + 1) * Cmid] = (
                pad2_ref[dy:dy + Hp, dx:dx + Wp, :].reshape(Hp * Wp, Cmid))

    y = jnp.dot(col2_ref[...], w2_ref[...],
                preferred_element_type=jnp.float32)      # (Hp*Wp, Cout), f32 acc

    # ---- LeakyReLU + store ----
    y = jnp.where(y >= 0, y, LEAKY_SLOPE * y)
    out_ref[0] = y.reshape(Hp, Wp, Cout)


def _vmem_footprint_bytes(shape, dtype):
    """Approximate VMEM bytes for one buffer, accounting for (sublane, lane) tile padding."""
    itemsize = jnp.dtype(dtype).itemsize
    dims = list(shape)
    if len(dims) == 0:
        dims = [1, 1]
    elif len(dims) == 1:
        dims = [1] + dims
    sublane = 8 * max(1, 4 // itemsize)
    dims[-1] = -(-dims[-1] // 128) * 128
    dims[-2] = -(-dims[-2] // sublane) * sublane
    total = itemsize
    for d in dims:
        total *= int(d)
    return total


def down_forward(x_nchw, w1_hwio, gamma, beta, w2_hwio, *, compute_dtype=jnp.bfloat16):
    """Down.forward. x_nchw: (B, Cin, H, W) -> (B, Cout, H//2, W//2)."""
    B, Cin, H, W = x_nchw.shape
    Hp, Wp = H // 2, W // 2
    Cmid = w1_hwio.shape[3]
    Cout = w2_hwio.shape[3]

    # NCHW -> NHWC, bf16 activations (halves HBM->VMEM DMA traffic), then expose
    # the 2x2 pooling windows as (row-pair, lane-half) with a metadata reshape.
    x_nhwc = jnp.transpose(x_nchw, (0, 2, 3, 1)).astype(compute_dtype)
    x_r = x_nhwc.reshape(B, Hp, 2, Wp, 2 * Cin)

    # Flatten conv weights to im2col-matmul form: (3,3,Ci,Co) -> (9*Ci, Co).
    # Row index = (dy*3 + dx)*Ci + ci, matching the col-slab layout in the kernel.
    w1_mat = w1_hwio.reshape(9 * Cin, Cmid).astype(compute_dtype)
    w2_mat = w2_hwio.reshape(9 * Cmid, Cout).astype(compute_dtype)
    gamma2 = gamma.reshape(1, Cmid).astype(jnp.float32)
    beta2 = beta.reshape(1, Cmid).astype(jnp.float32)

    # Explicit scoped-VMEM budget: blocks (double-buffered) + persistent scratch,
    # with 2x headroom for compiler temporaries; clamped to [32 MiB, 64 MiB] so it
    # stays safe on v7x (64 MiB physical per TC).
    blk_bytes = (
        2 * _vmem_footprint_bytes((1, Hp, 2, Wp, 2 * Cin), compute_dtype)
        + 2 * _vmem_footprint_bytes((9 * Cin, Cmid), compute_dtype)
        + 2 * _vmem_footprint_bytes((9 * Cmid, Cout), compute_dtype)
        + 4 * _vmem_footprint_bytes((1, Cmid), jnp.float32)
        + 2 * _vmem_footprint_bytes((1, Hp, Wp, Cout), jnp.float32)
    )
    scratch_bytes = (
        _vmem_footprint_bytes((Hp + 2, Wp + 2, Cin), compute_dtype)
        + _vmem_footprint_bytes((Hp + 2, Wp + 2, Cmid), compute_dtype)
        + _vmem_footprint_bytes((Hp * Wp, 9 * Cin), compute_dtype)
        + _vmem_footprint_bytes((Hp * Wp, 9 * Cmid), compute_dtype)
    )
    vmem_limit = int(min(max(2 * (blk_bytes + scratch_bytes), 32 << 20), 64 << 20))

    out_nhwc = pl.pallas_call(
        down_kernel,
        out_shape=jax.ShapeDtypeStruct((B, Hp, Wp, Cout), jnp.float32),
        grid_spec=pltpu.PrefetchScalarGridSpec(
            num_scalar_prefetch=0,
            grid=(B,),
            in_specs=[
                pl.BlockSpec((1, Hp, 2, Wp, 2 * Cin), lambda b: (b, 0, 0, 0, 0)),
                pl.BlockSpec((9 * Cin, Cmid), lambda b: (0, 0)),
                pl.BlockSpec((1, Cmid), lambda b: (0, 0)),
                pl.BlockSpec((1, Cmid), lambda b: (0, 0)),
                pl.BlockSpec((9 * Cmid, Cout), lambda b: (0, 0)),
            ],
            out_specs=pl.BlockSpec((1, Hp, Wp, Cout), lambda b: (b, 0, 0, 0)),
            scratch_shapes=[
                pltpu.VMEM((Hp + 2, Wp + 2, Cin), compute_dtype),   # conv1 padded image
                pltpu.VMEM((Hp + 2, Wp + 2, Cmid), compute_dtype),  # conv2 padded image
                pltpu.VMEM((Hp * Wp, 9 * Cin), compute_dtype),      # conv1 im2col slab
                pltpu.VMEM((Hp * Wp, 9 * Cmid), compute_dtype),     # conv2 im2col slab
            ],
        ),
        compiler_params=pltpu.CompilerParams(
            dimension_semantics=("parallel",),   # batch is independent -> v7x megacore
            vmem_limit_bytes=vmem_limit,
        ),
    )(x_r, w1_mat, gamma2, beta2, w2_mat)

    return jnp.transpose(out_nhwc, (0, 3, 1, 2))


def down_reference(x_nchw, w1_hwio, gamma, beta, w2_hwio):
    """Pure-JAX f32 reference matching the PyTorch Down.forward semantics."""
    pooled = lax.reduce_window(x_nchw, -jnp.inf, lax.max,
                               (1, 1, 2, 2), (1, 1, 2, 2), "VALID")
    dn = ("NCHW", "HWIO", "NCHW")
    h = lax.conv_general_dilated(pooled, w1_hwio, (1, 1), "SAME",
                                 dimension_numbers=dn)
    mean = jnp.mean(h, axis=(1, 2, 3), keepdims=True)
    var = jnp.mean((h - mean) ** 2, axis=(1, 2, 3), keepdims=True)
    h = (h - mean) * lax.rsqrt(var + GN_EPS)
    h = h * gamma.reshape(1, -1, 1, 1) + beta.reshape(1, -1, 1, 1)
    h = jnp.where(h >= 0, h, LEAKY_SLOPE * h)
    y = lax.conv_general_dilated(h, w2_hwio, (1, 1), "SAME",
                                 dimension_numbers=dn)
    return jnp.where(y >= 0, y, LEAKY_SLOPE * y)


if __name__ == "__main__":
    B, Cin, H, W = 2, 4, 16, 16
    Cout = 8
    Cmid = Cout   # Down(...) default: residual=False -> mid_channels == out_channels

    key = jax.random.PRNGKey(0)
    k1, k2, k3, k4, k5 = jax.random.split(key, 5)
    x = jax.random.normal(k1, (B, Cin, H, W), jnp.float32)
    # Conv weights kept in HWIO layout (PyTorch OIHW transposed to (H, W, I, O)).
    w1 = 0.1 * jax.random.normal(k2, (3, 3, Cin, Cmid), jnp.float32)
    w2 = 0.1 * jax.random.normal(k3, (3, 3, Cmid, Cout), jnp.float32)
    gamma = 1.0 + 0.1 * jax.random.normal(k4, (Cmid,), jnp.float32)
    beta = 0.1 * jax.random.normal(k5, (Cmid,), jnp.float32)

    out = down_forward(x, w1, gamma, beta, w2)
    out = jax.block_until_ready(out)

    assert out.shape == (B, Cout, H // 2, W // 2), out.shape
    ref = down_reference(x, w1, gamma, beta, w2)
    max_err = float(jnp.max(jnp.abs(out - ref)))
    # bf16 matmul operands (f32 accumulation) -> mixed-precision tolerance.
    assert jnp.allclose(out, ref, atol=3e-2, rtol=3e-2), max_err

    print("KERNEL_OK")
</pallas_src>

<mosaic_0001>
module attributes {stable_mosaic.version = 11 : i64} {
  func.func @down_kernel(%arg0: i32, %arg1: memref<1x8x2x8x8xbf16, #tpu.memory_space<vmem>>, %arg2: memref<36x8xbf16, #tpu.memory_space<vmem>>, %arg3: memref<1x8xf32, #tpu.memory_space<vmem>>, %arg4: memref<1x8xf32, #tpu.memory_space<vmem>>, %arg5: memref<72x8xbf16, #tpu.memory_space<vmem>>, %arg6: memref<1x8x8x8xf32, #tpu.memory_space<vmem>>, %arg7: memref<10x10x4xbf16, #tpu.memory_space<vmem>>, %arg8: memref<10x10x8xbf16, #tpu.memory_space<vmem>>, %arg9: memref<64x36xbf16, #tpu.memory_space<vmem>>, %arg10: memref<64x72xbf16, #tpu.memory_space<vmem>>) attributes {dimension_semantics = [#tpu.dimension_semantics<parallel>], iteration_bounds = array<i64: 2>, scalar_prefetch = 0 : i64, scratch_operands = 4 : i64, tpu.core_type = #tpu.core_type<tc>, window_params = [{transform_indices = @transform_0, window_bounds = array<i64: 1, 8, 2, 8, 8>}, {pipeline_mode = #tpu.pipeline_mode<synchronous>, transform_indices = @transform_1, window_bounds = array<i64: 36, 8>}, {pipeline_mode = #tpu.pipeline_mode<synchronous>, transform_indices = @transform_2, window_bounds = array<i64: 1, 8>}, {pipeline_mode = #tpu.pipeline_mode<synchronous>, transform_indices = @transform_3, window_bounds = array<i64: 1, 8>}, {pipeline_mode = #tpu.pipeline_mode<synchronous>, transform_indices = @transform_4, window_bounds = array<i64: 72, 8>}, {transform_indices = @transform_5, window_bounds = array<i64: 1, 8, 8, 8>}]} {
    %c0 = arith.constant 0 : index
    %c0_0 = arith.constant 0 : index
    %c0_1 = arith.constant 0 : index
    %c0_2 = arith.constant 0 : index
    %c0_3 = arith.constant 0 : index
    %0 = vector.load %arg1[%c0, %c0_0, %c0_1, %c0_2, %c0_3] : memref<1x8x2x8x8xbf16, #tpu.memory_space<vmem>>, vector<1x8x2x8x8xbf16>
    %1 = vector.shape_cast %0 : vector<1x8x2x8x8xbf16> to vector<8x2x8x8xbf16>
    %2 = vector.extract_strided_slice %1 {offsets = [0, 0, 0, 0], sizes = [8, 1, 8, 8], strides = [1, 1, 1, 1]} : vector<8x2x8x8xbf16> to vector<8x1x8x8xbf16>
    %3 = vector.shape_cast %2 : vector<8x1x8x8xbf16> to vector<8x8x8xbf16>
    %4 = vector.extract_strided_slice %1 {offsets = [0, 1, 0, 0], sizes = [8, 1, 8, 8], strides = [1, 1, 1, 1]} : vector<8x2x8x8xbf16> to vector<8x1x8x8xbf16>
    %5 = vector.shape_cast %4 : vector<8x1x8x8xbf16> to vector<8x8x8xbf16>
    %6 = arith.maximumf %3, %5 : vector<8x8x8xbf16>
    %7 = vector.extract_strided_slice %6 {offsets = [0, 0, 0], sizes = [8, 8, 4], strides = [1, 1, 1]} : vector<8x8x8xbf16> to vector<8x8x4xbf16>
    %8 = vector.extract_strided_slice %6 {offsets = [0, 0, 4], sizes = [8, 8, 4], strides = [1, 1, 1]} : vector<8x8x8xbf16> to vector<8x8x4xbf16>
    %9 = arith.maximumf %7, %8 : vector<8x8x4xbf16>
    %cst = arith.constant 0.000000e+00 : bf16
    %10 = vector.broadcast %cst : bf16 to vector<1x10x4xbf16>
    %cst_4 = arith.constant 0.000000e+00 : bf16
    %11 = vector.broadcast %cst_4 : bf16 to vector<8x1x4xbf16>
    %c0_5 = arith.constant 0 : index
    %c0_6 = arith.constant 0 : index
    %c0_7 = arith.constant 0 : index
    %12 = vector.load %arg7[%c0_5, %c0_6, %c0_7] : memref<10x10x4xbf16, #tpu.memory_space<vmem>>, vector<1x10x4xbf16>
    tpu.vector_store %arg7[%c0_5, %c0_6, %c0_7], %10 {strides = array<i32>} : memref<10x10x4xbf16, #tpu.memory_space<vmem>>, vector<1x10x4xbf16>,
    %c9 = arith.constant 9 : index
    %c0_8 = arith.constant 0 : index
    %c0_9 = arith.constant 0 : index
    %13 = vector.load %arg7[%c9, %c0_8, %c0_9] : memref<10x10x4xbf16, #tpu.memory_space<vmem>>, vector<1x10x4xbf16>
    tpu.vector_store %arg7[%c9, %c0_8, %c0_9], %10 {strides = array<i32>} : memref<10x10x4xbf16, #tpu.memory_space<vmem>>, vector<1x10x4xbf16>,
    %c1 = arith.constant 1 : index
    %c0_10 = arith.constant 0 : index
    %c0_11 = arith.constant 0 : index
    %14 = vector.load %arg7[%c1, %c0_10, %c0_11] : memref<10x10x4xbf16, #tpu.memory_space<vmem>>, vector<8x1x4xbf16>
    tpu.vector_store %arg7[%c1, %c0_10, %c0_11], %11 {strides = array<i32>} : memref<10x10x4xbf16, #tpu.memory_space<vmem>>, vector<8x1x4xbf16>,
    %c1_12 = arith.constant 1 : index
    %c9_13 = arith.constant 9 : index
    %c0_14 = arith.constant 0 : index
    %15 = vector.load %arg7[%c1_12, %c9_13, %c0_14] : memref<10x10x4xbf16, #tpu.memory_space<vmem>>, vector<8x1x4xbf16>
    tpu.vector_store %arg7[%c1_12, %c9_13, %c0_14], %11 {strides = array<i32>} : memref<10x10x4xbf16, #tpu.memory_space<vmem>>, vector<8x1x4xbf16>,
    %c1_15 = arith.constant 1 : index
    %c1_16 = arith.constant 1 : index
    %c0_17 = arith.constant 0 : index
    %16 = vector.load %arg7[%c1_15, %c1_16, %c0_17] : memref<10x10x4xbf16, #tpu.memory_space<vmem>>, vector<8x8x4xbf16>
    tpu.vector_store %arg7[%c1_15, %c1_16, %c0_17], %9 {strides = array<i32>} : memref<10x10x4xbf16, #tpu.memory_space<vmem>>, vector<8x8x4xbf16>,
    %c0_18 = arith.constant 0 : index
    %c0_19 = arith.constant 0 : index
    %c0_20 = arith.constant 0 : index
    %17 = vector.load %arg7[%c0_18, %c0_19, %c0_20] : memref<10x10x4xbf16, #tpu.memory_space<vmem>>, vector<8x8x4xbf16>
    %18 = vector.shape_cast %17 : vector<8x8x4xbf16> to vector<64x4xbf16>
    %c0_21 = arith.constant 0 : index
    %c0_22 = arith.constant 0 : index
    %19 = vector.load %arg9[%c0_21, %c0_22] : memref<64x36xbf16, #tpu.memory_space<vmem>>, vector<64x4xbf16>
    tpu.vector_store %arg9[%c0_21, %c0_22], %18 {strides = array<i32>} : memref<64x36xbf16, #tpu.memory_space<vmem>>, vector<64x4xbf16>,
    %c0_23 = arith.constant 0 : index
    %c1_24 = arith.constant 1 : index
    %c0_25 = arith.constant 0 : index
    %20 = vector.load %arg7[%c0_23, %c1_24, %c0_25] : memref<10x10x4xbf16, #tpu.memory_space<vmem>>, vector<8x8x4xbf16>
    %21 = vector.shape_cast %20 : vector<8x8x4xbf16> to vector<64x4xbf16>
    %c0_26 = arith.constant 0 : index
    %c4 = arith.constant 4 : index
    %22 = vector.load %arg9[%c0_26, %c4] : memref<64x36xbf16, #tpu.memory_space<vmem>>, vector<64x4xbf16>
    tpu.vector_store %arg9[%c0_26, %c4], %21 {strides = array<i32>} : memref<64x36xbf16, #tpu.memory_space<vmem>>, vector<64x4xbf16>,
    %c0_27 = arith.constant 0 : index
    %c2 = arith.constant 2 : index
    %c0_28 = arith.constant 0 : index
    %23 = vector.load %arg7[%c0_27, %c2, %c0_28] : memref<10x10x4xbf16, #tpu.memory_space<vmem>>, vector<8x8x4xbf16>
    %24 = vector.shape_cast %23 : vector<8x8x4xbf16> to vector<64x4xbf16>
    %c0_29 = arith.constant 0 : index
    %c8 = arith.constant 8 : index
    %25 = vector.load %arg9[%c0_29, %c8] : memref<64x36xbf16, #tpu.memory_space<vmem>>, vector<64x4xbf16>
    tpu.vector_store %arg9[%c0_29, %c8], %24 {strides = array<i32>} : memref<64x36xbf16, #tpu.memory_space<vmem>>, vector<64x4xbf16>,
    %c1_30 = arith.constant 1 : index
    %c0_31 = arith.constant 0 : index
    %c0_32 = arith.constant 0 : index
    %26 = vector.load %arg7[%c1_30, %c0_31, %c0_32] : memref<10x10x4xbf16, #tpu.memory_space<vmem>>, vector<8x8x4xbf16>
    %27 = vector.shape_cast %26 : vector<8x8x4xbf16> to vector<64x4xbf16>
    %c0_33 = arith.constant 0 : index
    %c12 = arith.constant 12 : index
    %28 = vector.load %arg9[%c0_33, %c12] : memref<64x36xbf16, #tpu.memory_space<vmem>>, vector<64x4xbf16>
    tpu.vector_store %arg9[%c0_33, %c12], %27 {strides = array<i32>} : memref<64x36xbf16, #tpu.memory_space<vmem>>, vector<64x4xbf16>,
    %c1_34 = arith.constant 1 : index
    %c1_35 = arith.constant 1 : index
    %c0_36 = arith.constant 0 : index
    %29 = vector.load %arg7[%c1_34, %c1_35, %c0_36] : memref<10x10x4xbf16, #tpu.memory_space<vmem>>, vector<8x8x4xbf16>
    %30 = vector.shape_cast %29 : vector<8x8x4xbf16> to vector<64x4xbf16>
    %c0_37 = arith.constant 0 : index
    %c16 = arith.constant 16 : index
    %31 = vector.load %arg9[%c0_37, %c16] : memref<64x36xbf16, #tpu.memory_space<vmem>>, vector<64x4xbf16>
    tpu.vector_store %arg9[%c0_37, %c16], %30 {strides = array<i32>} : memref<64x36xbf16, #tpu.memory_space<vmem>>, vector<64x4xbf16>,
    %c1_38 = arith.constant 1 : index
    %c2_39 = arith.constant 2 : index
    %c0_40 = arith.constant 0 : index
    %32 = vector.load %arg7[%c1_38, %c2_39, %c0_40] : memref<10x10x4xbf16, #tpu.memory_space<vmem>>, vector<8x8x4xbf16>
    %33 = vector.shape_cast %32 : vector<8x8x4xbf16> to vector<64x4xbf16>
    %c0_41 = arith.constant 0 : index
    %c20 = arith.constant 20 : index
    %34 = vector.load %arg9[%c0_41, %c20] : memref<64x36xbf16, #tpu.memory_space<vmem>>, vector<64x4xbf16>
    tpu.vector_store %arg9[%c0_41, %c20], %33 {strides = array<i32>} : memref<64x36xbf16, #tpu.memory_space<vmem>>, vector<64x4xbf16>,
    %c2_42 = arith.constant 2 : index
    %c0_43 = arith.constant 0 : index
    %c0_44 = arith.constant 0 : index
    %35 = vector.load %arg7[%c2_42, %c0_43, %c0_44] : memref<10x10x4xbf16, #tpu.memory_space<vmem>>, vector<8x8x4xbf16>
    %36 = vector.shape_cast %35 : vector<8x8x4xbf16> to vector<64x4xbf16>
    %c0_45 = arith.constant 0 : index
    %c24 = arith.constant 24 : index
    %37 = vector.load %arg9[%c0_45, %c24] : memref<64x36xbf16, #tpu.memory_space<vmem>>, vector<64x4xbf16>
    tpu.vector_store %arg9[%c0_45, %c24], %36 {strides = array<i32>} : memref<64x36xbf16, #tpu.memory_space<vmem>>, vector<64x4xbf16>,
    %c2_46 = arith.constant 2 : index
    %c1_47 = arith.constant 1 : index
    %c0_48 = arith.constant 0 : index
    %38 = vector.load %arg7[%c2_46, %c1_47, %c0_48] : memref<10x10x4xbf16, #tpu.memory_space<vmem>>, vector<8x8x4xbf16>
    %39 = vector.shape_cast %38 : vector<8x8x4xbf16> to vector<64x4xbf16>
    %c0_49 = arith.constant 0 : index
    %c28 = arith.constant 28 : index
    %40 = vector.load %arg9[%c0_49, %c28] : memref<64x36xbf16, #tpu.memory_space<vmem>>, vector<64x4xbf16>
    tpu.vector_store %arg9[%c0_49, %c28], %39 {strides = array<i32>} : memref<64x36xbf16, #tpu.memory_space<vmem>>, vector<64x4xbf16>,
    %c2_50 = arith.constant 2 : index
    %c2_51 = arith.constant 2 : index
    %c0_52 = arith.constant 0 : index
    %41 = vector.load %arg7[%c2_50, %c2_51, %c0_52] : memref<10x10x4xbf16, #tpu.memory_space<vmem>>, vector<8x8x4xbf16>
    %42 = vector.shape_cast %41 : vector<8x8x4xbf16> to vector<64x4xbf16>
    %c0_53 = arith.constant 0 : index
    %c32 = arith.constant 32 : index
    %43 = vector.load %arg9[%c0_53, %c32] : memref<64x36xbf16, #tpu.memory_space<vmem>>, vector<64x4xbf16>
    tpu.vector_store %arg9[%c0_53, %c32], %42 {strides = array<i32>} : memref<64x36xbf16, #tpu.memory_space<vmem>>, vector<64x4xbf16>,
    %c0_54 = arith.constant 0 : index
    %c0_55 = arith.constant 0 : index
    %44 = vector.load %arg9[%c0_54, %c0_55] : memref<64x36xbf16, #tpu.memory_space<vmem>>, vector<64x36xbf16>
    %c0_56 = arith.constant 0 : index
    %c0_57 = arith.constant 0 : index
    %45 = vector.load %arg2[%c0_56, %c0_57] : memref<36x8xbf16, #tpu.memory_space<vmem>>, vector<36x8xbf16>
    %cst_58 = arith.constant dense<0.000000e+00> : vector<64x8xf32>
    %46 = tpu.matmul %44, %45, %cst_58 {dimension_numbers = #tpu.dot_dimension_numbers<[1], [0], [0], [1], [0, 0, 1, 1], [], []>} : vector<64x36xbf16>, vector<36x8xbf16>, vector<64x8xf32> -> vector<64x8xf32>
    %47 = vector.shape_cast %46 : vector<64x8xf32> to vector<1x64x8xf32>
    %cst_59 = arith.constant dense<0.000000e+00> : vector<1xf32>
    %48 = vector.multi_reduction <add>, %47, %cst_59 [1, 2] : vector<1x64x8xf32> to vector<1xf32>
    %49 = vector.shape_cast %48 : vector<1xf32> to vector<1x1x1xf32>
    %50 = vector.extract %49[0, 0, 0] : f32 from vector<1x1x1xf32>
    %51 = arith.mulf %46, %46 : vector<64x8xf32>
    %52 = vector.shape_cast %51 : vector<64x8xf32> to vector<1x64x8xf32>
    %cst_60 = arith.constant dense<0.000000e+00> : vector<1xf32>
    %53 = vector.multi_reduction <add>, %52, %cst_60 [1, 2] : vector<1x64x8xf32> to vector<1xf32>
    %54 = vector.shape_cast %53 : vector<1xf32> to vector<1x1x1xf32>
    %55 = vector.extract %54[0, 0, 0] : f32 from vector<1x1x1xf32>
    %cst_61 = arith.constant 5.120000e+02 : f32
    %56 = arith.divf %50, %cst_61 : f32
    %cst_62 = arith.constant 5.120000e+02 : f32
    %57 = arith.divf %55, %cst_62 : f32
    %58 = arith.mulf %56, %56 : f32
    %59 = arith.subf %57, %58 : f32
    %cst_63 = arith.constant 9.99999974E-6 : f32
    %60 = arith.addf %59, %cst_63 : f32
    %61 = math.rsqrt %60 : f32
    %62 = vector.broadcast %56 : f32 to vector<64x8xf32>
    %63 = arith.subf %46, %62 : vector<64x8xf32>
    %64 = vector.broadcast %61 : f32 to vector<64x8xf32>
    %65 = arith.mulf %63, %64 : vector<64x8xf32>
    %c0_64 = arith.constant 0 : index
    %c0_65 = arith.constant 0 : index
    %66 = vector.load %arg3[%c0_64, %c0_65] : memref<1x8xf32, #tpu.memory_space<vmem>>, vector<1x8xf32>
    %67 = vector.broadcast %66 : vector<1x8xf32> to vector<64x8xf32>
    %68 = arith.mulf %65, %67 : vector<64x8xf32>
    %c0_66 = arith.constant 0 : index
    %c0_67 = arith.constant 0 : index
    %69 = vector.load %arg4[%c0_66, %c0_67] : memref<1x8xf32, #tpu.memory_space<vmem>>, vector<1x8xf32>
    %70 = vector.broadcast %69 : vector<1x8xf32> to vector<64x8xf32>
    %71 = arith.addf %68, %70 : vector<64x8xf32>
    %cst_68 = arith.constant 0.000000e+00 : f32
    %72 = vector.broadcast %cst_68 : f32 to vector<64x8xf32>
    %73 = arith.cmpf oge, %71, %72 : vector<64x8xf32>
    %cst_69 = arith.constant 0.00999999977 : f32
    %74 = vector.broadcast %cst_69 : f32 to vector<64x8xf32>
    %75 = arith.mulf %74, %71 : vector<64x8xf32>
    %76 = arith.select %73, %71, %75 : vector<64x8xi1>, vector<64x8xf32>
    %cst_70 = arith.constant 0.000000e+00 : bf16
    %77 = vector.broadcast %cst_70 : bf16 to vector<1x10x8xbf16>
    %cst_71 = arith.constant 0.000000e+00 : bf16
    %78 = vector.broadcast %cst_71 : bf16 to vector<8x1x8xbf16>
    %c0_72 = arith.constant 0 : index
    %c0_73 = arith.constant 0 : index
    %c0_74 = arith.constant 0 : index
    %79 = vector.load %arg8[%c0_72, %c0_73, %c0_74] : memref<10x10x8xbf16, #tpu.memory_space<vmem>>, vector<1x10x8xbf16>
    tpu.vector_store %arg8[%c0_72, %c0_73, %c0_74], %77 {strides = array<i32>} : memref<10x10x8xbf16, #tpu.memory_space<vmem>>, vector<1x10x8xbf16>,
    %c9_75 = arith.constant 9 : index
    %c0_76 = arith.constant 0 : index
    %c0_77 = arith.constant 0 : index
    %80 = vector.load %arg8[%c9_75, %c0_76, %c0_77] : memref<10x10x8xbf16, #tpu.memory_space<vmem>>, vector<1x10x8xbf16>
    tpu.vector_store %arg8[%c9_75, %c0_76, %c0_77], %77 {strides = array<i32>} : memref<10x10x8xbf16, #tpu.memory_space<vmem>>, vector<1x10x8xbf16>,
    %c1_78 = arith.constant 1 : index
    %c0_79 = arith.constant 0 : index
    %c0_80 = arith.constant 0 : index
    %81 = vector.load %arg8[%c1_78, %c0_79, %c0_80] : memref<10x10x8xbf16, #tpu.memory_space<vmem>>, vector<8x1x8xbf16>
    tpu.vector_store %arg8[%c1_78, %c0_79, %c0_80], %78 {strides = array<i32>} : memref<10x10x8xbf16, #tpu.memory_space<vmem>>, vector<8x1x8xbf16>,
    %c1_81 = arith.constant 1 : index
    %c9_82 = arith.constant 9 : index
    %c0_83 = arith.constant 0 : index
    %82 = vector.load %arg8[%c1_81, %c9_82, %c0_83] : memref<10x10x8xbf16, #tpu.memory_space<vmem>>, vector<8x1x8xbf16>
    tpu.vector_store %arg8[%c1_81, %c9_82, %c0_83], %78 {strides = array<i32>} : memref<10x10x8xbf16, #tpu.memory_space<vmem>>, vector<8x1x8xbf16>,
    %83 = vector.shape_cast %76 : vector<64x8xf32> to vector<8x8x8xf32>
    %84 = arith.truncf %83 : vector<8x8x8xf32> to vector<8x8x8xbf16>
    %c1_84 = arith.constant 1 : index
    %c1_85 = arith.constant 1 : index
    %c0_86 = arith.constant 0 : index
    %85 = vector.load %arg8[%c1_84, %c1_85, %c0_86] : memref<10x10x8xbf16, #tpu.memory_space<vmem>>, vector<8x8x8xbf16>
    tpu.vector_store %arg8[%c1_84, %c1_85, %c0_86], %84 {strides = array<i32>} : memref<10x10x8xbf16, #tpu.memory_space<vmem>>, vector<8x8x8xbf16>,
    %c0_87 = arith.constant 0 : index
    %c0_88 = arith.constant 0 : index
    %c0_89 = arith.constant 0 : index
    %86 = vector.load %arg8[%c0_87, %c0_88, %c0_89] : memref<10x10x8xbf16, #tpu.memory_space<vmem>>, vector<8x8x8xbf16>
    %87 = vector.shape_cast %86 : vector<8x8x8xbf16> to vector<64x8xbf16>
    %c0_90 = arith.constant 0 : index
    %c0_91 = arith.constant 0 : index
    %88 = vector.load %arg10[%c0_90, %c0_91] : memref<64x72xbf16, #tpu.memory_space<vmem>>, vector<64x8xbf16>
    tpu.vector_store %arg10[%c0_90, %c0_91], %87 {strides = array<i32>} : memref<64x72xbf16, #tpu.memory_space<vmem>>, vector<64x8xbf16>,
    %c0_92 = arith.constant 0 : index
    %c1_93 = arith.constant 1 : index
    %c0_94 = arith.constant 0 : index
    %89 = vector.load %arg8[%c0_92, %c1_93, %c0_94] : memref<10x10x8xbf16, #tpu.memory_space<vmem>>, vector<8x8x8xbf16>
    %90 = vector.shape_cast %89 : vector<8x8x8xbf16> to vector<64x8xbf16>
    %c0_95 = arith.constant 0 : index
    %c8_96 = arith.constant 8 : index
    %91 = vector.load %arg10[%c0_95, %c8_96] : memref<64x72xbf16, #tpu.memory_space<vmem>>, vector<64x8xbf16>
    tpu.vector_store %arg10[%c0_95, %c8_96], %90 {strides = array<i32>} : memref<64x72xbf16, #tpu.memory_space<vmem>>, vector<64x8xbf16>,
    %c0_97 = arith.constant 0 : index
    %c2_98 = arith.constant 2 : index
    %c0_99 = arith.constant 0 : index
    %92 = vector.load %arg8[%c0_97, %c2_98, %c0_99] : memref<10x10x8xbf16, #tpu.memory_space<vmem>>, vector<8x8x8xbf16>
    %93 = vector.shape_cast %92 : vector<8x8x8xbf16> to vector<64x8xbf16>
    %c0_100 = arith.constant 0 : index
    %c16_101 = arith.constant 16 : index
    %94 = vector.load %arg10[%c0_100, %c16_101] : memref<64x72xbf16, #tpu.memory_space<vmem>>, vector<64x8xbf16>
    tpu.vector_store %arg10[%c0_100, %c16_101], %93 {strides = array<i32>} : memref<64x72xbf16, #tpu.memory_space<vmem>>, vector<64x8xbf16>,
    %c1_102 = arith.constant 1 : index
    %c0_103 = arith.constant 0 : index
    %c0_104 = arith.constant 0 : index
    %95 = vector.load %arg8[%c1_102, %c0_103, %c0_104] : memref<10x10x8xbf16, #tpu.memory_space<vmem>>, vector<8x8x8xbf16>
    %96 = vector.shape_cast %95 : vector<8x8x8xbf16> to vector<64x8xbf16>
    %c0_105 = arith.constant 0 : index
    %c24_106 = arith.constant 24 : index
    %97 = vector.load %arg10[%c0_105, %c24_106] : memref<64x72xbf16, #tpu.memory_space<vmem>>, vector<64x8xbf16>
    tpu.vector_store %arg10[%c0_105, %c24_106], %96 {strides = array<i32>} : memref<64x72xbf16, #tpu.memory_space<vmem>>, vector<64x8xbf16>,
    %c1_107 = arith.constant 1 : index
    %c1_108 = arith.constant 1 : index
    %c0_109 = arith.constant 0 : index
    %98 = vector.load %arg8[%c1_107, %c1_108, %c0_109] : memref<10x10x8xbf16, #tpu.memory_space<vmem>>, vector<8x8x8xbf16>
    %99 = vector.shape_cast %98 : vector<8x8x8xbf16> to vector<64x8xbf16>
    %c0_110 = arith.constant 0 : index
    %c32_111 = arith.constant 32 : index
    %100 = vector.load %arg10[%c0_110, %c32_111] : memref<64x72xbf16, #tpu.memory_space<vmem>>, vector<64x8xbf16>
    tpu.vector_store %arg10[%c0_110, %c32_111], %99 {strides = array<i32>} : memref<64x72xbf16, #tpu.memory_space<vmem>>, vector<64x8xbf16>,
    %c1_112 = arith.constant 1 : index
    %c2_113 = arith.constant 2 : index
    %c0_114 = arith.constant 0 : index
    %101 = vector.load %arg8[%c1_112, %c2_113, %c0_114] : memref<10x10x8xbf16, #tpu.memory_space<vmem>>, vector<8x8x8xbf16>
    %102 = vector.shape_cast %101 : vector<8x8x8xbf16> to vector<64x8xbf16>
    %c0_115 = arith.constant 0 : index
    %c40 = arith.constant 40 : index
    %103 = vector.load %arg10[%c0_115, %c40] : memref<64x72xbf16, #tpu.memory_space<vmem>>, vector<64x8xbf16>
    tpu.vector_store %arg10[%c0_115, %c40], %102 {strides = array<i32>} : memref<64x72xbf16, #tpu.memory_space<vmem>>, vector<64x8xbf16>,
    %c2_116 = arith.constant 2 : index
    %c0_117 = arith.constant 0 : index
    %c0_118 = arith.constant 0 : index
    %104 = vector.load %arg8[%c2_116, %c0_117, %c0_118] : memref<10x10x8xbf16, #tpu.memory_space<vmem>>, vector<8x8x8xbf16>
    %105 = vector.shape_cast %104 : vector<8x8x8xbf16> to vector<64x8xbf16>
    %c0_119 = arith.constant 0 : index
    %c48 = arith.constant 48 : index
    %106 = vector.load %arg10[%c0_119, %c48] : memref<64x72xbf16, #tpu.memory_space<vmem>>, vector<64x8xbf16>
    tpu.vector_store %arg10[%c0_119, %c48], %105 {strides = array<i32>} : memref<64x72xbf16, #tpu.memory_space<vmem>>, vector<64x8xbf16>,
    %c2_120 = arith.constant 2 : index
    %c1_121 = arith.constant 1 : index
    %c0_122 = arith.constant 0 : index
    %107 = vector.load %arg8[%c2_120, %c1_121, %c0_122] : memref<10x10x8xbf16, #tpu.memory_space<vmem>>, vector<8x8x8xbf16>
    %108 = vector.shape_cast %107 : vector<8x8x8xbf16> to vector<64x8xbf16>
    %c0_123 = arith.constant 0 : index
    %c56 = arith.constant 56 : index
    %109 = vector.load %arg10[%c0_123, %c56] : memref<64x72xbf16, #tpu.memory_space<vmem>>, vector<64x8xbf16>
    tpu.vector_store %arg10[%c0_123, %c56], %108 {strides = array<i32>} : memref<64x72xbf16, #tpu.memory_space<vmem>>, vector<64x8xbf16>,
    %c2_124 = arith.constant 2 : index
    %c2_125 = arith.constant 2 : index
    %c0_126 = arith.constant 0 : index
    %110 = vector.load %arg8[%c2_124, %c2_125, %c0_126] : memref<10x10x8xbf16, #tpu.memory_space<vmem>>, vector<8x8x8xbf16>
    %111 = vector.shape_cast %110 : vector<8x8x8xbf16> to vector<64x8xbf16>
    %c0_127 = arith.constant 0 : index
    %c64 = arith.constant 64 : index
    %112 = vector.load %arg10[%c0_127, %c64] : memref<64x72xbf16, #tpu.memory_space<vmem>>, vector<64x8xbf16>
    tpu.vector_store %arg10[%c0_127, %c64], %111 {strides = array<i32>} : memref<64x72xbf16, #tpu.memory_space<vmem>>, vector<64x8xbf16>,
    %c0_128 = arith.constant 0 : index
    %c0_129 = arith.constant 0 : index
    %113 = vector.load %arg10[%c0_128, %c0_129] : memref<64x72xbf16, #tpu.memory_space<vmem>>, vector<64x72xbf16>
    %c0_130 = arith.constant 0 : index
    %c0_131 = arith.constant 0 : index
    %114 = vector.load %arg5[%c0_130, %c0_131] : memref<72x8xbf16, #tpu.memory_space<vmem>>, vector<72x8xbf16>
    %cst_132 = arith.constant dense<0.000000e+00> : vector<64x8xf32>
    %115 = tpu.matmul %113, %114, %cst_132 {dimension_numbers = #tpu.dot_dimension_numbers<[1], [0], [0], [1], [0, 0, 1, 1], [], []>} : vector<64x72xbf16>, vector<72x8xbf16>, vector<64x8xf32> -> vector<64x8xf32>
    %cst_133 = arith.constant 0.000000e+00 : f32
    %116 = vector.broadcast %cst_133 : f32 to vector<64x8xf32>
    %117 = arith.cmpf oge, %115, %116 : vector<64x8xf32>
    %cst_134 = arith.constant 0.00999999977 : f32
    %118 = vector.broadcast %cst_134 : f32 to vector<64x8xf32>
    %119 = arith.mulf %118, %115 : vector<64x8xf32>
    %120 = arith.select %117, %115, %119 : vector<64x8xi1>, vector<64x8xf32>
    %121 = vector.shape_cast %120 : vector<64x8xf32> to vector<8x8x8xf32>
    %c0_135 = arith.constant 0 : index
    %c0_136 = arith.constant 0 : index
    %c0_137 = arith.constant 0 : index
    %c0_138 = arith.constant 0 : index
    %122 = vector.load %arg6[%c0_135, %c0_136, %c0_137, %c0_138] : memref<1x8x8x8xf32, #tpu.memory_space<vmem>>, vector<1x8x8x8xf32>
    %123 = vector.shape_cast %122 : vector<1x8x8x8xf32> to vector<8x8x8xf32>
    %124 = vector.shape_cast %121 : vector<8x8x8xf32> to vector<1x8x8x8xf32>
    tpu.vector_store %arg6[%c0_135, %c0_136, %c0_137, %c0_138], %124 {strides = array<i32>} : memref<1x8x8x8xf32, #tpu.memory_space<vmem>>, vector<1x8x8x8xf32>,
    return
  }
  func.func @transform_0(%arg0: i32) -> (i32, i32, i32, i32, i32) {
    %c0_i32 = arith.constant 0 : i32
    %c0_i32_0 = arith.constant 0 : i32
    %c0_i32_1 = arith.constant 0 : i32
    %c0_i32_2 = arith.constant 0 : i32
    %c0_i32_3 = arith.constant 0 : i32
    return %arg0, %c0_i32, %c0_i32_0, %c0_i32_1, %c0_i32_2 : i32, i32, i32, i32, i32
  }
  func.func @transform_1(%arg0: i32) -> (i32, i32) {
    %c0_i32 = arith.constant 0 : i32
    %c0_i32_0 = arith.constant 0 : i32
    %c0_i32_1 = arith.constant 0 : i32
    return %c0_i32, %c0_i32_0 : i32, i32
  }
  func.func @transform_2(%arg0: i32) -> (i32, i32) {
    %c0_i32 = arith.constant 0 : i32
    %c0_i32_0 = arith.constant 0 : i32
    %c0_i32_1 = arith.constant 0 : i32
    return %c0_i32, %c0_i32_0 : i32, i32
  }
  func.func @transform_3(%arg0: i32) -> (i32, i32) {
    %c0_i32 = arith.constant 0 : i32
    %c0_i32_0 = arith.constant 0 : i32
    %c0_i32_1 = arith.constant 0 : i32
    return %c0_i32, %c0_i32_0 : i32, i32
  }
  func.func @transform_4(%arg0: i32) -> (i32, i32) {
    %c0_i32 = arith.constant 0 : i32
    %c0_i32_0 = arith.constant 0 : i32
    %c0_i32_1 = arith.constant 0 : i32
    return %c0_i32, %c0_i32_0 : i32, i32
  }
  func.func @transform_5(%arg0: i32) -> (i32, i32, i32, i32) {
    %c0_i32 = arith.constant 0 : i32
    %c0_i32_0 = arith.constant 0 : i32
    %c0_i32_1 = arith.constant 0 : i32
    %c0_i32_2 = arith.constant 0 : i32
    return %arg0, %c0_i32, %c0_i32_0, %c0_i32_1 : i32, i32, i32, i32
  }
}

</mosaic_0001>

<bundles_post_ra>
// kernel: tpu_custom_call.1
= control target key start
LH: loop header
LB: loop body
LE: loop exit
PB: predicated region body
PF: predicated region fallthrough
CT: control target
= control target key end

     0   :  { %10 = vsyncpa [#allocation7], 0  ;;  %s4423_s0 = inlined_call_operand.hbm [shape: bf16[2,8,2,8,8], index: 0, kind: input, shape index: {}]   ;;  %s4424_s1 = inlined_call_operand.vmem [shape: bf16[36,8], index: 1, kind: input, shape index: {}]   ;;  %s4425_s2 = inlined_call_operand.vmem [shape: f32[1,8], index: 2, kind: input, shape index: {}]   ;;  %s4426_s3 = inlined_call_operand.vmem [shape: f32[1,8], index: 3, kind: input, shape index: {}]   ;;  %s4427_s4 = inlined_call_operand.vmem [shape: bf16[72,8], index: 4, kind: input, shape index: {}]   ;;  %s4428_s5 = inlined_call_operand.hbm [shape: f32[2,8,8,8], index: 5, kind: output, shape index: {}]  }
   0x1   :  { %12 = vsyncpa [#allocation7 + $0x1], 0 }
   0x2   :  { %13 = vsyncpa [#allocation8], 0 }
   0x3   :  { %15 = vsyncpa [#allocation8 + $0x1], 0  ;;  %s3439_s18 = smov 0   ;;  %s3441_s19 = smov 0  }
   0x4   :  { %s3443_s20 = smov 0   ;;  %s3445_s21 = smov 0  }
   0x5 LB: > { %s3460_s22 = sadd.s32 4294967295, %s3388_s21   ;;  %s2969_s23 = sadd.s32 4294967294, %s3388_s21   ;;  %s3388_s21 = sphi %s3445_s21, %s4457_s21   ;;  %s3384_s20 = sphi %s3443_s20, %s4456_s20   ;;  %s3380_s19 = sphi %s3441_s19, %s4455_s19   ;;  %s3376_s18 = sphi %s3439_s18, %s4454_s18  }
   0x6   : > { %s3464_s24 = sadd.s32 1, %s3388_s21   ;;  %s28_s25 = sadd.s32 1, %s3384_s20 }
   0x7   : > { %s25_s26 = ssub.s32 %s3388_s21, %s3464_s24  ;;  %p35_p0 = scmp.ne.s32.totalorder %s3384_s20, %s3380_s19 }
   0x8   : > { %p26_p1 = scmp.eq.s32.totalorder %s25_s26, 0  ;;  %p36_p2 = scmp.eq.s32.totalorder %s3388_s21, 0 }
   0x9   : > { %p41_p3 = scmp.ne.s32.totalorder %s3380_s19, %s3376_s18  ;;  %p42_p4 = scmp.eq.s32.totalorder %s3460_s22, 0 }
   0xa   : > { %s3476_s27 = scalar_select %p26_p1, %s3384_s20, %s28_s25  }
   0xb   : > { %p3478_p5 = por %p36_p2, %p35_p0  ;;  %p3482_p6 = por %p42_p4, %p41_p3 }
   0xc   : > { %p149_p7 = scmp.eq.s32.totalorder %s3460_s22, 1  ;;  %p155_p8 = scmp.eq.s32.totalorder %s2969_s23, 1 }
   0xd   : > { %p3207_p10 = scmp.lt.s32.totalorder %s3388_s21, 2  ;;  %s187_s7 = sand.u32 1, %s3384_s20  }
   0xe   : > { %p3489_p11 = por %p149_p7, %p35_p0  ;;  %p3493_p12 = por %p155_p8, %p41_p3 }
   0xf   : > { %s3129_s8 = sshll.u32 %s3388_s21, 10  ;;  %s2972_s9 = sshll.u32 %s187_s7, 6 }
  0x10   : > { %s4432_s30 = scalar_select %p3489_p11, 1, 0 }
  0x11   : > { %s4433_s6 = scalar_select %p3493_p12, 1, 0 }
  0x12   : > { %s3502_s12 = scalar_lea.hbm %s4423_s0, %s3129_s8  ;;  %s191_s13 = scalar_lea.vmem [#allocation6], %s2972_s9 }
  0x13   : > { %s198_s14 = sshll.u32 %s191_s13, 4  ;;  %p3506_p13 = pnand %p3207_p10, %p3478_p5  ;;  %s3510_s14 = int_to_ptr.vmem [resolvable:$true] %s198_s14 }
  0x14   : > { %s3512_s16 = scalar_lea.sflag [#allocation7], %s187_s7  ;;  %s3292_s17 = scalar_lea.hbm %s3502_s12, 1024 }
  0x15   : > { %p3293_p0 = scmp.ne.s32.totalorder %s3502_s12, %s3292_s17  ;;  %p3294_p1 = pneg %p3506_p13 }
  0x16   : > { %s3297_s26 = scalar_lea.hbm %s4423_s0, 2048  ;;  %p3298_p4 = scmp.lt.u32.totalorder %s3502_s12, %s4423_s0 }
  0x17   : > { %p3295_p2 = pnand %p3294_p1, %p3293_p0  ;;  %p3299_p5 = scmp.lt.u32.totalorder %s3297_s26, %s3292_s17 }
  0x18   : > { %p3301_p8 = scmp.lt.u32.totalorder %s3292_s17, %s3502_s12 }
  0x19   : > { %p3296_p3 = pneg %p3295_p2  ;;  %p3300_p7 = por %p3299_p5, %p3298_p4 }
  0x1b   : > { %p3302_p10 = por %p3301_p8, %p3300_p7 }
  0x1d   : > { %p3303_p9 = pnand %p3302_p10, %p3296_p3 }
  0x1f   : > { %3306 = shalt.err (!%p3303_p9)
}
  0x20   : > { %s3307_s7 = scalar_lea.vmem %s3510_s14, 1024  ;;  %s3390_s9 = smov [#allocation6]  }
  0x21   : > { %p3308_p0 = scmp.ne.s32.totalorder %s3510_s14, %s3307_s7  ;;  %s3312_s10 = sshll.u32 %s3390_s9, 4  ;;  %s3313_s10 = int_to_ptr.vmem [resolvable:$false] %s3312_s10 }
  0x22   : > { %s3314_s11 = scalar_lea.vmem %s3313_s10, 2048  ;;  %p3315_p11 = scmp.lt.s32.totalorder %s3510_s14, %s3313_s10 }
  0x23   : > { %p3310_p2 = pnand %p3308_p0, %p3294_p1  ;;  %p3316_p4 = scmp.lt.s32.totalorder %s3314_s11, %s3307_s7 }
  0x25   : > { %p3311_p12 = pneg %p3310_p2  ;;  %p3317_p5 = por %p3316_p4, %p3315_p11 }
  0x27   : > { %p3318_p7 = pnand %p3317_p5, %p3311_p12 }
  0x29   : > { %3321 = shalt.err (!%p3318_p7)
}
  0x2a   : > { %s3391_s13 = smov 64   ;;  %s3392_s17 = smov 4  }
  0x2b   : > { %3202 = dma.hbm_to_vmem [thread:$0]  (!%p3506_p13), %s3502_s12, 1024, %s3510_s14, %s3512_s16, %s3391_s13, %s3391_s13, %s3392_s17  }
  0x2c   : > { %p2975_p9 = scmp.ge.s32.totalorder %s3388_s21, 1  ;;  %p206_p1 = scmp.lt.s32.totalorder %s3388_s21, 3 }
  0x2e   : > { %p207_p3 = pnand %p2975_p9, %p206_p1 }
  0x2f   : > { %s3543_s23 = sand.u32 (!%p207_p3), 1, %s3380_s19  }
  0x30   : > { %210 = sbr.rel (%p207_p3) target bundleno = 1383 (0x567), region = 40  ;;  %s2976_s25 = sshll.u32 (!%p207_p3), %s3543_s23, 6 }
  0x31   : > { %s213_s26 = scalar_lea.sflag (!%p207_p3), [#allocation7], %s3543_s23  ;;  %s3549_s28 = scalar_lea.vmem (!%p207_p3), [#allocation6], %s2976_s25 }
  0x37   : > { %3367 = dma.done.wait (%p3482_p6), %s213_s26, 1024  }
  0x38   : > { %3369 = vsyncadd (%p3482_p6), %s213_s26, 4294966272  ;;  %vm308_vm0 = vcmask 27648   ;;  %vm310_vm1 = vcmask 24576   ;;  %vm1630_vm2 = vcmask 60416   ;;  %v3393_v0 = vmov 0   ;;  %s3394_s29 = smov 124  }
  0x39   : > { %309 = vst.msk [vmem:[#allocation2] sm:$0xf] %vm308_vm0, %v3393_v0  ;;  %313 = vst.msk [vmem:[#allocation2 + $0x48] sm:$0xf] %vm308_vm0, %v3393_v0  ;;  %vm1632_vm3 = vcmask 57344   ;;  %vm728_vm12 = vcmask 1042432  }
  0x3a   : > { %311 = vst.msk [vmem:[#allocation2 + $0x4] sm:$0x1] %vm310_vm1, %v3393_v0  ;;  %314 = vst.msk [vmem:[#allocation2 + $0x4c] sm:$0x1] %vm310_vm1, %v3393_v0  ;;  %vm343_vm4 = vsmask.f32 7938 }
  0x3b   : > { %1631 = vst.msk [vmem:[#allocation3] sm:$0xf] %vm1630_vm2, %v3393_v0  ;;  %1635 = vst.msk [vmem:[#allocation3 + $0x48] sm:$0xf] %vm1630_vm2, %v3393_v0  ;;  %vm317_vm5 = vsmask.f32 256 }
  0x3c   : > { %1633 = vst.msk [vmem:[#allocation3 + $0x4] sm:$0x1] %vm1632_vm3, %v3393_v0  ;;  %1636 = vst.msk [vmem:[#allocation3 + $0x4c] sm:$0x1] %vm1632_vm3, %v3393_v0  ;;  %v248_v4 = vld [vmem:[%s3549_s28 + $0x10] sm:$0xf] }
  0x3d   : > { %vm3563_vm6 = vmand %vm308_vm0, %vm343_vm4  ;;  %v249_v5 = vld [vmem:[%s3549_s28 + $0x14] sm:$0xf]  ;;  %v244_v6 = vld [vmem:[%s3549_s28] sm:$0xf]  ;;  %vm729_vm13 = vcmask 1046532   ;;  %s3395_s12 = smov 12  }
  0x3e   : > { %vm3567_vm7 = vmand %vm1632_vm3, %vm317_vm5  ;;  %v3579_v7 = vmax.bf16 %v249_v5, %v248_v4  ;;  %v245_v8 = vld [vmem:[%s3549_s28 + $0x4] sm:$0xf]  ;;  %v250_v9 = vld [vmem:[%s3549_s28 + $0x18] sm:$0xf]  ;;  %vm552_vm14 = vsmask.f32 3328 }
  0x3f   : > { %vm3572_vm8 = vmand %vm1632_vm3, %vm343_vm4  ;;  %v251_v10 = vld [vmem:[%s3549_s28 + $0x1c] sm:$0xf]  ;;  %v3584_v11 = vmax.bf16 %v245_v8, %v244_v6  ;;  %v246_v12 = vld [vmem:[%s3549_s28 + $0x8] sm:$0xf]  ;;  %vm553_vm15 = vsmask.f32 7440 }
  0x40   : > { %v247_v13 = vld [vmem:[%s3549_s28 + $0xc] sm:$0xf]  ;;  %vm3589_vm9 = vmand %vm310_vm1, %vm317_vm5  ;;  %280 = vrot.lane.b32.xlu1 %v3579_v7, %s3394_s29  ;;  %v3595_v15 = vmax.bf16 %v251_v10, %v250_v9  ;;  %v254_v18 = vld [vmem:[%s3549_s28 + $0x28] sm:$0xf]  ;;  %s3396_s14 = smov 24   ;;  %s3397_s15 = smov 8  }
  0x41   : > { %vm3599_vm10 = vmand %vm310_vm1, %vm343_vm4  ;;  %276 = vrot.lane.b32.xlu0 %v3584_v11, %s3394_s29  ;;  %v3605_v17 = vmax.bf16 %v247_v13, %v246_v12  ;;  %v255_v19 = vld [vmem:[%s3549_s28 + $0x2c] sm:$0xf]  ;;  %v252_v20 = vld [vmem:[%s3549_s28 + $0x20] sm:$0xf]  ;;  %s3398_s16 = smov 20   ;;  %s3399_s8 = smov 32  }
  0x42   : > { %v253_v21 = vld [vmem:[%s3549_s28 + $0x24] sm:$0xf]  ;;  %v325_v22 = vld [vmem:[#allocation2 + $0x18] sm:$0x1]  ;;  %v351_v23 = vld [vmem:[#allocation2 + $0x1c] sm:$0x1]  ;;  %v3625_v31 = vmax.bf16 %v255_v19, %v254_v18 }
  0x43   : > { %v258_v24 = vld [vmem:[%s3549_s28 + $0x38] sm:$0xf]  ;;  %v259_v25 = vld [vmem:[%s3549_s28 + $0x3c] sm:$0xf]  ;;  %v326_v26 = vsel %vm3589_vm9, 0, %v325_v22  ;;  %v352_v27 = vsel %vm3599_vm10, 0, %v351_v23  ;;  %vm3619_vm11 = vmand %vm1630_vm2, %vm343_vm4  ;;  %v3635_v38 = vmax.bf16 %v253_v21, %v252_v20 }
  0x44   : > { %v319_v29 = vld [vmem:[#allocation2 + $0x8] sm:$0x1]  ;;  %v345_v30 = vld [vmem:[#allocation2 + $0xc] sm:$0x1]  ;;  %282 = vrot.lane.b32.xlu1 %v3595_v15, %s3394_s29  ;;  %v256_v32 = vld [vmem:[%s3549_s28 + $0x30] sm:$0xf]  ;;  %v3651_v51 = vmax.bf16 %v259_v25, %v258_v24 }
  0x45   : > { %v257_v33 = vld [vmem:[%s3549_s28 + $0x34] sm:$0xf]  ;;  %327 = vst [vmem:[#allocation2 + $0x18] sm:$0x1] %v326_v26  ;;  %353 = vst [vmem:[#allocation2 + $0x1c] sm:$0x1] %v352_v27  ;;  %278 = vrot.lane.b32.xlu0 %v3605_v17, %s3394_s29 }
  0x46   : > { %v320_v34 = vsel %vm3589_vm9, 0, %v319_v29  ;;  %v346_v35 = vsel %vm3599_vm10, 0, %v345_v30  ;;  %v328_v36 = vld [vmem:[#allocation2 + $0x20] sm:$0x1]  ;;  %v354_v37 = vld [vmem:[#allocation2 + $0x24] sm:$0x1]  ;;  %v3659_v56 = vmax.bf16 %v257_v33, %v256_v32  ;;  %vm3760_vm0 = vmor %vm728_vm12, %vm729_vm13 }
  0x47   : > { %321 = vst [vmem:[#allocation2 + $0x8] sm:$0x1] %v320_v34  ;;  %347 = vst [vmem:[#allocation2 + $0xc] sm:$0x1] %v346_v35  ;;  %v329_v39 = vsel %vm3589_vm9, 0, %v328_v36  ;;  %v355_v40 = vsel %vm3599_vm10, 0, %v354_v37 }
  0x48   : > { %v322_v41 = vld [vmem:[#allocation2 + $0x10] sm:$0x1]  ;;  %v348_v42 = vld [vmem:[#allocation2 + $0x14] sm:$0x1]  ;;  %330 = vst [vmem:[#allocation2 + $0x20] sm:$0x1] %v329_v39  ;;  %286 = vrot.lane.b32.xlu1 %v3625_v31, %s3394_s29  ;;  %vm3772_vm1 = vmor %vm552_vm14, %vm553_vm15 }
  0x49   : > { %356 = vst [vmem:[#allocation2 + $0x24] sm:$0x1] %v355_v40  ;;  %v323_v43 = vsel %vm3589_vm9, 0, %v322_v41  ;;  %v349_v44 = vsel %vm3599_vm10, 0, %v348_v42  ;;  %v334_v45 = vld [vmem:[#allocation2 + $0x30] sm:$0x1]  ;;  %284 = vrot.lane.b32.xlu0 %v3635_v38, %s3394_s29 }
  0x4a   : > { %v360_v46 = vld [vmem:[#allocation2 + $0x34] sm:$0x1]  ;;  %324 = vst [vmem:[#allocation2 + $0x10] sm:$0x1] %v323_v43  ;;  %350 = vst [vmem:[#allocation2 + $0x14] sm:$0x1] %v349_v44 }
  0x4b   : > { %v335_v47 = vsel %vm3589_vm9, 0, %v334_v45  ;;  %v361_v48 = vsel %vm3599_vm10, 0, %v360_v46  ;;  %v331_v49 = vld [vmem:[#allocation2 + $0x28] sm:$0x1]  ;;  %v357_v50 = vld [vmem:[#allocation2 + $0x2c] sm:$0x1] }
  0x4c   : > { %336 = vst [vmem:[#allocation2 + $0x30] sm:$0x1] %v335_v47  ;;  %362 = vst [vmem:[#allocation2 + $0x34] sm:$0x1] %v361_v48  ;;  %v332_v52 = vsel %vm3589_vm9, 0, %v331_v49  ;;  %v358_v53 = vsel %vm3599_vm10, 0, %v357_v50  ;;  %290 = vrot.lane.b32.xlu1 %v3651_v51, %s3394_s29 }
  0x4d   : > { %v340_v54 = vld [vmem:[#allocation2 + $0x40] sm:$0x1]  ;;  %v366_v55 = vld [vmem:[#allocation2 + $0x44] sm:$0x1]  ;;  %333 = vst [vmem:[#allocation2 + $0x28] sm:$0x1] %v332_v52  ;;  %288 = vrot.lane.b32.xlu0 %v3659_v56, %s3394_s29 }
  0x4e   : > { %359 = vst [vmem:[#allocation2 + $0x2c] sm:$0x1] %v358_v53  ;;  %v341_v57 = vsel %vm3589_vm9, 0, %v340_v54  ;;  %v367_v58 = vsel %vm3599_vm10, 0, %v366_v55  ;;  %v337_v59 = vld [vmem:[#allocation2 + $0x38] sm:$0x1] }
  0x4f   : > { %v363_v60 = vld [vmem:[#allocation2 + $0x3c] sm:$0x1]  ;;  %342 = vst [vmem:[#allocation2 + $0x40] sm:$0x1] %v341_v57  ;;  %368 = vst [vmem:[#allocation2 + $0x44] sm:$0x1] %v367_v58 }
  0x50   : > { %v338_v61 = vsel %vm3589_vm9, 0, %v337_v59  ;;  %v364_v62 = vsel %vm3599_vm10, 0, %v363_v60  ;;  %v536_v63 = vld [vmem:[#allocation2] sm:$0xf]  ;;  %v3680_v13 = vld [vmem:[#allocation2 + $0x4] sm:$0x1] }
  0x51   : > { %339 = vst [vmem:[#allocation2 + $0x38] sm:$0x1] %v338_v61  ;;  %365 = vst [vmem:[#allocation2 + $0x3c] sm:$0x1] %v364_v62  ;;  %v556_v0 = vshrl.u32 %v536_v63, 16  ;;  %v559_v4 = vshll.u32 %v536_v63, 16 }
  0x52   : > { %v3678_v12 = vld [vmem:[#allocation2] sm:$0xe]  ;;  %v3683_v18 = vld [vmem:[#allocation2 + $0x4] sm:$0x1]  ;;  %v3685_v19 = vld [vmem:[#allocation2 + $0x48] sm:$0xf] }
  0x53   : > { %v3673_v6 = vrot.slane %v556_v0, 4  ;;  %v3675_v8 = vrot.slane %v559_v4, 5  ;;  %v463_v22 = vld [vmem:[#allocation2 + $0x18] sm:$0xf]  ;;  %v2986_v25 = vrot.slane %v3678_v12, 9  ;;  %v565_v32 = vshll.u32 %v3683_v18, 16 }
  0x54   : > { %v466_v27 = vld [vmem:[#allocation2 + $0x1c] sm:$0x1]  ;;  %v1248_v33 = vshrl.u32 %v3685_v19, 16  ;;  %v451_v34 = vld [vmem:[#allocation2 + $0x8] sm:$0xf]  ;;  %v1251_v39 = vshll.u32 %v3685_v19, 16 }
  0x55   : > { %v562_v26 = vor.u32 %v3675_v8, %v3673_v6  ;;  %v454_v42 = vld [vmem:[#allocation2 + $0xc] sm:$0x1]  ;;  %v469_v52 = vld [vmem:[#allocation2 + $0x20] sm:$0xf]  ;;  %v472_v58 = vld [vmem:[#allocation2 + $0x24] sm:$0x1] }
  0x56   : > { %v457_v59 = vld [vmem:[#allocation2 + $0x10] sm:$0xf]  ;;  %v460_v0 = vld [vmem:[#allocation2 + $0x14] sm:$0x1]  ;;  %s3400_s7 = smov 4   ;;  %s3401_s9 = smov 16  }
  0x57   : > { %s3402_s13 = smov 28   ;;  %vm531_vm2 = vcmask 31744   ;;  %vm1420_vm3 = vcmask 1041408   ;;  %vm691_vm4 = vcmask 64544   ;;  %vm787_vm5 = vcmask 97344   ;;  %p4451_p11 = scmp.ne.s32.totalorder %s4432_s30, 0 }
  0x58   : > { %v490_v8 = vld [vmem:[#allocation2 + $0x3c] sm:$0x1]  ;;  %vm1082_vm10 = vcmask 195744   ;;  %vm1128_vm12 = vcmask 228544   ;;  %vm1285_vm13 = vcmask 261344   ;;  %vm1378_vm14 = vcmask 294144  }
  0x59   : > { %vm1407_vm15 = vcmask 293888  }
  0xb2   : > { %v281_v5 = vpop.permute.xlu1 %280 }
  0xb3   : > { %v302_v9 = vmax.bf16 %v281_v5, %v3579_v7  ;;  %v277_v10 = vpop.permute.xlu0 %276  ;;  %v733_v7 = vrot.slane %v3680_v13, 5 }
  0xb4   : > { %v300_v16 = vmax.bf16 %v277_v10, %v3584_v11 }
  0xb5   : > { %v386_v20 = vshrl.u32 %v302_v9, 16  ;;  %v389_v21 = vshll.u32 %v302_v9, 16 }
  0xb6   : > { %v370_v23 = vshrl.u32 %v300_v16, 16  ;;  %v283_v24 = vpop.permute.xlu1 %282  ;;  %v373_v36 = vshll.u32 %v300_v16, 16 }
  0xb7   : > { %v388_v29 = vrot.slane %v386_v20, 7  ;;  %v303_v11 = vmax.bf16 %v283_v24, %v3595_v15  ;;  %v279_v30 = vpop.permute.xlu0 %278 }
  0xb8   : > { %v372_v35 = vrot.slane %v370_v23, 7  ;;  %v301_v37 = vmax.bf16 %v279_v30, %v3605_v17  ;;  %v481_v23 = vld [vmem:[#allocation2 + $0x30] sm:$0xf]  ;;  %v484_v30 = vld [vmem:[#allocation2 + $0x34] sm:$0x1] }
  0xb9   : > { %v391_v40 = vor.u32 %v389_v21, %v388_v29  ;;  %v392_v41 = vrot.slane %v388_v29, 4  ;;  %v394_v43 = vshrl.u32 %v303_v11, 16  ;;  %v397_v44 = vshll.u32 %v303_v11, 16 }
  0xba   : > { %v375_v45 = vor.u32 %v373_v36, %v372_v35  ;;  %v376_v46 = vrot.slane %v372_v35, 4  ;;  %v378_v15 = vshrl.u32 %v301_v37, 16  ;;  %v381_v47 = vshll.u32 %v301_v37, 16  ;;  %v287_v48 = vpop.permute.xlu1 %286 }
  0xbb   : > { %v464_v49 = vsel %vm3563_vm6, %v391_v40, %v463_v22  ;;  %v467_v50 = vsel %vm3589_vm9, %v392_v41, %v466_v27  ;;  %v396_v17 = vrot.slane %v394_v43, 7  ;;  %v305_v53 = vmax.bf16 %v287_v48, %v3625_v31  ;;  %v285_v54 = vpop.permute.xlu0 %284  ;;  %v478_v41 = vld [vmem:[#allocation2 + $0x2c] sm:$0x1] }
  0xbc   : > { %465 = vst [vmem:[#allocation2 + $0x18] sm:$0xf] %v464_v49  ;;  %468 = vst [vmem:[#allocation2 + $0x1c] sm:$0x1] %v467_v50  ;;  %v452_v55 = vsel %vm3563_vm6, %v375_v45, %v451_v34  ;;  %v455_v57 = vsel %vm3589_vm9, %v376_v46, %v454_v42  ;;  %v380_v60 = vrot.slane %v378_v15, 7  ;;  %v304_v61 = vmax.bf16 %v285_v54, %v3635_v38 }
  0xbd   : > { %453 = vst [vmem:[#allocation2 + $0x8] sm:$0xf] %v452_v55  ;;  %456 = vst [vmem:[#allocation2 + $0xc] sm:$0x1] %v455_v57  ;;  %v399_v62 = vor.u32 %v397_v44, %v396_v17  ;;  %v400_v63 = vrot.slane %v396_v17, 4  ;;  %v410_v31 = vshrl.u32 %v305_v53, 16 }
  0xbe   : > { %v413_v4 = vshll.u32 %v305_v53, 16  ;;  %v383_v5 = vor.u32 %v381_v47, %v380_v60  ;;  %v384_v9 = vrot.slane %v380_v60, 4  ;;  %v402_v10 = vshrl.u32 %v304_v61, 16  ;;  %v291_v20 = vpop.permute.xlu1 %290  ;;  %v475_v34 = vld [vmem:[#allocation2 + $0x28] sm:$0xf] }
  0xbf   : > { %v405_v16 = vshll.u32 %v304_v61, 16  ;;  %v470_v21 = vsel %vm3563_vm6, %v399_v62, %v469_v52  ;;  %v473_v22 = vsel %vm3589_vm9, %v400_v63, %v472_v58  ;;  %v412_v38 = vrot.slane %v410_v31, 7  ;;  %v289_v27 = vpop.permute.xlu0 %288  ;;  %v493_v45 = vld [vmem:[#allocation2 + $0x40] sm:$0xf]  ;;  %v496_v46 = vld [vmem:[#allocation2 + $0x44] sm:$0x1] }
  0xc0   : > { %v307_v24 = vmax.bf16 %v291_v20, %v3651_v51  ;;  %471 = vst [vmem:[#allocation2 + $0x20] sm:$0xf] %v470_v21  ;;  %474 = vst [vmem:[#allocation2 + $0x24] sm:$0x1] %v473_v22  ;;  %v458_v29 = vsel %vm3563_vm6, %v383_v5, %v457_v59  ;;  %v461_v11 = vsel %vm3589_vm9, %v384_v9, %v460_v0  ;;  %v404_v35 = vrot.slane %v402_v10, 7 }
  0xc1   : > { %v306_v36 = vmax.bf16 %v289_v27, %v3659_v56  ;;  %459 = vst [vmem:[#allocation2 + $0x10] sm:$0xf] %v458_v29  ;;  %462 = vst [vmem:[#allocation2 + $0x14] sm:$0x1] %v461_v11  ;;  %v415_v37 = vor.u32 %v413_v4, %v412_v38  ;;  %v416_v40 = vrot.slane %v412_v38, 4  ;;  %v3725_v52 = vrot.slane %v562_v26, 4 }
  0xc2   : > { %v426_v51 = vshrl.u32 %v307_v24, 16  ;;  %v429_v42 = vshll.u32 %v307_v24, 16  ;;  %v407_v43 = vor.u32 %v405_v16, %v404_v35  ;;  %v408_v44 = vrot.slane %v404_v35, 4  ;;  %v3716_v48 = vld [vmem:[#allocation2 + $0x4c] sm:$0x1] }
  0xc3   : > { %v418_v15 = vshrl.u32 %v306_v36, 16  ;;  %v421_v47 = vshll.u32 %v306_v36, 16  ;;  %v482_v49 = vsel %vm3563_vm6, %v415_v37, %v481_v23  ;;  %v485_v56 = vsel %vm3589_vm9, %v416_v40, %v484_v30  ;;  %v487_v54 = vld [vmem:[#allocation2 + $0x38] sm:$0xf]  ;;  %v703_v10 = vld [vmem:[#allocation2 + $0x1c] sm:$0x1] }
  0xc4   : > { %v428_v50 = vrot.slane %v426_v51, 7  ;;  %483 = vst [vmem:[#allocation2 + $0x30] sm:$0xf] %v482_v49  ;;  %486 = vst [vmem:[#allocation2 + $0x34] sm:$0x1] %v485_v56  ;;  %v476_v17 = vsel %vm3563_vm6, %v407_v43, %v475_v34  ;;  %v479_v53 = vsel %vm3589_vm9, %v408_v44, %v478_v41  ;;  %v3733_v57 = vrot.slane %v565_v32, 5 }
  0xc5   : > { %v420_v55 = vrot.slane %v418_v15, 7  ;;  %477 = vst [vmem:[#allocation2 + $0x28] sm:$0xf] %v476_v17  ;;  %480 = vst [vmem:[#allocation2 + $0x2c] sm:$0x1] %v479_v53  ;;  %v3737_v26 = vrot.slane %v1248_v33, 4  ;;  %v734_v56 = vsel %vm3760_vm0, %v2986_v25, %v733_v7 }
  0xc6   : > { %v431_v58 = vor.u32 %v429_v42, %v428_v50  ;;  %v432_v6 = vrot.slane %v428_v50, 4  ;;  %v3741_v59 = vrot.slane %v1251_v39, 5  ;;  %v698_v62 = vld [vmem:[#allocation2 + $0x8] sm:$0xe]  ;;  %v699_v63 = vld [vmem:[#allocation2 + $0xc] sm:$0x1]  ;;  %v568_v25 = vsel %vm3772_vm1, %v3725_v52, %v3733_v57 }
  0xc7   : > { %v423_v60 = vor.u32 %v421_v47, %v420_v55  ;;  %v424_v61 = vrot.slane %v420_v55, 4  ;;  %v1257_v18 = vshll.u32 %v3716_v48, 16  ;;  %v3258_v31 = vld [vmem:[#allocation2 + $0x18] ss:$8 sps:$4 sm:$0xff]   ;;  %v2987_v4 = vrot.slane %v698_v62, 9 }
  0xc8   : > { %v494_v32 = vsel %vm3563_vm6, %v431_v58, %v493_v45  ;;  %v497_v0 = vsel %vm3589_vm9, %v432_v6, %v496_v46  ;;  %v3259_v39 = vld [vmem:[#allocation2 + $0x8] ss:$8 sps:$4 sm:$0xff]   ;;  %822 = vrot.lane.b32.xlu1 %v3258_v31, %s3395_s12  ;;  %v737_v5 = vrot.slane %v699_v63, 5  ;;  %v702_v9 = vld [vmem:[#allocation2 + $0x18] sm:$0xe]  ;;  %v745_v27 = vrot.slane %v703_v10, 5 }
  0xc9   : > { %495 = vst [vmem:[#allocation2 + $0x40] sm:$0xf] %v494_v32  ;;  %498 = vst [vmem:[#allocation2 + $0x44] sm:$0x1] %v497_v0  ;;  %v488_v19 = vsel %vm3563_vm6, %v423_v60, %v487_v54  ;;  %v491_v33 = vsel %vm3589_vm9, %v424_v61, %v490_v8  ;;  %820 = vrot.lane.b32.xlu0 %v3259_v39, %s3395_s12  ;;  %v3260_v16 = vld [vmem:[#allocation2 + $0x10] ss:$8 sps:$4 sm:$0xff]   ;;  %v1254_v7 = vor.u32 %v3741_v59, %v3737_v26 }
  0xca   : > { %489 = vst [vmem:[#allocation2 + $0x38] sm:$0xf] %v488_v19  ;;  %492 = vst [vmem:[#allocation2 + $0x3c] sm:$0x1] %v491_v33  ;;  %v700_v20 = vld [vmem:[#allocation2 + $0x10] sm:$0xe]  ;;  %v738_v50 = vsel %vm3760_vm0, %v2987_v4, %v737_v5 }
  0xcb   : > { %v701_v21 = vld [vmem:[#allocation2 + $0x14] sm:$0x1]  ;;  %v3754_v1 = vld [vmem:[#allocation2 + $0x8] sm:$0xe]  ;;  %v995_v22 = vld [vmem:[#allocation2 + $0xc] sm:$0x1]  ;;  %v2994_v32 = vcombine.low %v734_v56, %v738_v50 }
  0xcc   : > { %v3261_v14 = vld [vmem:[#allocation2 + $0x20] ss:$8 sps:$4 sm:$0xff]   ;;  %v2988_v23 = vrot.slane %v700_v20, 9  ;;  %v741_v38 = vrot.slane %v701_v21, 5  ;;  %v2989_v24 = vrot.slane %v702_v9, 9  ;;  %v3006_v35 = vrot.slane %v3754_v1, 9 }
  0xcd   : > { %1116 = vrot.lane.b32.xlu0 %v3260_v16, %s3396_s14  ;;  %1118 = vrot.lane.b32.xlu1 %v3261_v14, %s3396_s14  ;;  %v3262_v29 = vld [vmem:[#allocation2 + $0x28] ss:$8 sps:$4 sm:$0xff]   ;;  %v997_v34 = vld [vmem:[#allocation2 + $0x14] sm:$0x1]  ;;  %v1028_v36 = vrot.slane %v995_v22, 5  ;;  %vm832_vm6 = vcmask 130144  }
  0xce   : > { %v996_v30 = vld [vmem:[#allocation2 + $0x10] sm:$0xe]  ;;  %v3765_v37 = vld [vmem:[#allocation2 + $0x18] sm:$0xe]  ;;  %v1032_v51 = vrot.slane %v997_v34, 5  ;;  %v742_v58 = vsel %vm3760_vm0, %v2988_v23, %v741_v38  ;;  %v746_v0 = vsel %vm3760_vm0, %v2989_v24, %v745_v27  ;;  %vm989_vm9 = vcmask 162944  }
  0xcf   : > { %v3007_v41 = vrot.slane %v996_v30, 9  ;;  %v999_v42 = vld [vmem:[#allocation2 + $0x1c] sm:$0x1]  ;;  %v1000_v43 = vld [vmem:[#allocation2 + $0x20] sm:$0xe]  ;;  %v3008_v15 = vrot.slane %v3765_v37, 9  ;;  %v2995_v4 = vcombine.low %v742_v58, %v746_v0  ;;  %v1029_v21 = vsel %vm3760_vm0, %v3006_v35, %v1028_v36 }
  0xd0   : > { %v3265_v45 = vld [vmem:[#allocation2 + $0x40] ss:$8 sps:$4 sm:$0xff]   ;;  %v1001_v46 = vld [vmem:[#allocation2 + $0x24] sm:$0x1]  ;;  %v1036_v47 = vrot.slane %v999_v42, 5  ;;  %v3009_v17 = vrot.slane %v1000_v43, 9 }
  0xd1   : > { %v3263_v40 = vld [vmem:[#allocation2 + $0x38] ss:$8 sps:$4 sm:$0xff]   ;;  %824 = vrot.lane.b32.xlu0 %v3262_v29, %s3395_s12  ;;  %v1040_v53 = vrot.slane %v1001_v46, 5  ;;  %v1290_v54 = vld [vmem:[#allocation2 + $0x10] sm:$0xe]  ;;  %v1033_v5 = vsel %vm3760_vm0, %v3007_v41, %v1032_v51 }
  0xd2   : > { %826 = vrot.lane.b32.xlu1 %v3263_v40, %s3395_s12  ;;  %v3264_v44 = vld [vmem:[#allocation2 + $0x30] ss:$8 sps:$4 sm:$0xff]   ;;  %v1291_v55 = vld [vmem:[#allocation2 + $0x14] sm:$0x1]  ;;  %v1293_v8 = vld [vmem:[#allocation2 + $0x1c] sm:$0x1]  ;;  %v3014_v35 = vcombine.low %v1029_v21, %v1033_v5  ;;  %v1037_v36 = vsel %vm3760_vm0, %v3008_v15, %v1036_v47 }
  0xd3   : > { %v1292_v6 = vld [vmem:[#allocation2 + $0x18] sm:$0xe]  ;;  %v3026_v60 = vrot.slane %v1290_v54, 9  ;;  %v1324_v61 = vrot.slane %v1291_v55, 5  ;;  %v1328_v62 = vrot.slane %v1293_v8, 5  ;;  %v1041_v1 = vsel %vm3760_vm0, %v3009_v17, %v1040_v53 }
  0xd4   : > { %v3027_v13 = vrot.slane %v1292_v6, 9  ;;  %v708_v12 = vld [vmem:[#allocation2 + $0x30] sm:$0xe]  ;;  %v709_v63 = vld [vmem:[#allocation2 + $0x34] sm:$0x1]  ;;  %v3015_v17 = vcombine.low %v1037_v36, %v1041_v1 }
  0xd5   : > { %1120 = vrot.lane.b32.xlu0 %v3264_v44, %s3396_s14  ;;  %v710_v31 = vld [vmem:[#allocation2 + $0x38] sm:$0xe]  ;;  %v711_v19 = vld [vmem:[#allocation2 + $0x3c] sm:$0x1]  ;;  %v2992_v33 = vrot.slane %v708_v12, 9  ;;  %v757_v39 = vrot.slane %v709_v63, 5  ;;  %v1325_v24 = vsel %vm3760_vm0, %v3026_v60, %v1324_v61 }
  0xd6   : > { %1122 = vrot.lane.b32.xlu1 %v3265_v45, %s3396_s14  ;;  %v2993_v9 = vrot.slane %v710_v31, 9  ;;  %v761_v10 = vrot.slane %v711_v19, 5  ;;  %v1294_v16 = vld [vmem:[#allocation2 + $0x20] sm:$0xe]  ;;  %v1295_v20 = vld [vmem:[#allocation2 + $0x24] sm:$0x1]  ;;  %v1329_v43 = vsel %vm3760_vm0, %v3027_v13, %v1328_v62 }
  0xd7   : > { %v1296_v22 = vld [vmem:[#allocation2 + $0x28] sm:$0xe]  ;;  %v1297_v14 = vld [vmem:[#allocation2 + $0x2c] sm:$0x1]  ;;  %v3028_v23 = vrot.slane %v1294_v16, 9  ;;  %v1332_v38 = vrot.slane %v1295_v20, 5  ;;  %v758_v44 = vsel %vm3760_vm0, %v2992_v33, %v757_v39  ;;  %v3034_v53 = vcombine.low %v1325_v24, %v1329_v43 }
  0xd8   : > { %v762_v27 = vsel %vm3760_vm0, %v2993_v9, %v761_v10  ;;  %v3029_v29 = vrot.slane %v1296_v22, 9  ;;  %v1336_v30 = vrot.slane %v1297_v14, 5  ;;  %v1006_v34 = vld [vmem:[#allocation2 + $0x38] sm:$0xe]  ;;  %v1007_v37 = vld [vmem:[#allocation2 + $0x3c] sm:$0x1] }
  0xd9   : > { %775 = vrot.lane.b32.xlu0 %v2994_v32, %s3397_s15  ;;  %v1008_v40 = vld [vmem:[#allocation2 + $0x40] sm:$0xe]  ;;  %v1009_v41 = vld [vmem:[#allocation2 + $0x44] sm:$0x1]  ;;  %v3012_v51 = vrot.slane %v1006_v34, 9  ;;  %v1052_v42 = vrot.slane %v1007_v37, 5  ;;  %v2997_v54 = vcombine.low %v758_v44, %v762_v27  ;;  %v1333_v47 = vsel %vm3760_vm0, %v3028_v23, %v1332_v38 }
  0xda   : > { %777 = vrot.lane.b32.xlu1 %v2995_v4, %s3397_s15  ;;  %v3013_v45 = vrot.slane %v1008_v40, 9  ;;  %v1056_v46 = vrot.slane %v1009_v41, 5  ;;  %v704_v56 = vld [vmem:[#allocation2 + $0x20] sm:$0xe]  ;;  %v705_v50 = vld [vmem:[#allocation2 + $0x24] sm:$0x1]  ;;  %v1337_v6 = vsel %vm3760_vm0, %v3029_v29, %v1336_v30 }
  0xdb   : > { %v706_v55 = vld [vmem:[#allocation2 + $0x28] sm:$0xe]  ;;  %v707_v58 = vld [vmem:[#allocation2 + $0x2c] sm:$0x1]  ;;  %v2990_v15 = vrot.slane %v704_v56, 9  ;;  %v1053_v62 = vsel %vm3760_vm0, %v3012_v51, %v1052_v42  ;;  %v749_v19 = vrot.slane %v705_v50, 5  ;;  %v3035_v9 = vcombine.low %v1333_v47, %v1337_v6 }
  0xdc   : > { %v2991_v8 = vrot.slane %v706_v55, 9  ;;  %v753_v60 = vrot.slane %v707_v58, 5  ;;  %v540_v61 = vld [vmem:[#allocation2 + $0x10] sm:$0xf]  ;;  %v541_v13 = vld [vmem:[#allocation2 + $0x14] sm:$0x1]  ;;  %v1057_v12 = vsel %vm3760_vm0, %v3013_v45, %v1056_v46 }
  0xdd   : > { %1070 = vrot.lane.b32.xlu0 %v3014_v35, %s3398_s16  ;;  %v542_v63 = vld [vmem:[#allocation2 + $0x18] sm:$0xf]  ;;  %v543_v32 = vld [vmem:[#allocation2 + $0x1c] sm:$0x1]  ;;  %v584_v0 = vshrl.u32 %v540_v61, 16  ;;  %v587_v31 = vshll.u32 %v540_v61, 16  ;;  %v3017_v1 = vcombine.low %v1053_v62, %v1057_v12  ;;  %v750_v37 = vsel %vm3760_vm0, %v2990_v15, %v749_v19 }
  0xde   : > { %1072 = vrot.lane.b32.xlu1 %v3015_v17, %s3398_s16  ;;  %v593_v33 = vshll.u32 %v541_v13, 16  ;;  %v598_v39 = vshrl.u32 %v542_v63, 16  ;;  %v601_v4 = vshll.u32 %v542_v63, 16  ;;  %v1002_v5 = vld [vmem:[#allocation2 + $0x28] sm:$0xe]  ;;  %v607_v20 = vshll.u32 %v543_v32, 16 }
  0xdf   : > { %v586_v10 = vrot.slane %v584_v0, 4  ;;  %v589_v16 = vrot.slane %v587_v31, 5  ;;  %v1003_v21 = vld [vmem:[#allocation2 + $0x2c] sm:$0x1]  ;;  %v1004_v23 = vld [vmem:[#allocation2 + $0x30] sm:$0xe]  ;;  %v754_v24 = vsel %vm3760_vm0, %v2991_v8, %v753_v60 }
  0xe0   : > { %v600_v22 = vrot.slane %v598_v39, 4  ;;  %v603_v14 = vrot.slane %v601_v4, 5  ;;  %v3010_v38 = vrot.slane %v1002_v5, 9  ;;  %v1005_v29 = vld [vmem:[#allocation2 + $0x34] sm:$0x1]  ;;  %v1044_v30 = vrot.slane %v1003_v21, 5 }
  0xe1   : > { %1366 = vrot.lane.b32.xlu0 %v3034_v53, %s3399_s8  ;;  %v590_v27 = vor.u32 %v589_v16, %v586_v10  ;;  %v3011_v34 = vrot.slane %v1004_v23, 9  ;;  %v595_v35 = vrot.slane %v593_v33, 5  ;;  %v1048_v40 = vrot.slane %v1005_v29, 5  ;;  %v841_v41 = vld [vmem:[#allocation2 + $0x18] sm:$0xf] }
  0xe2   : > { %781 = vrot.lane.b32.xlu1 %v2997_v54, %s3397_s15  ;;  %v604_v36 = vor.u32 %v603_v14, %v600_v22  ;;  %v842_v51 = vld [vmem:[#allocation2 + $0x1c] sm:$0x1]  ;;  %v609_v43 = vrot.slane %v607_v20, 5  ;;  %v1045_v44 = vsel %vm3760_vm0, %v3010_v38, %v1044_v30  ;;  %v843_v45 = vld [vmem:[#allocation2 + $0x20] sm:$0xf]  ;;  %v882_v46 = vshrl.u32 %v841_v41, 16 }
  0xe3   : > { %v591_v42 = vrot.slane %v590_v27, 4  ;;  %v2996_v56 = vcombine.low %v750_v37, %v754_v24  ;;  %v1049_v17 = vsel %vm3760_vm0, %v3011_v34, %v1048_v40  ;;  %v844_v53 = vld [vmem:[#allocation2 + $0x24] sm:$0x1]  ;;  %v885_v54 = vshll.u32 %v841_v41, 16  ;;  %v538_v55 = vld [vmem:[#allocation2 + $0x8] sm:$0xf] }
  0xe4   : > { %v605_v50 = vrot.slane %v604_v36, 4  ;;  %v884_v15 = vrot.slane %v882_v46, 4  ;;  %v891_v47 = vshll.u32 %v842_v51, 16  ;;  %v896_v6 = vshrl.u32 %v843_v45, 16  ;;  %v539_v8 = vld [vmem:[#allocation2 + $0xc] sm:$0x1] }
  0xe5   : > { %1368 = vrot.lane.b32.xlu0 %v3035_v9, %s3399_s8  ;;  %v596_v58 = vsel %vm3772_vm1, %v591_v42, %v595_v35  ;;  %v3016_v61 = vcombine.low %v1045_v44, %v1049_v17  ;;  %v887_v13 = vrot.slane %v885_v54, 5  ;;  %v899_v62 = vshll.u32 %v843_v45, 16  ;;  %v1137_v12 = vld [vmem:[#allocation2 + $0x20] sm:$0xf]  ;;  %v1138_v19 = vld [vmem:[#allocation2 + $0x24] sm:$0x1] }
  0xe6   : > { %1076 = vrot.lane.b32.xlu1 %v3017_v1, %s3398_s16  ;;  %v610_v60 = vsel %vm3772_vm1, %v605_v50, %v609_v43  ;;  %v898_v32 = vrot.slane %v896_v6, 4  ;;  %v905_v0 = vshll.u32 %v844_v53, 16  ;;  %v570_v31 = vshrl.u32 %v538_v55, 16  ;;  %v1139_v9 = vld [vmem:[#allocation2 + $0x28] sm:$0xf] }
  0xe7   : > { %v2983_v63 = vcombine.low %v596_v58, %v610_v60  ;;  %v888_v33 = vor.u32 %v887_v13, %v884_v15  ;;  %v901_v39 = vrot.slane %v899_v62, 5  ;;  %v573_v4 = vshll.u32 %v538_v55, 16  ;;  %v1140_v38 = vld [vmem:[#allocation2 + $0x2c] sm:$0x1]  ;;  %v837_v34 = vld [vmem:[#allocation2 + $0x8] sm:$0xf] }
  0xe8   : > { %v579_v5 = vshll.u32 %v539_v8, 16  ;;  %v893_v10 = vrot.slane %v891_v47, 5  ;;  %v572_v16 = vrot.slane %v570_v31, 4  ;;  %v1178_v20 = vshrl.u32 %v1137_v12, 16  ;;  %v838_v44 = vld [vmem:[#allocation2 + $0xc] sm:$0x1] }
  0xe9   : > { %779 = vrot.lane.b32.xlu0 %v2996_v56, %s3397_s15  ;;  %v1181_v21 = vshll.u32 %v1137_v12, 16  ;;  %v889_v1 = vrot.slane %v888_v33, 4  ;;  %v902_v22 = vor.u32 %v901_v39, %v898_v32  ;;  %v907_v14 = vrot.slane %v905_v0, 5  ;;  %v839_v50 = vld [vmem:[#allocation2 + $0x10] sm:$0xf] }
  0xea   : > { %681 = vrot.lane.b32.xlu1 %v2983_v63, %s3400_s7  ;;  %v575_v23 = vrot.slane %v573_v4, 5  ;;  %v1180_v24 = vrot.slane %v1178_v20, 4  ;;  %v1187_v29 = vshll.u32 %v1138_v19, 16  ;;  %v1192_v30 = vshrl.u32 %v1139_v9, 16  ;;  %v840_v58 = vld [vmem:[#allocation2 + $0x14] sm:$0x1] }
  0xeb   : > { %v1183_v27 = vrot.slane %v1181_v21, 5  ;;  %v903_v37 = vrot.slane %v902_v22, 4  ;;  %v581_v36 = vrot.slane %v579_v5, 5  ;;  %v1195_v40 = vshll.u32 %v1139_v9, 16  ;;  %v545_v32 = vld [vmem:[#allocation2 + $0x24] sm:$0x1] }
  0xec   : > { %v576_v35 = vor.u32 %v575_v23, %v572_v16  ;;  %v894_v41 = vsel %vm3772_vm1, %v889_v1, %v893_v10  ;;  %v1194_v42 = vrot.slane %v1192_v30, 4  ;;  %v1201_v43 = vshll.u32 %v1140_v38, 16  ;;  %v546_v39 = vld [vmem:[#allocation2 + $0x28] sm:$0xf]  ;;  %v547_v9 = vld [vmem:[#allocation2 + $0x2c] sm:$0x1] }
  0xed   : > { %1074 = vrot.lane.b32.xlu0 %v3016_v61, %s3398_s16  ;;  %v1184_v51 = vor.u32 %v1183_v27, %v1180_v24  ;;  %v908_v45 = vsel %vm3772_vm1, %v903_v37, %v907_v14  ;;  %v1197_v56 = vrot.slane %v1195_v40, 5  ;;  %v854_v17 = vshrl.u32 %v837_v34, 16  ;;  %v544_v61 = vld [vmem:[#allocation2 + $0x20] sm:$0xf]  ;;  %v1133_v21 = vld [vmem:[#allocation2 + $0x10] sm:$0xf] }
  0xee   : > { %v577_v46 = vrot.slane %v576_v35, 4  ;;  %v3003_v53 = vcombine.low %v894_v41, %v908_v45  ;;  %v1189_v55 = vrot.slane %v1187_v29, 5  ;;  %v857_v15 = vshll.u32 %v837_v34, 16  ;;  %v1134_v30 = vld [vmem:[#allocation2 + $0x14] sm:$0x1]  ;;  %v3269_v34 = vld [vmem:[%s4424_s1] sm:$0xff]  }
  0xef   : > { %v1185_v54 = vrot.slane %v1184_v51, 4  ;;  %v1198_v6 = vor.u32 %v1197_v56, %v1194_v42  ;;  %v856_v8 = vrot.slane %v854_v17, 4  ;;  %v863_v60 = vshll.u32 %v838_v44, 16  ;;  %v1135_v40 = vld [vmem:[#allocation2 + $0x18] sm:$0xf]  ;;  %3155 = vmatprep.subr.bf16.mxu0 %v3269_v34 }
  0xf0   : > { %v582_v47 = vsel %vm3772_vm1, %v577_v46, %v581_v36  ;;  %979 = vrot.lane.b32.xlu1 %v3003_v53, %s3401_s9  ;;  %v1203_v62 = vrot.slane %v1201_v43, 5  ;;  %v859_v12 = vrot.slane %v857_v15, 5  ;;  %v868_v63 = vshrl.u32 %v839_v50, 16  ;;  %v1136_v56 = vld [vmem:[#allocation2 + $0x1c] sm:$0x1]  ;;  %3156 = vmatpush3.bf16.msra.mxu0 %v3269_v34 }
  0xf1   : > { %v2982_v13 = vcombine.low %v568_v25, %v582_v47  ;;  %v1190_v0 = vsel %vm3772_vm1, %v1185_v54, %v1189_v55  ;;  %v1199_v31 = vrot.slane %v1198_v6, 4  ;;  %v871_v19 = vshll.u32 %v839_v50, 16  ;;  %v548_v15 = vld [vmem:[#allocation2 + $0x30] sm:$0xf] }
  0xf2   : > { %v877_v33 = vshll.u32 %v840_v58, 16  ;;  %v860_v4 = vor.u32 %v859_v12, %v856_v8  ;;  %v870_v5 = vrot.slane %v868_v63, 4  ;;  %v612_v10 = vshrl.u32 %v544_v61, 16 }
  0xf3   : > { %679 = vrot.lane.b32.xlu0 %v2982_v13, %s3400_s7  ;;  %v615_v16 = vshll.u32 %v544_v61, 16  ;;  %v1204_v52 = vsel %vm3772_vm1, %v1199_v31, %v1203_v62  ;;  %v865_v57 = vrot.slane %v863_v60, 5  ;;  %v873_v25 = vrot.slane %v871_v19, 5  ;;  %v549_v61 = vld [vmem:[#allocation2 + $0x34] sm:$0x1] }
  0xf4   : > { %v621_v20 = vshll.u32 %v545_v32, 16  ;;  %v3023_v1 = vcombine.low %v1190_v0, %v1204_v52  ;;  %v861_v22 = vrot.slane %v860_v4, 4  ;;  %v614_v14 = vrot.slane %v612_v10, 4  ;;  %v550_v13 = vld [vmem:[#allocation2 + $0x38] sm:$0xf] }
  0xf5   : > { %v617_v23 = vrot.slane %v615_v16, 5  ;;  %v874_v38 = vor.u32 %v873_v25, %v870_v5  ;;  %v879_v24 = vrot.slane %v877_v33, 5  ;;  %v626_v27 = vshrl.u32 %v546_v39, 16  ;;  %v551_v19 = vld [vmem:[#allocation2 + $0x3c] sm:$0x1] }
  0xf6   : > { %v629_v29 = vshll.u32 %v546_v39, 16  ;;  %1275 = vrot.lane.b32.xlu1 %v3023_v1, %s3402_s13  ;;  %v623_v35 = vrot.slane %v621_v20, 5  ;;  %v635_v36 = vshll.u32 %v547_v9, 16  ;;  %v1150_v41 = vshrl.u32 %v1133_v21, 16  ;;  %v845_v16 = vld [vmem:[#allocation2 + $0x28] sm:$0xf] }
  0xf7   : > { %v618_v37 = vor.u32 %v617_v23, %v614_v14  ;;  %v875_v51 = vrot.slane %v874_v38, 4  ;;  %v628_v42 = vrot.slane %v626_v27, 4  ;;  %v1153_v44 = vshll.u32 %v1133_v21, 16  ;;  %v847_v21 = vld [vmem:[#allocation2 + $0x30] sm:$0xf] }
  0xf8   : > { %v631_v43 = vrot.slane %v629_v29, 5  ;;  %v866_v45 = vsel %vm3772_vm1, %v861_v22, %v865_v57  ;;  %v1152_v50 = vrot.slane %v1150_v41, 4  ;;  %v1159_v17 = vshll.u32 %v1134_v30, 16  ;;  %v846_v38 = vld [vmem:[#allocation2 + $0x2c] sm:$0x1] }
  0xf9   : > { %v619_v46 = vrot.slane %v618_v37, 4  ;;  %v880_v53 = vsel %vm3772_vm1, %v875_v51, %v879_v24  ;;  %v1155_v55 = vrot.slane %v1153_v44, 5  ;;  %v1164_v58 = vshrl.u32 %v1135_v40, 16  ;;  %v3271_v24 = vld [vmem:[%s4424_s1 + $0x8] sm:$0xff]  }
  0xfa   : > { %v632_v54 = vor.u32 %v631_v43, %v628_v42  ;;  %v3002_v47 = vcombine.low %v866_v45, %v880_v53  ;;  %v637_v8 = vrot.slane %v635_v36, 5  ;;  %v1167_v60 = vshll.u32 %v1135_v40, 16  ;;  %3157 = vmatprep.subr.bf16.mxu0 %v3271_v24  ;;  %v849_v45 = vld [vmem:[#allocation2 + $0x38] sm:$0xf]  ;;  %v850_v53 = vld [vmem:[#allocation2 + $0x3c] sm:$0x1] }
  0xfb   : > { %v624_v6 = vsel %vm3772_vm1, %v619_v46, %v623_v35  ;;  %v1156_v12 = vor.u32 %v1155_v55, %v1152_v50  ;;  %v1166_v63 = vrot.slane %v1164_v58, 4  ;;  %v1173_v32 = vshll.u32 %v1136_v56, 16  ;;  %v848_v35 = vld [vmem:[#allocation2 + $0x34] sm:$0x1]  ;;  %3158 = vmatpush3.bf16.msra.mxu0 %v3271_v24 }
  0xfc   : > { %v633_v62 = vrot.slane %v632_v54, 4  ;;  %977 = vrot.lane.b32.xlu0 %v3002_v47, %s3401_s9  ;;  %v1161_v0 = vrot.slane %v1159_v17, 5  ;;  %v1169_v31 = vrot.slane %v1167_v60, 5  ;;  %v640_v33 = vshrl.u32 %v548_v15, 16  ;;  %v851_v54 = vld [vmem:[#allocation2 + $0x40] sm:$0xf] }
  0xfd   : > { %v643_v39 = vshll.u32 %v548_v15, 16  ;;  %v1157_v5 = vrot.slane %v1156_v12, 4  ;;  %v649_v9 = vshll.u32 %v549_v61, 16  ;;  %v654_v10 = vshrl.u32 %v550_v13, 16 }
  0xfe   : > { %v638_v4 = vsel %vm3772_vm1, %v633_v62, %v637_v8  ;;  %v1170_v57 = vor.u32 %v1169_v31, %v1166_v63  ;;  %v642_v25 = vrot.slane %v640_v33, 4  ;;  %v1175_v22 = vrot.slane %v1173_v32, 5  ;;  %v1141_v8 = vld [vmem:[#allocation2 + $0x30] sm:$0xf]  ;;  %v852_v62 = vld [vmem:[#allocation2 + $0x44] sm:$0x1] }
  0xff   : > { %v2984_v52 = vcombine.low %v624_v6, %v638_v4  ;;  %v645_v20 = vrot.slane %v643_v39, 5  ;;  %v1162_v1 = vsel %vm3772_vm1, %v1157_v5, %v1161_v0  ;;  %v656_v14 = vrot.slane %v654_v10, 4  ;;  %v1143_v63 = vld [vmem:[#allocation2 + $0x38] sm:$0xf]  ;;  %v1142_v10 = vld [vmem:[#allocation2 + $0x34] sm:$0x1] }
 0x100   : > { %v657_v23 = vshll.u32 %v550_v13, 16  ;;  %v1171_v27 = vrot.slane %v1170_v57, 4  ;;  %v663_v30 = vshll.u32 %v551_v19, 16  ;;  %v910_v34 = vshrl.u32 %v845_v16, 16  ;;  %v3266_v32 = vld [vmem:[#allocation2 + $0x10] ss:$8 sps:$4 sm:$0xff]  }
 0x101   : > { %683 = vrot.lane.b32.xlu1 %v2984_v52, %s3400_s7  ;;  %v646_v29 = vor.u32 %v645_v20, %v642_v25  ;;  %v913_v36 = vshll.u32 %v845_v16, 16  ;;  %v924_v40 = vshrl.u32 %v847_v21, 16  ;;  %v3882_v41 = vrot.slane %v1254_v7, 4  ;;  %533 = vst.msk [vmem:[#allocation4 + $0x8] sm:$0xff] %vm531_vm2, %v3266_v32  ;;  %v3267_v16 = vld [vmem:[#allocation2] ss:$8 sps:$4 sm:$0xff]  }
 0x102   : > { %v659_v37 = vrot.slane %v657_v23, 5  ;;  %v1176_v51 = vsel %vm3772_vm1, %v1171_v27, %v1175_v22  ;;  %v912_v43 = vrot.slane %v910_v34, 4  ;;  %v919_v44 = vshll.u32 %v846_v38, 16  ;;  %v1145_v20 = vld [vmem:[#allocation2 + $0x40] sm:$0xf]  ;;  %532 = vst.msk [vmem:[#allocation4] sm:$0xff] %vm531_vm2, %v3267_v16 }
 0x103   : > { %v647_v42 = vrot.slane %v646_v29, 4  ;;  %v3022_v46 = vcombine.low %v1162_v1, %v1176_v51  ;;  %v651_v56 = vrot.slane %v649_v9, 5  ;;  %v915_v17 = vrot.slane %v913_v36, 5  ;;  %v3270_v36 = vld [vmem:[#allocation2 + $0x30] ss:$8 sps:$4 sm:$0xff]  }
 0x104   : > { %v660_v50 = vor.u32 %v659_v37, %v656_v14  ;;  %v665_v55 = vrot.slane %v663_v30, 5  ;;  %v926_v58 = vrot.slane %v924_v40, 4  ;;  %v927_v26 = vshll.u32 %v847_v21, 16  ;;  %v3268_v21 = vld [vmem:[#allocation2 + $0x20] ss:$8 sps:$4 sm:$0xff]   ;;  %535 = vst.msk [vmem:[#allocation4 + $0x18] sm:$0xff] %vm531_vm2, %v3270_v36 }
 0x105   : > { %v933_v59 = vshll.u32 %v848_v35, 16  ;;  %1273 = vrot.lane.b32.xlu0 %v3022_v46, %s3402_s13  ;;  %v916_v15 = vor.u32 %v915_v17, %v912_v43  ;;  %v938_v47 = vshrl.u32 %v849_v45, 16  ;;  %v941_v6 = vshll.u32 %v849_v45, 16  ;;  %534 = vst.msk [vmem:[#allocation4 + $0x10] sm:$0xff] %vm531_vm2, %v3268_v21  ;;  %v1144_v43 = vld [vmem:[#allocation2 + $0x3c] sm:$0x1] }
 0x106   : > { %v661_v7 = vrot.slane %v660_v50, 4  ;;  %v652_v60 = vsel %vm3772_vm1, %v647_v42, %v651_v56  ;;  %v921_v61 = vrot.slane %v919_v44, 5  ;;  %v929_v13 = vrot.slane %v927_v26, 5  ;;  %v1304_v45 = vld [vmem:[#allocation2 + $0x48] sm:$0xe] }
 0x107   : > { %v952_v12 = vshrl.u32 %v851_v54, 16  ;;  %v917_v31 = vrot.slane %v916_v15, 4  ;;  %v940_v19 = vrot.slane %v938_v47, 4  ;;  %v943_v33 = vrot.slane %v941_v6, 5  ;;  %v1146_v17 = vld [vmem:[#allocation2 + $0x44] sm:$0x1] }
 0x108   : > { %v666_v0 = vsel %vm3772_vm1, %v661_v7, %v665_v55  ;;  %v930_v4 = vor.u32 %v929_v13, %v926_v58  ;;  %v935_v5 = vrot.slane %v933_v59, 5  ;;  %v947_v9 = vshll.u32 %v850_v53, 16  ;;  %v1305_v58 = vld [vmem:[#allocation2 + $0x4c] sm:$0x1]  ;;  %v1301_v13 = vld [vmem:[#allocation2 + $0x3c] sm:$0x1] }
 0x109   : > { %v2985_v39 = vcombine.low %v652_v60, %v666_v0  ;;  %v944_v52 = vor.u32 %v943_v33, %v940_v19  ;;  %v954_v57 = vrot.slane %v952_v12, 4  ;;  %v955_v25 = vshll.u32 %v851_v54, 16  ;;  %v1298_v60 = vld [vmem:[#allocation2 + $0x30] sm:$0xe]  ;;  %v1302_v32 = vld [vmem:[#allocation2 + $0x40] sm:$0xe] }
 0x10a   : > { %v922_v1 = vsel %vm3772_vm1, %v917_v31, %v921_v61  ;;  %v931_v22 = vrot.slane %v930_v4, 4  ;;  %v1206_v14 = vshrl.u32 %v1141_v8, 16  ;;  %v1209_v23 = vshll.u32 %v1141_v8, 16  ;;  %v1300_v61 = vld [vmem:[#allocation2 + $0x38] sm:$0xe] }
 0x10b   : > { %685 = vrot.lane.b32.xlu1 %v2985_v39, %s3400_s7  ;;  %v945_v38 = vrot.slane %v944_v52, 4  ;;  %v957_v24 = vrot.slane %v955_v25, 5  ;;  %v961_v27 = vshll.u32 %v852_v62, 16  ;;  %v1220_v29 = vshrl.u32 %v1143_v63, 16  ;;  %v1303_v0 = vld [vmem:[#allocation2 + $0x44] sm:$0x1] }
 0x10c   : > { %v936_v30 = vsel %vm3772_vm1, %v931_v22, %v935_v5  ;;  %v1208_v34 = vrot.slane %v1206_v14, 4  ;;  %v1211_v37 = vrot.slane %v1209_v23, 5  ;;  %v1259_v35 = vrot.slane %v1257_v18, 5  ;;  %v1299_v4 = vld [vmem:[#allocation2 + $0x34] sm:$0x1] }
 0x10d   : > { %v3004_v40 = vcombine.low %v922_v1, %v936_v30  ;;  %v949_v51 = vrot.slane %v947_v9, 5  ;;  %v958_v42 = vor.u32 %v957_v24, %v954_v57  ;;  %v1215_v44 = vshll.u32 %v1142_v10, 16  ;;  %v3272_v5 = vld [vmem:[%s4424_s1 + $0x10] ss:$0 sps:$4 sm:$0x33]  }
 0x10e   : > { %v1212_v46 = vor.u32 %v1211_v37, %v1208_v34  ;;  %v1222_v56 = vrot.slane %v1220_v29, 4  ;;  %v1223_v50 = vshll.u32 %v1143_v63, 16  ;;  %v1234_v53 = vshrl.u32 %v1145_v20, 16  ;;  %3187 = vmatprep.subr.msk.bf16.mxu0 %vm1420_vm3, %v3272_v5 }
 0x10f   : > { %981 = vrot.lane.b32.xlu0 %v3004_v40, %s3401_s9  ;;  %v950_v48 = vsel %vm3772_vm1, %v945_v38, %v949_v51  ;;  %v959_v18 = vrot.slane %v958_v42, 4  ;;  %v963_v54 = vrot.slane %v961_v27, 5  ;;  %v1237_v55 = vshll.u32 %v1145_v20, 16 }
 0x110   : > { %v1225_v26 = vrot.slane %v1223_v50, 5  ;;  %v1229_v59 = vshll.u32 %v1144_v43, 16  ;;  %v1236_v7 = vrot.slane %v1234_v53, 4  ;;  %v3033_v15 = vrot.slane %v1304_v45, 9 }
 0x111   : > { %v964_v47 = vsel %vm3772_vm1, %v959_v18, %v963_v54  ;;  %v1239_v6 = vrot.slane %v1237_v55, 5  ;;  %v1243_v8 = vshll.u32 %v1146_v17, 16  ;;  %v1213_v12 = vrot.slane %v1212_v46, 4 }
 0x112   : > { %v3005_v62 = vcombine.low %v950_v48, %v964_v47  ;;  %v1226_v63 = vor.u32 %v1225_v26, %v1222_v56  ;;  %v1352_v31 = vrot.slane %v1305_v58, 5  ;;  %v1217_v19 = vrot.slane %v1215_v44, 5 }
 0x113   : > { %v1240_v33 = vor.u32 %v1239_v6, %v1236_v7  ;;  %v1260_v39 = vsel %vm3772_vm1, %v3882_v41, %v1259_v35  ;;  %v1231_v10 = vrot.slane %v1229_v59, 5  ;;  %v3031_v16 = vrot.slane %v1300_v61, 9 }
 0x114   : > { %983 = vrot.lane.b32.xlu1 %v3005_v62, %s3401_s9  ;;  %v1227_v9 = vrot.slane %v1226_v63, 4  ;;  %v1344_v52 = vrot.slane %v1301_v13, 5  ;;  %v1245_v25 = vrot.slane %v1243_v8, 5  ;;  %v3032_v20 = vrot.slane %v1302_v32, 9 }
 0x115   : > { %v1241_v57 = vrot.slane %v1240_v33, 4  ;;  %v1348_v21 = vrot.slane %v1303_v0, 5  ;;  %v1218_v1 = vsel %vm3772_vm1, %v1213_v12, %v1217_v19  ;;  %v3030_v22 = vrot.slane %v1298_v60, 9 }
 0x116   : > { %v1232_v41 = vsel %vm3772_vm1, %v1227_v9, %v1231_v10  ;;  %v1340_v14 = vrot.slane %v1299_v4, 5  ;;  %v1345_v27 = vsel %vm3760_vm0, %v3031_v16, %v1344_v52  ;;  %v1353_v30 = vsel %vm3760_vm0, %v3033_v15, %v1352_v31 }
 0x117   : > { %v3024_v23 = vcombine.low %v1218_v1, %v1232_v41  ;;  %v1246_v38 = vsel %vm3772_vm1, %v1241_v57, %v1245_v25  ;;  %v1349_v29 = vsel %vm3760_vm0, %v3032_v20, %v1348_v21  ;;  %v1422_v34 = vsel %vm1420_vm3, %v3272_v5, 0 }
 0x118   : > { %v3025_v24 = vcombine.low %v1246_v38, %v1260_v39  ;;  %v1341_v37 = vsel %vm3760_vm0, %v3030_v22, %v1340_v14  ;;  %3160 = vmatpush3.bf16.msra.mxu0 %v1422_v34  ;;  %v3037_v36 = vcombine.low %v1349_v29, %v1353_v30  ;;  %vm1489_vm2 = vcmask 64512  }
 0x119   : > { %1277 = vrot.lane.b32.xlu0 %v3024_v23, %s3402_s13  ;;  %v3036_v35 = vcombine.low %v1341_v37, %v1345_v27 }
 0x11a   : > { %1279 = vrot.lane.b32.xlu1 %v3025_v24, %s3402_s13 }
 0x11d   : > { %1370 = vrot.lane.b32.xlu0 %v3036_v35, %s3399_s8 }
 0x11e   : > { %1372 = vrot.lane.b32.xlu1 %v3037_v36, %s3399_s8 }
 0x13a   : > { %v823_v40 = vpop.permute.xlu1 %822 }
 0x13b   : > { %v821_v51 = vpop.permute.xlu0 %820 }
 0x13f   : > { %v1119_v42 = vpop.permute.xlu1 %1118  ;;  %v1117_v43 = vpop.permute.xlu0 %1116 }
 0x143   : > { %v825_v45 = vpop.permute.xlu0 %824 }
 0x144   : > { %v827_v44 = vpop.permute.xlu1 %826 }
 0x147   : > { %v1121_v56 = vpop.permute.xlu0 %1120 }
 0x148   : > { %v1123_v46 = vpop.permute.xlu1 %1122 }
 0x14b   : > { %v776_v17 = vpop.permute.xlu0 %775 }
 0x14c   : > { %v778_v50 = vpop.permute.xlu1 %777 }
 0x14f   : > { %v1071_v48 = vpop.permute.xlu0 %1070 }
 0x150   : > { %v1073_v53 = vpop.permute.xlu1 %1072 }
 0x153   : > { %v1367_v54 = vpop.permute.xlu0 %1366 }
 0x154   : > { %v782_v18 = vpop.permute.xlu1 %781 }
 0x157   : > { %v1369_v58 = vpop.permute.xlu0 %1368 }
 0x158   : > { %v1077_v55 = vpop.permute.xlu1 %1076 }
 0x15b   : > { %v780_v59 = vpop.permute.xlu0 %779 }
 0x15c   : > { %v682_v26 = vpop.permute.xlu1 %681 }
 0x15d   : > { %693 = vst.msk [vmem:[#allocation4 + $0x8] sm:$0xff] %vm691_vm4, %v682_v26 }
 0x15e   : > { %789 = vst.msk [vmem:[#allocation4 + $0x8] sm:$0xff] %vm787_vm5, %v778_v50 }
 0x15f   : > { %834 = vst.msk [vmem:[#allocation4 + $0x8] sm:$0xff] %vm832_vm6, %v823_v40  ;;  %v1075_v7 = vpop.permute.xlu0 %1074 }
 0x162   : > { %v980_v15 = vpop.permute.xlu1 %979 }
 0x163   : > { %991 = vst.msk [vmem:[#allocation4 + $0x8] sm:$0xff] %vm989_vm9, %v980_v15 }
 0x164   : > { %1084 = vst.msk [vmem:[#allocation4 + $0x8] sm:$0xff] %vm1082_vm10, %v1073_v53 }
 0x165   : > { %v680_v47 = vpop.permute.xlu0 %679  ;;  %1130 = vst.msk [vmem:[#allocation4 + $0x8] sm:$0xff] %vm1128_vm12, %v1119_v42 }
 0x166   : > { %692 = vst.msk [vmem:[#allocation4] sm:$0xff] %vm691_vm4, %v680_v47 }
 0x167   : > { %788 = vst.msk [vmem:[#allocation4] sm:$0xff] %vm787_vm5, %v776_v17 }
 0x168   : > { %833 = vst.msk [vmem:[#allocation4] sm:$0xff] %vm832_vm6, %v821_v51  ;;  %v1276_v6 = vpop.permute.xlu1 %1275 }
 0x169   : > { %1287 = vst.msk [vmem:[#allocation4 + $0x8] sm:$0xff] %vm1285_vm13, %v1276_v6 }
 0x16a   : > { %1380 = vst.msk [vmem:[#allocation4 + $0x8] sm:$0xff] %vm1378_vm14, %v1369_v58 }
 0x16e   : > { %v978_v8 = vpop.permute.xlu0 %977 }
 0x16f   : > { %990 = vst.msk [vmem:[#allocation4] sm:$0xff] %vm989_vm9, %v978_v8 }
 0x170   : > { %1083 = vst.msk [vmem:[#allocation4] sm:$0xff] %vm1082_vm10, %v1071_v48 }
 0x171   : > { %1129 = vst.msk [vmem:[#allocation4] sm:$0xff] %vm1128_vm12, %v1117_v43  ;;  %v1384_v63 = vld [vmem:[#allocation4 + $0x8] sm:$0xff] }
 0x173   : > { %v684_v60 = vpop.permute.xlu1 %683 }
 0x174   : > { %694 = vst.msk [vmem:[#allocation4 + $0x10] sm:$0xff] %vm691_vm4, %v684_v60 }
 0x175   : > { %790 = vst.msk [vmem:[#allocation4 + $0x10] sm:$0xff] %vm787_vm5, %v780_v59 }
 0x176   : > { %835 = vst.msk [vmem:[#allocation4 + $0x10] sm:$0xff] %vm832_vm6, %v825_v45 }
 0x177   : > { %v1274_v61 = vpop.permute.xlu0 %1273 }
 0x178   : > { %1286 = vst.msk [vmem:[#allocation4] sm:$0xff] %vm1285_vm13, %v1274_v61 }
 0x179   : > { %1379 = vst.msk [vmem:[#allocation4] sm:$0xff] %vm1378_vm14, %v1367_v54 }
 0x17d   : > { %v686_v13 = vpop.permute.xlu1 %685 }
 0x17e   : > { %695 = vst.msk [vmem:[#allocation4 + $0x18] sm:$0xff] %vm691_vm4, %v686_v13 }
 0x17f   : > { %791 = vst.msk [vmem:[#allocation4 + $0x18] sm:$0xff] %vm787_vm5, %v782_v18 }
 0x180   : > { %836 = vst.msk [vmem:[#allocation4 + $0x18] sm:$0xff] %vm832_vm6, %v827_v44  ;;  %v1383_v62 = vld [vmem:[#allocation4] sm:$0xff] }
 0x181   : > { %v982_v12 = vpop.permute.xlu0 %981  ;;  %3161 = vmatprep.mubr.msk.bf16.mxu0 %vm1407_vm15, %v1383_v62 }
 0x182   : > { %992 = vst.msk [vmem:[#allocation4 + $0x10] sm:$0xff] %vm989_vm9, %v982_v12  ;;  %3162 = vmatmul.mubr.msk.bf16.vlgmr.msra.gmra.mrb[0].mxu0 %vm1407_vm15, %v1384_v63 }
 0x183   : > { %1085 = vst.msk [vmem:[#allocation4 + $0x10] sm:$0xff] %vm1082_vm10, %v1075_v7 }
 0x184   : > { %1131 = vst.msk [vmem:[#allocation4 + $0x10] sm:$0xff] %vm1128_vm12, %v1121_v56 }
 0x186   : > { %v984_v32 = vpop.permute.xlu1 %983 }
 0x187   : > { %993 = vst.msk [vmem:[#allocation4 + $0x18] sm:$0xff] %vm989_vm9, %v984_v32 }
 0x188   : > { %1086 = vst.msk [vmem:[#allocation4 + $0x18] sm:$0xff] %vm1082_vm10, %v1077_v55 }
 0x189   : > { %1132 = vst.msk [vmem:[#allocation4 + $0x18] sm:$0xff] %vm1128_vm12, %v1123_v46 }
 0x18b   : > { %v1278_v0 = vpop.permute.xlu0 %1277 }
 0x18c   : > { %v1280_v31 = vpop.permute.xlu1 %1279  ;;  %1288 = vst.msk [vmem:[#allocation4 + $0x10] sm:$0xff] %vm1285_vm13, %v1278_v0 }
 0x18d   : > { %1289 = vst.msk [vmem:[#allocation4 + $0x18] sm:$0xff] %vm1285_vm13, %v1280_v31  ;;  %vm2334_vm13 = vcmask 326912  }
 0x18f   : > { %v1371_v19 = vpop.permute.xlu0 %1370 }
 0x190   : > { %v1373_v33 = vpop.permute.xlu1 %1372  ;;  %1381 = vst.msk [vmem:[#allocation4 + $0x10] sm:$0xff] %vm1378_vm14, %v1371_v19 }
 0x191   : > { %1382 = vst.msk [vmem:[#allocation4 + $0x18] sm:$0xff] %vm1378_vm14, %v1373_v33  ;;  %vm2427_vm14 = vcmask 392512  }
 0x197   : > { %v1385_v39 = vld [vmem:[#allocation4 + $0x10] sm:$0xff] }
 0x198   : > { %3165 = vmatprep.mubr.msk.bf16.mxu0 %vm1407_vm15, %v1385_v39  ;;  %v1386_v4 = vld [vmem:[#allocation4 + $0x18] sm:$0xff] }
 0x199   : > { %3166 = vmatmul.mubr.msk.bf16.gmra.mrb[4].mxu0 %vm1407_vm15, %v1386_v4  ;;  %vm2473_vm15 = vcmask 458112  }
 0x255   : > { %v3968_v5 = vpop.f32.mrb[0].mxu0 }
 0x256   : > { %v3970_v9 = vpop.f32.mrb[1].mxu0  ;;  %v1516_v57 = vmul.f32 %v3968_v5, %v3968_v5  ;;  %v1493_v41 = vsel %vm1489_vm2, %v3968_v5, 0.0 }
 0x257   : > { %v1514_v10 = vmul.f32 %v3970_v9, %v3970_v9  ;;  %v3974_v16 = vpop.f32.mrb[2].mxu0  ;;  %v1490_v25 = vsel %vm1489_vm2, %v3970_v9, 0.0 }
 0x258   : > { %v3976_v52 = vpop.f32.mrb[3].mxu0  ;;  %v1517_v14 = vmul.f32 %v3974_v16, %v3974_v16  ;;  %v1525_v27 = vsel %vm1489_vm2, %v1516_v57, 0.0  ;;  %v1495_v29 = vsel %vm1489_vm2, %v3974_v16, 0.0  ;;  %v1640_v57 = vld [vmem:[#allocation3 + $0x8] sm:$0x1] }
 0x259   : > { %v1491_v20 = vsel %vm1489_vm2, %v3976_v52, 0.0  ;;  %v1515_v21 = vmul.f32 %v3976_v52, %v3976_v52  ;;  %v1522_v22 = vsel %vm1489_vm2, %v1514_v10, 0.0 }
 0x25a   : > { %v1492_v1 = vadd.f32 %v1491_v20, %v1490_v25  ;;  %v1527_v37 = vsel %vm1489_vm2, %v1517_v14, 0.0  ;;  %v1643_v25 = vld [vmem:[#allocation3 + $0x10] sm:$0x1]  ;;  %v1646_v20 = vld [vmem:[#allocation3 + $0x18] sm:$0x1] }
 0x25b   : > { %v1523_v23 = vsel %vm1489_vm2, %v1515_v21, 0.0  ;;  %v1641_v21 = vsel %vm3567_vm7, 0, %v1640_v57 }
 0x25c   : > { %v1494_v38 = vadd.f32 %v1493_v41, %v1492_v1  ;;  %v1524_v24 = vadd.f32 %v1523_v23, %v1522_v22  ;;  %v1644_v1 = vsel %vm3567_vm7, 0, %v1643_v25  ;;  %v1647_v41 = vsel %vm3567_vm7, 0, %v1646_v20  ;;  %v1649_v22 = vld [vmem:[#allocation3 + $0x20] sm:$0x1]  ;;  %1642 = vst [vmem:[#allocation3 + $0x8] sm:$0x1] %v1641_v21 }
 0x25d   : > { %1645 = vst [vmem:[#allocation3 + $0x10] sm:$0x1] %v1644_v1  ;;  %1648 = vst [vmem:[#allocation3 + $0x18] sm:$0x1] %v1647_v41  ;;  %v1650_v14 = vsel %vm3567_vm7, 0, %v1649_v22 }
 0x25e   : > { %v1526_v30 = vadd.f32 %v1525_v27, %v1524_v24  ;;  %v1496_v34 = vadd.f32 %v1495_v29, %v1494_v38  ;;  %v1652_v23 = vld [vmem:[#allocation3 + $0x28] sm:$0x1]  ;;  %v1655_v38 = vld [vmem:[#allocation3 + $0x30] sm:$0x1]  ;;  %1651 = vst [vmem:[#allocation3 + $0x20] sm:$0x1] %v1650_v14 }
 0x25f   : > { %v1653_v24 = vsel %vm3567_vm7, 0, %v1652_v23  ;;  %v1656_v27 = vsel %vm3567_vm7, 0, %v1655_v38  ;;  %v1658_v29 = vld [vmem:[#allocation3 + $0x38] sm:$0x1]  ;;  %v3046_v21 = vld [vmem:[%s4426_s3] ss:$0 sm:$0xff] }
 0x260   : > { %v1528_v35 = vadd.f32 %v1527_v37, %v1526_v30  ;;  %v1661_v30 = vld [vmem:[#allocation3 + $0x40] sm:$0x1]  ;;  %1654 = vst [vmem:[#allocation3 + $0x28] sm:$0x1] %v1653_v24  ;;  %1657 = vst [vmem:[#allocation3 + $0x30] sm:$0x1] %v1656_v27 }
 0x261   : > { %v1662_v37 = vsel %vm3567_vm7, 0, %v1661_v30 }
 0x262   : > { %1663 = vst [vmem:[#allocation3 + $0x40] sm:$0x1] %v1662_v37 }
 0x26c   : > { %v3996_v36 = vpop.f32.mrb[4].mxu0 }
 0x26d   : > { %v3998_v40 = vpop.f32.mrb[5].mxu0  ;;  %v1520_v46 = vmul.f32 %v3996_v36, %v3996_v36  ;;  %v1501_v18 = vsel %vm1489_vm2, %v3996_v36, 0.0 }
 0x26e   : > { %v1497_v51 = vsel %vm1489_vm2, %v3998_v40, 0.0  ;;  %v1518_v42 = vmul.f32 %v3998_v40, %v3998_v40  ;;  %v4004_v43 = vpop.f32.mrb[6].mxu0 }
 0x26f   : > { %v1498_v44 = vadd.f32 %v1497_v51, %v1496_v34  ;;  %v4006_v45 = vpop.f32.mrb[7].mxu0  ;;  %v1521_v54 = vmul.f32 %v4004_v43, %v4004_v43  ;;  %v1503_v59 = vsel %vm1489_vm2, %v4004_v43, 0.0  ;;  %v1533_v7 = vsel %vm1489_vm2, %v1520_v46, 0.0  ;;  %v1668_v51 = vld [vmem:[#allocation3 + $0x14] sm:$0x1] }
 0x270   : > { %v1529_v56 = vsel %vm1489_vm2, %v1518_v42, 0.0  ;;  %v1499_v50 = vsel %vm1489_vm2, %v4006_v45, 0.0  ;;  %v1519_v17 = vmul.f32 %v4006_v45, %v4006_v45  ;;  %v1659_v34 = vsel %vm3567_vm7, 0, %v1658_v29  ;;  %v1671_v46 = vld [vmem:[#allocation3 + $0x1c] sm:$0x1] }
 0x271   : > { %v1530_v53 = vadd.f32 %v1529_v56, %v1528_v35  ;;  %v1500_v48 = vadd.f32 %v1499_v50, %v1498_v44  ;;  %v1535_v6 = vsel %vm1489_vm2, %v1521_v54, 0.0  ;;  %v1665_v35 = vld [vmem:[#allocation3 + $0xc] sm:$0x1]  ;;  %1660 = vst [vmem:[#allocation3 + $0x38] sm:$0x1] %v1659_v34  ;;  %v1669_v44 = vsel %vm3572_vm8, 0, %v1668_v51 }
 0x272   : > { %v1531_v55 = vsel %vm1489_vm2, %v1519_v17, 0.0  ;;  %v1666_v42 = vsel %vm3572_vm8, 0, %v1665_v35  ;;  %v1674_v56 = vld [vmem:[#allocation3 + $0x24] sm:$0x1]  ;;  %1670 = vst [vmem:[#allocation3 + $0x14] sm:$0x1] %v1669_v44 }
 0x273   : > { %v1532_v58 = vadd.f32 %v1531_v55, %v1530_v53  ;;  %v1502_v26 = vadd.f32 %v1501_v18, %v1500_v48  ;;  %1667 = vst [vmem:[#allocation3 + $0xc] sm:$0x1] %v1666_v42  ;;  %v1672_v50 = vsel %vm3572_vm8, 0, %v1671_v46  ;;  %v1675_v17 = vsel %vm3572_vm8, 0, %v1674_v56  ;;  %v1677_v53 = vld [vmem:[#allocation3 + $0x2c] sm:$0x1] }
 0x274   : > { %v1680_v48 = vld [vmem:[#allocation3 + $0x34] sm:$0x1]  ;;  %1673 = vst [vmem:[#allocation3 + $0x1c] sm:$0x1] %v1672_v50  ;;  %1676 = vst [vmem:[#allocation3 + $0x24] sm:$0x1] %v1675_v17 }
 0x275   : > { %v1504_v15 = vadd.f32 %v1503_v59, %v1502_v26  ;;  %v1534_v47 = vadd.f32 %v1533_v7, %v1532_v58  ;;  %v1678_v18 = vsel %vm3572_vm8, 0, %v1677_v53  ;;  %v1681_v54 = vsel %vm3572_vm8, 0, %v1680_v48  ;;  %v1683_v55 = vld [vmem:[#allocation3 + $0x3c] sm:$0x1]  ;;  %v1686_v58 = vld [vmem:[#allocation3 + $0x44] sm:$0x1] }
 0x276   : > { %1679 = vst [vmem:[#allocation3 + $0x2c] sm:$0x1] %v1678_v18  ;;  %1682 = vst [vmem:[#allocation3 + $0x34] sm:$0x1] %v1681_v54  ;;  %v1684_v26 = vsel %vm3572_vm8, 0, %v1683_v55  ;;  %v1687_v59 = vsel %vm3572_vm8, 0, %v1686_v58 }
 0x277   : > { %1505 = vadd.xlane.f32.xlu0 %v1504_v15  ;;  %v1536_v8 = vadd.f32 %v1535_v6, %v1534_v47  ;;  %1685 = vst [vmem:[#allocation3 + $0x3c] sm:$0x1] %v1684_v26  ;;  %1688 = vst [vmem:[#allocation3 + $0x44] sm:$0x1] %v1687_v59 }
 0x279   : > { %1537 = vadd.xlane.f32.xlu1 %v1536_v8 }
 0x304   : > { %v1506_v60 = vpop.xlane.xlu0 %1505 }
 0x305   : > { %v1507_v61 = vrot.slane %v1506_v60, 4 }
 0x306   : > { %v1538_v13 = vpop.xlane.xlu1 %1537 }
 0x307   : > { %v1508_v62 = vadd.f32 %v1507_v61, %v1506_v60  ;;  %v1539_v12 = vrot.slane %v1538_v13, 4 }
 0x309   : > { %v1509_v63 = vrot.slane %v1508_v62, 2  ;;  %v1540_v32 = vadd.f32 %v1539_v12, %v1538_v13 }
 0x30b   : > { %v1541_v0 = vrot.slane %v1540_v32, 2  ;;  %v1510_v31 = vadd.f32 %v1509_v63, %v1508_v62 }
 0x30d   : > { %v1511_v19 = vrot.slane %v1510_v31, 1  ;;  %v1542_v33 = vadd.f32 %v1541_v0, %v1540_v32 }
 0x30f   : > { %v1512_v39 = vadd.f32 %v1511_v19, %v1510_v31  ;;  %v1543_v4 = vrot.slane %v1542_v33, 1 }
 0x311   : > { %3189 = vpush %v1512_v39  ;;  %v1544_v10 = vadd.f32 %v1543_v4, %v1542_v33 }
 0x313   : > { %3191 = vpush %v1544_v10 }
 0x342   : > { %s3190_s12 = spop %3189 }
 0x343   : > { %s1548_s16 = smul.f32 0.001953125, %s3190_s12 }
 0x344   : > { %s3192_s7 = spop %3191 }
 0x345   : > { %s1552_s10 = smul.f32 %s1548_s16, %s1548_s16  ;;  %v1558_v7 = vstv %s1548_s16 }
 0x346   : > { %s1551_s11 = smul.f32 0.001953125, %s3192_s7  ;;  %v1559_v15 = vsub.f32 %v3970_v9, %v1558_v7  ;;  %v1560_v47 = vsub.f32 %v3976_v52, %v1558_v7  ;;  %v1561_v6 = vsub.f32 %v3968_v5, %v1558_v7  ;;  %v1562_v8 = vsub.f32 %v3974_v16, %v1558_v7  ;;  %v1887_v9 = vld [vmem:[#allocation3] sm:$0xf]  ;;  %v2492_v52 = vld [vmem:[#allocation3 + $0x48] sm:$0xf]  ;;  %s3403_s7 = smov 48  }
 0x347   : > { %v1563_v60 = vsub.f32 %v3998_v40, %v1558_v7  ;;  %v1564_v3 = vsub.f32 %v4006_v45, %v1558_v7  ;;  %v1565_v61 = vsub.f32 %v3996_v36, %v1558_v7  ;;  %v1566_v13 = vsub.f32 %v4004_v43, %v1558_v7  ;;  %v3045_v36 = vld [vmem:[%s4425_s2] ss:$0 sm:$0xff] }
 0x348   : > { %s1553_s13 = ssub.f32 %s1551_s11, %s1552_s10  ;;  %v1904_v63 = vshrl.u32 %v1887_v9, 16  ;;  %v1907_v5 = vshll.u32 %v1887_v9, 16  ;;  %v2593_v32 = vshrl.u32 %v2492_v52, 16  ;;  %v2596_v16 = vshll.u32 %v2492_v52, 16  ;;  %s3405_s10 = smov 64  }
 0x34a   : > { %s1554_s17 = sadd.f32 1e-05, %s1553_s13  ;;  %v4064_v40 = vrot.slane %v1904_v63, 4  ;;  %v4069_v43 = vrot.slane %v1907_v5, 5  ;;  %v4071_v0 = vrot.slane %v2593_v32, 4  ;;  %v4073_v31 = vrot.slane %v2596_v16, 5 }
 0x34c   : > { %v1555_v62 = vstv %s1554_s17  ;;  %v1910_v18 = vor.u32 %v4069_v43, %v4064_v40 }
 0x34d   : > { %3290 = vrsqrt.f32 %v1555_v62 }
 0x357   : > { %v3291_v12 = vpop.eup %3290 }
 0x358   : > { %3193 = vpush %v3291_v12 }
 0x389   : > { %s3194_s26 = spop %3193 }
 0x38a   : > { %v1567_v45 = vstv %s3194_s26  ;;  %s3406_s26 = smov 56  }
 0x38b   : > { %v1568_v19 = vmul.f32 %v1567_v45, %v1559_v15  ;;  %v1569_v33 = vmul.f32 %v1567_v45, %v1560_v47  ;;  %v1570_v39 = vmul.f32 %v1567_v45, %v1561_v6  ;;  %v1571_v4 = vmul.f32 %v1567_v45, %v1562_v8 }
 0x38c   : > { %v1572_v10 = vmul.f32 %v1567_v45, %v1563_v60  ;;  %v1573_v57 = vmul.f32 %v1567_v45, %v1564_v3  ;;  %v1574_v25 = vmul.f32 %v1567_v45, %v1565_v61  ;;  %v1575_v20 = vmul.f32 %v1567_v45, %v1566_v13 }
 0x38d   : > { %v1583_v1 = vmul.f32 %v3045_v36, %v1568_v19  ;;  %v1584_v41 = vmul.f32 %v3045_v36, %v1569_v33  ;;  %v1585_v22 = vmul.f32 %v3045_v36, %v1570_v39  ;;  %v1586_v14 = vmul.f32 %v3045_v36, %v1571_v4 }
 0x38e   : > { %v1587_v23 = vmul.f32 %v3045_v36, %v1572_v10  ;;  %v1588_v38 = vmul.f32 %v3045_v36, %v1573_v57  ;;  %v1589_v24 = vmul.f32 %v3045_v36, %v1574_v25  ;;  %v1590_v27 = vmul.f32 %v3045_v36, %v1575_v20 }
 0x38f   : > { %v1598_v29 = vadd.f32 %v3046_v21, %v1583_v1  ;;  %v1599_v30 = vadd.f32 %v3046_v21, %v1584_v41  ;;  %v1600_v34 = vadd.f32 %v3046_v21, %v1585_v22  ;;  %v1601_v37 = vadd.f32 %v3046_v21, %v1586_v14  ;;  %v1806_v1 = vld [vmem:[#allocation3 + $0xc] sm:$0x1] }
 0x390   : > { %v1602_v35 = vadd.f32 %v3046_v21, %v1587_v23  ;;  %v1603_v51 = vadd.f32 %v3046_v21, %v1588_v38  ;;  %v1604_v42 = vadd.f32 %v3046_v21, %v1589_v24  ;;  %v1605_v44 = vadd.f32 %v3046_v21, %v1590_v27  ;;  %v1803_v21 = vld [vmem:[#allocation3 + $0x8] sm:$0xf]  ;;  %v1809_v38 = vld [vmem:[#allocation3 + $0x10] sm:$0xf] }
 0x391   : > { %vm1606_vm8 = vcmp.ge.f32.partialorder %v1598_v29, 0.0  ;;  %vm1607_vm3 = vcmp.ge.f32.partialorder %v1599_v30, 0.0  ;;  %vm1608_vm4 = vcmp.ge.f32.partialorder %v1600_v34, 0.0  ;;  %vm1609_vm5 = vcmp.ge.f32.partialorder %v1601_v37, 0.0 }
 0x392   : > { %vm1610_vm6 = vcmp.ge.f32.partialorder %v1602_v35, 0.0  ;;  %vm1611_vm9 = vcmp.ge.f32.partialorder %v1603_v51, 0.0  ;;  %vm1612_vm10 = vcmp.ge.f32.partialorder %v1604_v42, 0.0  ;;  %vm1613_vm12 = vcmp.ge.f32.partialorder %v1605_v44, 0.0 }
 0x393   : > { %v1614_v46 = vmul.f32 0.01, %v1598_v29  ;;  %v1615_v56 = vmul.f32 0.01, %v1599_v30  ;;  %v1616_v50 = vmul.f32 0.01, %v1600_v34 }
 0x394   : > { %v1617_v17 = vmul.f32 0.01, %v1601_v37  ;;  %v1618_v53 = vmul.f32 0.01, %v1602_v35  ;;  %v1619_v48 = vmul.f32 0.01, %v1603_v51 }
 0x395   : > { %v1620_v54 = vmul.f32 0.01, %v1604_v42  ;;  %v1621_v55 = vmul.f32 0.01, %v1605_v44  ;;  %v1622_v58 = vsel %vm1606_vm8, %v1598_v29, %v1614_v46  ;;  %v1623_v26 = vsel %vm1607_vm3, %v1599_v30, %v1615_v56  ;;  %v1821_v56 = vld [vmem:[#allocation3 + $0x20] sm:$0xf] }
 0x396   : > { %v1624_v59 = vsel %vm1608_vm4, %v1600_v34, %v1616_v50  ;;  %v1625_v7 = vsel %vm1609_vm5, %v1601_v37, %v1617_v17  ;;  %v1626_v15 = vsel %vm1610_vm6, %v1602_v35, %v1618_v53  ;;  %v1627_v47 = vsel %vm1611_vm9, %v1603_v51, %v1619_v48  ;;  %v1812_v34 = vld [vmem:[#allocation3 + $0x14] sm:$0x1]  ;;  %v1815_v37 = vld [vmem:[#allocation3 + $0x18] sm:$0xf]  ;;  %v1818_v35 = vld [vmem:[#allocation3 + $0x1c] sm:$0x1] }
 0x397   : > { %v1628_v6 = vsel %vm1612_vm10, %v1604_v42, %v1620_v54  ;;  %v1629_v8 = vsel %vm1613_vm12, %v1605_v44, %v1621_v55  ;;  %v3130_v60 = vpack.c.bf16 %v1622_v58, %v1622_v58  ;;  %v3131_v3 = vpack.c.bf16 %v1623_v26, %v1623_v26  ;;  %v1824_v50 = vld [vmem:[#allocation3 + $0x24] sm:$0x1]  ;;  %v1827_v55 = vld [vmem:[#allocation3 + $0x28] sm:$0xf] }
 0x398   : > { %v3132_v61 = vpack.c.bf16 %v1624_v59, %v1624_v59  ;;  %v3133_v13 = vpack.c.bf16 %v1625_v7, %v1625_v7  ;;  %v3134_v62 = vpack.c.bf16 %v1626_v15, %v1626_v15  ;;  %v3135_v12 = vpack.c.bf16 %v1627_v47, %v1627_v47  ;;  %v1830_v15 = vld [vmem:[#allocation3 + $0x2c] sm:$0x1]  ;;  %v1833_v47 = vld [vmem:[#allocation3 + $0x30] sm:$0xf] }
 0x399   : > { %v4088_v9 = vpack.c.bf16 %v1628_v6, %v1628_v6  ;;  %v4090_v52 = vpack.c.bf16 %v1629_v8, %v1629_v8  ;;  %v1722_v63 = vshrl.u32 %v3130_v60, 16  ;;  %v1725_v5 = vshll.u32 %v3130_v60, 16 }
 0x39a   : > { %v1730_v32 = vshrl.u32 %v3131_v3, 16  ;;  %v1733_v16 = vshll.u32 %v3131_v3, 16  ;;  %v1738_v45 = vshrl.u32 %v3132_v61, 16  ;;  %v1741_v36 = vshll.u32 %v3132_v61, 16  ;;  %v1836_v61 = vld [vmem:[#allocation3 + $0x34] sm:$0x1] }
 0x39b   : > { %v1724_v19 = vrot.slane %v1722_v63, 7  ;;  %v1746_v33 = vshrl.u32 %v3133_v13, 16  ;;  %v1749_v39 = vshll.u32 %v3133_v13, 16  ;;  %v1754_v4 = vshrl.u32 %v3134_v62, 16  ;;  %v1839_v13 = vld [vmem:[#allocation3 + $0x38] sm:$0xf] }
 0x39c   : > { %v1732_v10 = vrot.slane %v1730_v32, 7  ;;  %v1740_v57 = vrot.slane %v1738_v45, 7  ;;  %v1757_v25 = vshll.u32 %v3134_v62, 16  ;;  %v1762_v20 = vshrl.u32 %v3135_v12, 16  ;;  %v1842_v63 = vld [vmem:[#allocation3 + $0x3c] sm:$0x1] }
 0x39d   : > { %v1727_v41 = vor.u32 %v1725_v5, %v1724_v19  ;;  %v1728_v22 = vrot.slane %v1724_v19, 4  ;;  %v1748_v14 = vrot.slane %v1746_v33, 7  ;;  %v1756_v23 = vrot.slane %v1754_v4, 7  ;;  %v1845_v5 = vld [vmem:[#allocation3 + $0x40] sm:$0xf] }
 0x39e   : > { %v1735_v24 = vor.u32 %v1733_v16, %v1732_v10  ;;  %v1736_v27 = vrot.slane %v1732_v10, 4  ;;  %v1743_v29 = vor.u32 %v1741_v36, %v1740_v57  ;;  %v1744_v30 = vrot.slane %v1740_v57, 4  ;;  %v1848_v19 = vld [vmem:[#allocation3 + $0x44] sm:$0x1] }
 0x39f   : > { %v1751_v51 = vor.u32 %v1749_v39, %v1748_v14  ;;  %v1752_v42 = vrot.slane %v1748_v14, 4  ;;  %v1759_v44 = vor.u32 %v1757_v25, %v1756_v23  ;;  %v1760_v46 = vrot.slane %v1756_v23, 4  ;;  %v1888_v33 = vld [vmem:[#allocation3 + $0x4] sm:$0x1]  ;;  %v2044_v25 = vld [vmem:[#allocation3] sm:$0xe] }
 0x3a0   : > { %v1764_v17 = vrot.slane %v1762_v20, 7  ;;  %v1765_v53 = vshll.u32 %v3135_v12, 16  ;;  %v1770_v48 = vshrl.u32 %v4088_v9, 16  ;;  %v1773_v54 = vshll.u32 %v4088_v9, 16  ;;  %v2045_v20 = vld [vmem:[#allocation3 + $0x4] sm:$0x1] }
 0x3a1   : > { %v1778_v58 = vshrl.u32 %v4090_v52, 16  ;;  %v1781_v26 = vshll.u32 %v4090_v52, 16  ;;  %v1804_v59 = vsel %vm3619_vm11, %v1727_v41, %v1803_v21  ;;  %v1807_v7 = vsel %vm3567_vm7, %v1728_v22, %v1806_v1  ;;  %v2493_v14 = vld [vmem:[#allocation3 + $0x4c] sm:$0x1] }
 0x3a2   : > { %v1767_v6 = vor.u32 %v1765_v53, %v1764_v17  ;;  %v1768_v8 = vrot.slane %v1764_v17, 4  ;;  %v1772_v60 = vrot.slane %v1770_v48, 7  ;;  %1808 = vst [vmem:[#allocation3 + $0xc] sm:$0x1] %v1807_v7  ;;  %v1810_v3 = vsel %vm3619_vm11, %v1735_v24, %v1809_v38  ;;  %1805 = vst [vmem:[#allocation3 + $0x8] sm:$0xf] %v1804_v59 }
 0x3a3   : > { %v1780_v62 = vrot.slane %v1778_v58, 7  ;;  %v1813_v12 = vsel %vm3567_vm7, %v1736_v27, %v1812_v34  ;;  %v1816_v9 = vsel %vm3619_vm11, %v1743_v29, %v1815_v37  ;;  %v1819_v52 = vsel %vm3567_vm7, %v1744_v30, %v1818_v35  ;;  %1811 = vst [vmem:[#allocation3 + $0x10] sm:$0xf] %v1810_v3  ;;  %v4135_v37 = vld [vmem:[#allocation3 + $0x48] sm:$0xe] }
 0x3a4   : > { %v1775_v32 = vor.u32 %v1773_v54, %v1772_v60  ;;  %v1776_v16 = vrot.slane %v1772_v60, 4  ;;  %1814 = vst [vmem:[#allocation3 + $0x14] sm:$0x1] %v1813_v12  ;;  %1820 = vst [vmem:[#allocation3 + $0x1c] sm:$0x1] %v1819_v52  ;;  %v1822_v45 = vsel %vm3619_vm11, %v1751_v51, %v1821_v56  ;;  %v1825_v36 = vsel %vm3567_vm7, %v1752_v42, %v1824_v50 }
 0x3a5   : > { %1817 = vst [vmem:[#allocation3 + $0x18] sm:$0xf] %v1816_v9  ;;  %v1783_v39 = vor.u32 %v1781_v26, %v1780_v62  ;;  %v1784_v4 = vrot.slane %v1780_v62, 4  ;;  %1826 = vst [vmem:[#allocation3 + $0x24] sm:$0x1] %v1825_v36  ;;  %v1828_v10 = vsel %vm3619_vm11, %v1759_v44, %v1827_v55  ;;  %v1831_v57 = vsel %vm3567_vm7, %v1760_v46, %v1830_v15 }
 0x3a6   : > { %1823 = vst [vmem:[#allocation3 + $0x20] sm:$0xf] %v1822_v45  ;;  %1832 = vst [vmem:[#allocation3 + $0x2c] sm:$0x1] %v1831_v57  ;;  %v1834_v21 = vsel %vm3619_vm11, %v1767_v6, %v1833_v47  ;;  %v1837_v1 = vsel %vm3567_vm7, %v1768_v8, %v1836_v61  ;;  %v1840_v41 = vsel %vm3619_vm11, %v1775_v32, %v1839_v13  ;;  %v1913_v24 = vshll.u32 %v1888_v33, 16 }
 0x3a7   : > { %v1843_v22 = vsel %vm3567_vm7, %v1776_v16, %v1842_v63  ;;  %1829 = vst [vmem:[#allocation3 + $0x28] sm:$0xf] %v1828_v10  ;;  %1838 = vst [vmem:[#allocation3 + $0x34] sm:$0x1] %v1837_v1  ;;  %v1846_v23 = vsel %vm3619_vm11, %v1783_v39, %v1845_v5  ;;  %v1849_v38 = vsel %vm3567_vm7, %v1784_v4, %v1848_v19  ;;  %v3063_v29 = vrot.slane %v2044_v25, 9 }
 0x3a8   : > { %1844 = vst [vmem:[#allocation3 + $0x3c] sm:$0x1] %v1843_v22  ;;  %1835 = vst [vmem:[#allocation3 + $0x30] sm:$0xf] %v1834_v21  ;;  %v2599_v27 = vor.u32 %v4073_v31, %v4071_v0  ;;  %v2078_v30 = vrot.slane %v2045_v20, 5  ;;  %v4133_v34 = vrot.slane %v1910_v18, 4 }
 0x3a9   : > { %1841 = vst [vmem:[#allocation3 + $0x38] sm:$0xf] %v1840_v41  ;;  %1850 = vst [vmem:[#allocation3 + $0x44] sm:$0x1] %v1849_v38  ;;  %v2602_v28 = vshll.u32 %v2493_v14, 16  ;;  %v4137_v35 = vrot.slane %v1913_v24, 5 }
 0x3aa   : > { %1847 = vst [vmem:[#allocation3 + $0x40] sm:$0xf] %v1846_v23  ;;  %v3274_v2 = vld [vmem:[#allocation3 + $0x8] ss:$8 sps:$4 sm:$0xff]   ;;  %v4139_v51 = vrot.slane %v2599_v27, 4  ;;  %v3110_v31 = vrot.slane %v4135_v37, 9  ;;  %v2079_v13 = vsel %vm3760_vm0, %v3063_v29, %v2078_v30 }
 0x3ab   : > { %2165 = vrot.lane.b32.xlu0 %v3274_v2, %s3396_s14  ;;  %v4142_v0 = vrot.slane %v2602_v28, 5  ;;  %v2046_v43 = vld [vmem:[#allocation3 + $0x8] sm:$0xe]  ;;  %v2047_v18 = vld [vmem:[#allocation3 + $0xc] sm:$0x1]  ;;  %vm2781_vm7 = vcmask 1043456  }
 0x3ac   : > { %v3276_v40 = vld [vmem:[#allocation3 + $0x10] ss:$8 sps:$4 sm:$0xff]   ;;  %v4147_v46 = vld [vmem:[#allocation3 + $0x4c] sm:$0x1]  ;;  %v2049_v17 = vld [vmem:[#allocation3 + $0x14] sm:$0x1] }
 0x3ad   : > { %v3273_v42 = vld [vmem:[#allocation3 + $0x18] ss:$8 sps:$4 sm:$0xff]   ;;  %v2048_v50 = vld [vmem:[#allocation3 + $0x10] sm:$0xe]  ;;  %v2051_v54 = vld [vmem:[#allocation3 + $0x1c] sm:$0x1] }
 0x3ae   : > { %2167 = vrot.lane.b32.xlu1 %v3273_v42, %s3396_s14  ;;  %v3275_v44 = vld [vmem:[#allocation3 + $0x20] ss:$8 sps:$4 sm:$0xff]   ;;  %v2050_v48 = vld [vmem:[#allocation3 + $0x18] sm:$0xe]  ;;  %v3065_v55 = vrot.slane %v2048_v50, 9  ;;  %v2086_v58 = vrot.slane %v2049_v17, 5 }
 0x3af   : > { %2461 = vrot.lane.b32.xlu0 %v3276_v40, %s3403_s7  ;;  %v3278_v56 = vld [vmem:[#allocation3 + $0x28] ss:$8 sps:$4 sm:$0xff]   ;;  %v3066_v26 = vrot.slane %v2050_v48, 9  ;;  %v2090_v59 = vrot.slane %v2051_v54, 5  ;;  %v3064_v7 = vrot.slane %v2046_v43, 9  ;;  %v2082_v15 = vrot.slane %v2047_v18, 5 }
 0x3b0   : > { %v2343_v47 = vld [vmem:[#allocation3 + $0x18] sm:$0xe]  ;;  %v2344_v8 = vld [vmem:[#allocation3 + $0x1c] sm:$0x1]  ;;  %v2345_v60 = vld [vmem:[#allocation3 + $0x20] sm:$0xe]  ;;  %v2087_v61 = vsel %vm3760_vm0, %v3065_v55, %v2086_v58 }
 0x3b1   : > { %v3277_v53 = vld [vmem:[#allocation3 + $0x38] ss:$8 sps:$4 sm:$0xff]   ;;  %v2346_v3 = vld [vmem:[#allocation3 + $0x24] sm:$0x1]  ;;  %v3085_v62 = vrot.slane %v2343_v47, 9  ;;  %v2697_v52 = vrot.slane %v4147_v46, 5  ;;  %v2091_v5 = vsel %vm3760_vm0, %v3066_v26, %v2090_v59  ;;  %v2083_v32 = vsel %vm3760_vm0, %v3064_v7, %v2082_v15 }
 0x3b2   : > { %2463 = vrot.lane.b32.xlu1 %v3275_v44, %s3403_s7  ;;  %v3280_v6 = vld [vmem:[#allocation3 + $0x30] ss:$8 sps:$4 sm:$0xff]   ;;  %v2339_v12 = vld [vmem:[#allocation3 + $0x8] sm:$0xe]  ;;  %v2340_v9 = vld [vmem:[#allocation3 + $0xc] sm:$0x1]  ;;  %v3072_v41 = vcombine.low %v2087_v61, %v2091_v5  ;;  %v3071_v24 = vcombine.low %v2079_v13, %v2083_v32  ;;  %v1916_v32 = vsel %vm3772_vm1, %v4133_v34, %v4137_v35 }
 0x3b3   : > { %2169 = vrot.lane.b32.xlu0 %v3278_v56, %s3396_s14  ;;  %v3279_v63 = vld [vmem:[#allocation3 + $0x40] ss:$8 sps:$4 sm:$0xff]   ;;  %v2381_v16 = vrot.slane %v2344_v8, 5  ;;  %v3086_v45 = vrot.slane %v2345_v60, 9  ;;  %v2341_v36 = vld [vmem:[#allocation3 + $0x10] sm:$0xe] }
 0x3b4   : > { %v2342_v19 = vld [vmem:[#allocation3 + $0x14] sm:$0x1]  ;;  %v2385_v33 = vrot.slane %v2346_v3, 5  ;;  %v3083_v39 = vrot.slane %v2339_v12, 9  ;;  %v2373_v4 = vrot.slane %v2340_v9, 5  ;;  %v3084_v10 = vrot.slane %v2341_v36, 9 }
 0x3b5   : > { %v2056_v57 = vld [vmem:[#allocation3 + $0x30] sm:$0xe]  ;;  %v2377_v25 = vrot.slane %v2342_v19, 5  ;;  %v2057_v20 = vld [vmem:[#allocation3 + $0x34] sm:$0x1]  ;;  %v2382_v27 = vsel %vm3760_vm0, %v3085_v62, %v2381_v16  ;;  %v3286_v35 = vld [vmem:[%s4427_s4 + $0x10] sm:$0xff]  }
 0x3b6   : > { %2171 = vrot.lane.b32.xlu1 %v3277_v53, %s3396_s14  ;;  %v2058_v21 = vld [vmem:[#allocation3 + $0x38] sm:$0xe]  ;;  %v3069_v1 = vrot.slane %v2056_v57, 9  ;;  %v2059_v22 = vld [vmem:[#allocation3 + $0x3c] sm:$0x1]  ;;  %v2102_v14 = vrot.slane %v2057_v20, 5  ;;  %v2374_v42 = vsel %vm3760_vm0, %v3083_v39, %v2373_v4  ;;  %v2386_v50 = vsel %vm3760_vm0, %v3086_v45, %v2385_v33 }
 0x3b7   : > { %2465 = vrot.lane.b32.xlu0 %v3280_v6, %s3403_s7  ;;  %v3070_v23 = vrot.slane %v2058_v21, 9  ;;  %v2635_v38 = vld [vmem:[#allocation3 + $0x10] sm:$0xe]  ;;  %v2106_v29 = vrot.slane %v2059_v22, 5  ;;  %v2636_v30 = vld [vmem:[#allocation3 + $0x14] sm:$0x1]  ;;  %v2378_v40 = vsel %vm3760_vm0, %v3084_v10, %v2377_v25  ;;  %v3092_v62 = vcombine.low %v2382_v27, %v2386_v50 }
 0x3b8   : > { %v2637_v28 = vld [vmem:[#allocation3 + $0x18] sm:$0xe]  ;;  %v3103_v2 = vrot.slane %v2635_v38, 9  ;;  %v2638_v43 = vld [vmem:[#allocation3 + $0x1c] sm:$0x1]  ;;  %v2669_v18 = vrot.slane %v2636_v30, 5  ;;  %v2103_v17 = vsel %vm3760_vm0, %v3069_v1, %v2102_v14  ;;  %v3091_v6 = vcombine.low %v2374_v42, %v2378_v40 }
 0x3b9   : > { %v3104_v44 = vrot.slane %v2637_v28, 9  ;;  %v2351_v56 = vld [vmem:[#allocation3 + $0x38] sm:$0xe]  ;;  %v2673_v53 = vrot.slane %v2638_v43, 5  ;;  %v2352_v48 = vld [vmem:[#allocation3 + $0x3c] sm:$0x1]  ;;  %v2107_v58 = vsel %vm3760_vm0, %v3070_v23, %v2106_v29 }
 0x3ba   : > { %2467 = vrot.lane.b32.xlu1 %v3279_v63, %s3403_s7  ;;  %v2353_v54 = vld [vmem:[#allocation3 + $0x40] sm:$0xe]  ;;  %v3089_v55 = vrot.slane %v2351_v56, 9  ;;  %v2670_v26 = vsel %vm3760_vm0, %v3103_v2, %v2669_v18  ;;  %v2354_v59 = vld [vmem:[#allocation3 + $0x44] sm:$0x1]  ;;  %v2397_v7 = vrot.slane %v2352_v48, 5  ;;  %v3074_v16 = vcombine.low %v2103_v17, %v2107_v58 }
 0x3bb   : > { %2120 = vrot.lane.b32.xlu0 %v3071_v24, %s3401_s9  ;;  %v3090_v15 = vrot.slane %v2353_v54, 9  ;;  %v2639_v47 = vld [vmem:[#allocation3 + $0x20] sm:$0xe]  ;;  %v2674_v8 = vsel %vm3760_vm0, %v3104_v44, %v2673_v53  ;;  %v2401_v60 = vrot.slane %v2354_v59, 5  ;;  %v2640_v3 = vld [vmem:[#allocation3 + $0x24] sm:$0x1] }
 0x3bc   : > { %v2641_v61 = vld [vmem:[#allocation3 + $0x28] sm:$0xe]  ;;  %v3105_v13 = vrot.slane %v2639_v47, 9  ;;  %v2642_v12 = vld [vmem:[#allocation3 + $0x2c] sm:$0x1]  ;;  %v2677_v9 = vrot.slane %v2640_v3, 5  ;;  %v3111_v45 = vcombine.low %v2670_v26, %v2674_v8  ;;  %v2398_v4 = vsel %vm3760_vm0, %v3089_v55, %v2397_v7 }
 0x3bd   : > { %v3106_v63 = vrot.slane %v2641_v61, 9  ;;  %v1891_v5 = vld [vmem:[#allocation3 + $0x10] sm:$0xf]  ;;  %s3404_s14 = smov 40   ;;  %v2681_v36 = vrot.slane %v2642_v12, 5  ;;  %v2402_v10 = vsel %vm3760_vm0, %v3090_v15, %v2401_v60  ;;  %vm2039_vm11 = vcmask 130112  }
 0x3be   : > { %2122 = vrot.lane.b32.xlu1 %v3072_v41, %s3401_s9  ;;  %v1892_v19 = vld [vmem:[#allocation3 + $0x14] sm:$0x1]  ;;  %v1893_v33 = vld [vmem:[#allocation3 + $0x18] sm:$0xf]  ;;  %v1932_v39 = vshrl.u32 %v1891_v5, 16  ;;  %v1935_v25 = vshll.u32 %v1891_v5, 16  ;;  %v2678_v1 = vsel %vm3760_vm0, %v3105_v13, %v2677_v9  ;;  %v3094_v53 = vcombine.low %v2398_v4, %v2402_v10 }
 0x3bf   : > { %2415 = vrot.lane.b32.xlu0 %v3091_v6, %s3404_s14  ;;  %v1894_v57 = vld [vmem:[#allocation3 + $0x1c] sm:$0x1]  ;;  %v1941_v20 = vshll.u32 %v1892_v19, 16  ;;  %v2052_v21 = vld [vmem:[#allocation3 + $0x20] sm:$0xe]  ;;  %v1946_v22 = vshrl.u32 %v1893_v33, 16  ;;  %v2682_v38 = vsel %vm3760_vm0, %v3106_v63, %v2681_v36 }
 0x3c0   : > { %v1934_v41 = vrot.slane %v1932_v39, 4  ;;  %v1949_v14 = vshll.u32 %v1893_v33, 16  ;;  %v2053_v23 = vld [vmem:[#allocation3 + $0x24] sm:$0x1]  ;;  %v1937_v24 = vrot.slane %v1935_v25, 5  ;;  %v1955_v29 = vshll.u32 %v1894_v57, 16 }
 0x3c1   : > { %v1943_v27 = vrot.slane %v1941_v20, 5  ;;  %v2054_v30 = vld [vmem:[#allocation3 + $0x28] sm:$0xe]  ;;  %v1948_v28 = vrot.slane %v1946_v22, 4  ;;  %v2055_v42 = vld [vmem:[#allocation3 + $0x2c] sm:$0x1]  ;;  %v3112_v48 = vcombine.low %v2678_v1, %v2682_v38 }
 0x3c2   : > { %2417 = vrot.lane.b32.xlu1 %v3092_v62, %s3404_s14  ;;  %v1951_v2 = vrot.slane %v1949_v14, 5  ;;  %v3067_v40 = vrot.slane %v2052_v21, 9  ;;  %v2094_v43 = vrot.slane %v2053_v23, 5  ;;  %v1938_v18 = vor.u32 %v1937_v24, %v1934_v41  ;;  %v2186_v17 = vld [vmem:[#allocation3 + $0x18] sm:$0xf]  ;;  %v3282_v12 = vld [vmem:[%s4427_s4] sm:$0xff]  }
 0x3c3   : > { %2711 = vrot.lane.b32.xlu0 %v3111_v45, %s3405_s10  ;;  %v1957_v44 = vrot.slane %v1955_v29, 5  ;;  %v3068_v56 = vrot.slane %v2054_v30, 9  ;;  %v2098_v50 = vrot.slane %v2055_v42, 5  ;;  %v2187_v58 = vld [vmem:[#allocation3 + $0x1c] sm:$0x1]  ;;  %v2227_v47 = vshrl.u32 %v2186_v17, 16  ;;  %3169 = vmatprep.subr.bf16.mxu1 %v3282_v12 }
 0x3c4   : > { %v1952_v54 = vor.u32 %v1951_v2, %v1948_v28  ;;  %v2095_v55 = vsel %vm3760_vm0, %v3067_v40, %v2094_v43  ;;  %v2188_v26 = vld [vmem:[#allocation3 + $0x20] sm:$0xf]  ;;  %v2189_v59 = vld [vmem:[#allocation3 + $0x24] sm:$0x1]  ;;  %v1939_v7 = vrot.slane %v1938_v18, 4  ;;  %v2230_v6 = vshll.u32 %v2186_v17, 16  ;;  %3170 = vmatpush3.bf16.msra.mxu1 %v3282_v12 }
 0x3c5   : > { %v2099_v15 = vsel %vm3760_vm0, %v3068_v56, %v2098_v50  ;;  %v2347_v8 = vld [vmem:[#allocation3 + $0x28] sm:$0xe]  ;;  %v2236_v61 = vshll.u32 %v2187_v58, 16  ;;  %v2241_v13 = vshrl.u32 %v2188_v26, 16  ;;  %v2348_v62 = vld [vmem:[#allocation3 + $0x2c] sm:$0x1] }
 0x3c6   : > { %2126 = vrot.lane.b32.xlu1 %v3074_v16, %s3401_s9  ;;  %v1953_v60 = vrot.slane %v1952_v54, 4  ;;  %v3073_v3 = vcombine.low %v2095_v55, %v2099_v15  ;;  %v1944_v9 = vsel %vm3772_vm1, %v1939_v7, %v1943_v27  ;;  %v2229_v63 = vrot.slane %v2227_v47, 4  ;;  %v2349_v45 = vld [vmem:[#allocation3 + $0x30] sm:$0xe]  ;;  %v2350_v4 = vld [vmem:[#allocation3 + $0x34] sm:$0x1] }
 0x3c7   : > { %2713 = vrot.lane.b32.xlu0 %v3112_v48, %s3405_s10  ;;  %v2232_v5 = vrot.slane %v2230_v6, 5  ;;  %v2244_v16 = vshll.u32 %v2188_v26, 16  ;;  %v2238_v19 = vrot.slane %v2236_v61, 5  ;;  %v2243_v33 = vrot.slane %v2241_v13, 4  ;;  %v2482_v21 = vld [vmem:[#allocation3 + $0x20] sm:$0xf] }
 0x3c8   : > { %v1958_v36 = vsel %vm3772_vm1, %v1953_v60, %v1957_v44  ;;  %v2250_v39 = vshll.u32 %v2189_v59, 16  ;;  %v3087_v20 = vrot.slane %v2347_v8, 9  ;;  %v2483_v1 = vld [vmem:[#allocation3 + $0x24] sm:$0x1]  ;;  %v2389_v22 = vrot.slane %v2348_v62, 5  ;;  %v3284_v6 = vld [vmem:[%s4427_s4 + $0x8] sm:$0xff]  }
 0x3c9   : > { %v3060_v10 = vcombine.low %v1944_v9, %v1958_v36  ;;  %v2233_v57 = vor.u32 %v2232_v5, %v2229_v63  ;;  %v2246_v25 = vrot.slane %v2244_v16, 5  ;;  %v3088_v14 = vrot.slane %v2349_v45, 9  ;;  %v2484_v38 = vld [vmem:[#allocation3 + $0x28] sm:$0xf]  ;;  %v2485_v42 = vld [vmem:[#allocation3 + $0x2c] sm:$0x1]  ;;  %3171 = vmatprep.subr.bf16.mxu1 %v3284_v6 }
 0x3ca   : > { %2421 = vrot.lane.b32.xlu1 %v3094_v53, %s3404_s14  ;;  %v2252_v41 = vrot.slane %v2250_v39, 5  ;;  %v2393_v23 = vrot.slane %v2350_v4, 5  ;;  %v2523_v29 = vshrl.u32 %v2482_v21, 16  ;;  %v2526_v30 = vshll.u32 %v2482_v21, 16  ;;  %v1889_v18 = vld [vmem:[#allocation3 + $0x8] sm:$0xf]  ;;  %3172 = vmatpush3.bf16.msra.mxu1 %v3284_v6 }
 0x3cb   : > { %2124 = vrot.lane.b32.xlu0 %v3073_v3, %s3401_s9  ;;  %v2234_v24 = vrot.slane %v2233_v57, 4  ;;  %v2247_v27 = vor.u32 %v2246_v25, %v2243_v33  ;;  %v2390_v28 = vsel %vm3760_vm0, %v3087_v20, %v2389_v22  ;;  %v2532_v40 = vshll.u32 %v2483_v1, 16  ;;  %v1890_v53 = vld [vmem:[#allocation3 + $0xc] sm:$0x1]  ;;  %v1895_v26 = vld [vmem:[#allocation3 + $0x20] sm:$0xf]  ;;  %3173 = vmatprep.subr.bf16.mxu1 %v3286_v35 }
 0x3cc   : > { %v2394_v2 = vsel %vm3760_vm0, %v3088_v14, %v2393_v23  ;;  %v2537_v43 = vshrl.u32 %v2484_v38, 16  ;;  %v2525_v17 = vrot.slane %v2523_v29, 4  ;;  %v2528_v48 = vrot.slane %v2526_v30, 5  ;;  %v1896_v13 = vld [vmem:[#allocation3 + $0x24] sm:$0x1]  ;;  %s2883_s9 = scalar_lea.sflag [#allocation8], %s3543_s23 }
 0x3cd   : > { %v2239_v44 = vsel %vm3772_vm1, %v2234_v24, %v2238_v19  ;;  %v2248_v56 = vrot.slane %v2247_v27, 4  ;;  %v3093_v50 = vcombine.low %v2390_v28, %v2394_v2  ;;  %v2534_v54 = vrot.slane %v2532_v40, 5  ;;  %v1897_v62 = vld [vmem:[#allocation3 + $0x28] sm:$0xf]  ;;  %v1898_v19 = vld [vmem:[#allocation3 + $0x2c] sm:$0x1] }
 0x3ce   : > { %2029 = vrot.lane.b32.xlu1 %v3060_v10, %s3397_s15  ;;  %v2539_v55 = vrot.slane %v2537_v43, 4  ;;  %v2540_v58 = vshll.u32 %v2484_v38, 16  ;;  %v2546_v7 = vshll.u32 %v2485_v42, 16  ;;  %v1918_v15 = vshrl.u32 %v1889_v18, 16  ;;  %v2182_v25 = vld [vmem:[#allocation3 + $0x8] sm:$0xf]  ;;  %3174 = vmatpush3.bf16.msra.mxu1 %v3286_v35 }
 0x3cf   : > { %v2253_v59 = vsel %vm3772_vm1, %v2248_v56, %v2252_v41  ;;  %2419 = vrot.lane.b32.xlu0 %v3093_v50, %s3404_s14  ;;  %v1921_v47 = vshll.u32 %v1889_v18, 16  ;;  %v2529_v60 = vor.u32 %v2528_v48, %v2525_v17  ;;  %v1927_v61 = vshll.u32 %v1890_v53, 16  ;;  %v2183_v30 = vld [vmem:[#allocation3 + $0xc] sm:$0x1]  ;;  %v2184_v28 = vld [vmem:[#allocation3 + $0x10] sm:$0xf] }
 0x3d0   : > { %v3080_v8 = vcombine.low %v2239_v44, %v2253_v59  ;;  %v2542_v3 = vrot.slane %v2540_v58, 5  ;;  %v2548_v12 = vrot.slane %v2546_v7, 5  ;;  %v1920_v9 = vrot.slane %v1918_v15, 4  ;;  %v2185_v18 = vld [vmem:[#allocation3 + $0x14] sm:$0x1] }
 0x3d1   : > { %v1923_v63 = vrot.slane %v1921_v47, 5  ;;  %v1960_v5 = vshrl.u32 %v1895_v26, 16  ;;  %v2530_v16 = vrot.slane %v2529_v60, 4  ;;  %v1929_v36 = vrot.slane %v1927_v61, 5  ;;  %v1899_v56 = vld [vmem:[#allocation3 + $0x30] sm:$0xf] }
 0x3d2   : > { %2324 = vrot.lane.b32.xlu1 %v3080_v8, %s3399_s8  ;;  %v2543_v45 = vor.u32 %v2542_v3, %v2539_v55  ;;  %v1963_v33 = vshll.u32 %v1895_v26, 16  ;;  %v1969_v10 = vshll.u32 %v1896_v13, 16  ;;  %v1974_v57 = vshrl.u32 %v1897_v62, 16  ;;  %v1900_v47 = vld [vmem:[#allocation3 + $0x34] sm:$0x1] }
 0x3d3   : > { %v1924_v39 = vor.u32 %v1923_v63, %v1920_v9  ;;  %v1962_v4 = vrot.slane %v1960_v5, 4  ;;  %v2535_v20 = vsel %vm3772_vm1, %v2530_v16, %v2534_v54  ;;  %v1977_v41 = vshll.u32 %v1897_v62, 16  ;;  %v1901_v60 = vld [vmem:[#allocation3 + $0x38] sm:$0xf]  ;;  %v1902_v3 = vld [vmem:[#allocation3 + $0x3c] sm:$0x1] }
 0x3d4   : > { %v2544_v21 = vrot.slane %v2543_v45, 4  ;;  %v1965_v1 = vrot.slane %v1963_v33, 5  ;;  %v1971_v14 = vrot.slane %v1969_v10, 5  ;;  %v1976_v23 = vrot.slane %v1974_v57, 4  ;;  %v2478_v63 = vld [vmem:[#allocation3 + $0x10] sm:$0xf] }
 0x3d5   : > { %v1925_v22 = vrot.slane %v1924_v39, 4  ;;  %v1983_v38 = vshll.u32 %v1898_v19, 16  ;;  %v1979_v29 = vrot.slane %v1977_v41, 5  ;;  %v2199_v2 = vshrl.u32 %v2182_v25, 16  ;;  %v2479_v10 = vld [vmem:[#allocation3 + $0x14] sm:$0x1] }
 0x3d6   : > { %v2549_v24 = vsel %vm3772_vm1, %v2544_v21, %v2548_v12  ;;  %v1966_v27 = vor.u32 %v1965_v1, %v1962_v4  ;;  %v2202_v44 = vshll.u32 %v2182_v25, 16  ;;  %v2208_v55 = vshll.u32 %v2183_v30, 16  ;;  %v2480_v21 = vld [vmem:[#allocation3 + $0x18] sm:$0xf] }
 0x3d7   : > { %v3100_v42 = vcombine.low %v2535_v20, %v2549_v24  ;;  %v1930_v40 = vsel %vm3772_vm1, %v1925_v22, %v1929_v36  ;;  %v1985_v43 = vrot.slane %v1983_v38, 5  ;;  %v1980_v53 = vor.u32 %v1979_v29, %v1976_v23  ;;  %v2481_v38 = vld [vmem:[#allocation3 + $0x1c] sm:$0x1] }
 0x3d8   : > { %v3059_v50 = vcombine.low %v1916_v32, %v1930_v40  ;;  %v1967_v17 = vrot.slane %v1966_v27, 4  ;;  %v2201_v48 = vrot.slane %v2199_v2, 4  ;;  %v2204_v54 = vrot.slane %v2202_v44, 5 }
 0x3d9   : > { %2620 = vrot.lane.b32.xlu1 %v3100_v42, %s3406_s26  ;;  %v2213_v58 = vshrl.u32 %v2184_v28, 16  ;;  %v2216_v26 = vshll.u32 %v2184_v28, 16  ;;  %v1981_v7 = vrot.slane %v1980_v53, 4  ;;  %v2222_v15 = vshll.u32 %v2185_v18, 16  ;;  %v2194_v28 = vld [vmem:[#allocation3 + $0x38] sm:$0xf] }
 0x3da   : > { %2027 = vrot.lane.b32.xlu0 %v3059_v50, %s3397_s15  ;;  %v1972_v59 = vsel %vm3772_vm1, %v1967_v17, %v1971_v14  ;;  %v1988_v34 = vshrl.u32 %v1899_v56, 16  ;;  %v2205_v32 = vor.u32 %v2204_v54, %v2201_v48  ;;  %v2605_v61 = vsel %vm3772_vm1, %v4139_v51, %v4142_v0  ;;  %v2195_v18 = vld [vmem:[#allocation3 + $0x3c] sm:$0x1]  ;;  %v2196_v53 = vld [vmem:[#allocation3 + $0x40] sm:$0xf] }
 0x3db   : > { %v2215_v6 = vrot.slane %v2213_v58, 4  ;;  %v2218_v8 = vrot.slane %v2216_v26, 5  ;;  %v1986_v13 = vsel %vm3772_vm1, %v1981_v7, %v1985_v43  ;;  %v2210_v62 = vrot.slane %v2208_v55, 5  ;;  %v3288_v26 = vld [vmem:[%s4427_s4 + $0x18] sm:$0xff]  }
 0x3dc   : > { %v1990_v12 = vrot.slane %v1988_v34, 4  ;;  %v1991_v9 = vshll.u32 %v1899_v56, 16  ;;  %v3061_v5 = vcombine.low %v1972_v59, %v1986_v13  ;;  %v2206_v16 = vrot.slane %v2205_v32, 4  ;;  %3175 = vmatprep.subr.bf16.mxu1 %v3288_v26 }
 0x3dd   : > { %v2219_v45 = vor.u32 %v2218_v8, %v2215_v6  ;;  %v1997_v36 = vshll.u32 %v1900_v47, 16  ;;  %v2224_v19 = vrot.slane %v2222_v15, 5  ;;  %v2002_v39 = vshrl.u32 %v1901_v60, 16  ;;  %v2197_v47 = vld [vmem:[#allocation3 + $0x44] sm:$0x1]  ;;  %3176 = vmatpush3.bf16.msra.mxu1 %v3288_v26 }
 0x3de   : > { %v1993_v33 = vrot.slane %v1991_v9, 5  ;;  %v2005_v4 = vshll.u32 %v1901_v60, 16  ;;  %2031 = vrot.lane.b32.xlu1 %v3061_v5, %s3397_s15  ;;  %v2211_v57 = vsel %vm3772_vm1, %v2206_v16, %v2210_v62  ;;  %v2011_v20 = vshll.u32 %v1902_v3, 16  ;;  %v2190_v60 = vld [vmem:[#allocation3 + $0x28] sm:$0xf] }
 0x3df   : > { %v2220_v25 = vrot.slane %v2219_v45, 4  ;;  %v2495_v1 = vshrl.u32 %v2478_v63, 16  ;;  %v1999_v22 = vrot.slane %v1997_v36, 5  ;;  %v2004_v14 = vrot.slane %v2002_v39, 4  ;;  %v2191_v9 = vld [vmem:[#allocation3 + $0x2c] sm:$0x1] }
 0x3e0   : > { %v1994_v41 = vor.u32 %v1993_v33, %v1990_v12  ;;  %v2007_v23 = vrot.slane %v2005_v4, 5  ;;  %v2498_v29 = vshll.u32 %v2478_v63, 16  ;;  %v2504_v30 = vshll.u32 %v2479_v10, 16  ;;  %v2192_v63 = vld [vmem:[#allocation3 + $0x30] sm:$0xf] }
 0x3e1   : > { %v2225_v24 = vsel %vm3772_vm1, %v2220_v25, %v2224_v19  ;;  %v2497_v27 = vrot.slane %v2495_v1, 4  ;;  %v2509_v43 = vshrl.u32 %v2480_v21, 16  ;;  %v2013_v44 = vrot.slane %v2011_v20, 5  ;;  %v2193_v19 = vld [vmem:[#allocation3 + $0x34] sm:$0x1] }
 0x3e2   : > { %v3079_v2 = vcombine.low %v2211_v57, %v2225_v24  ;;  %v1995_v42 = vrot.slane %v1994_v41, 4  ;;  %v2008_v40 = vor.u32 %v2007_v23, %v2004_v14  ;;  %v2500_v56 = vrot.slane %v2498_v29, 5  ;;  %v2490_v57 = vld [vmem:[#allocation3 + $0x40] sm:$0xf]  ;;  %v2491_v41 = vld [vmem:[#allocation3 + $0x44] sm:$0x1] }
 0x3e3   : > { %v2512_v50 = vshll.u32 %v2480_v21, 16  ;;  %v2518_v17 = vshll.u32 %v2481_v38, 16  ;;  %v2511_v55 = vrot.slane %v2509_v43, 4  ;;  %v2283_v58 = vshrl.u32 %v2194_v28, 16  ;;  %v3281_v14 = vld [vmem:[#allocation3 + $0x10] ss:$8 sps:$4 sm:$0xff]  }
 0x3e4   : > { %2322 = vrot.lane.b32.xlu0 %v3079_v2, %s3399_s8  ;;  %v2000_v48 = vsel %vm3772_vm1, %v1995_v42, %v1999_v22  ;;  %v2009_v54 = vrot.slane %v2008_v40, 4  ;;  %v2501_v59 = vor.u32 %v2500_v56, %v2497_v27  ;;  %v2506_v7 = vrot.slane %v2504_v30, 5  ;;  %v2486_v22 = vld [vmem:[#allocation3 + $0x30] sm:$0xf]  ;;  %1884 = vst.msk [vmem:[#allocation5 + $0x8] sm:$0xff] %vm1489_vm2, %v3281_v14 }
 0x3e5   : > { %v2514_v15 = vrot.slane %v2512_v50, 5  ;;  %v2286_v34 = vshll.u32 %v2194_v28, 16  ;;  %v2285_v32 = vrot.slane %v2283_v58, 4  ;;  %v2292_v6 = vshll.u32 %v2195_v18, 16  ;;  %v3283_v42 = vld [vmem:[#allocation3] ss:$8 sps:$4 sm:$0xff]  }
 0x3e6   : > { %v2014_v35 = vsel %vm3772_vm1, %v2009_v54, %v2013_v44  ;;  %v2297_v8 = vshrl.u32 %v2196_v53, 16  ;;  %v2502_v13 = vrot.slane %v2501_v59, 4  ;;  %v2520_v5 = vrot.slane %v2518_v17, 5  ;;  %v2488_v54 = vld [vmem:[#allocation3 + $0x38] sm:$0xf]  ;;  %1883 = vst.msk [vmem:[#allocation5] sm:$0xff] %vm1489_vm2, %v3283_v42 }
 0x3e7   : > { %v3062_v3 = vcombine.low %v2000_v48, %v2014_v35  ;;  %v2515_v62 = vor.u32 %v2514_v15, %v2511_v55  ;;  %v2288_v12 = vrot.slane %v2286_v34, 5  ;;  %v2300_v45 = vshll.u32 %v2196_v53, 16  ;;  %v2487_v48 = vld [vmem:[#allocation3 + $0x34] sm:$0x1]  ;;  %v3285_v55 = vld [vmem:[#allocation3 + $0x20] ss:$8 sps:$4 sm:$0xff]  }
 0x3e8   : > { %v2299_v16 = vrot.slane %v2297_v8, 4  ;;  %v2306_v36 = vshll.u32 %v2197_v47, 16  ;;  %v2507_v33 = vsel %vm3772_vm1, %v2502_v13, %v2506_v7  ;;  %v2255_v10 = vshrl.u32 %v2190_v60, 16  ;;  %v2489_v7 = vld [vmem:[#allocation3 + $0x3c] sm:$0x1]  ;;  %1885 = vst.msk [vmem:[#allocation5 + $0x10] sm:$0xff] %vm1489_vm2, %v3285_v55 }
 0x3e9   : > { %2033 = vrot.lane.b32.xlu1 %v3062_v3, %s3397_s15  ;;  %v2516_v39 = vrot.slane %v2515_v62, 4  ;;  %v2289_v4 = vor.u32 %v2288_v12, %v2285_v32  ;;  %v2294_v25 = vrot.slane %v2292_v6, 5  ;;  %v2302_v20 = vrot.slane %v2300_v45, 5  ;;  %v2647_v13 = vld [vmem:[#allocation3 + $0x40] sm:$0xe] }
 0x3ea   : > { %v2258_v21 = vshll.u32 %v2190_v60, 16  ;;  %v2264_v1 = vshll.u32 %v2191_v9, 16  ;;  %v2257_v24 = vrot.slane %v2255_v10, 4  ;;  %v2269_v27 = vshrl.u32 %v2192_v63, 16  ;;  %v3287_v62 = vld [vmem:[#allocation3 + $0x30] ss:$8 sps:$4 sm:$0xff]  }
 0x3eb   : > { %v2521_v23 = vsel %vm3772_vm1, %v2516_v39, %v2520_v5  ;;  %v2290_v38 = vrot.slane %v2289_v4, 4  ;;  %v2303_v30 = vor.u32 %v2302_v20, %v2299_v16  ;;  %v2308_v28 = vrot.slane %v2306_v36, 5  ;;  %1886 = vst.msk [vmem:[#allocation5 + $0x18] sm:$0xff] %vm1489_vm2, %v3287_v62 }
 0x3ec   : > { %v3099_v29 = vcombine.low %v2507_v33, %v2521_v23  ;;  %v2260_v2 = vrot.slane %v2258_v21, 5  ;;  %v2271_v43 = vrot.slane %v2269_v27, 4  ;;  %v2272_v18 = vshll.u32 %v2192_v63, 16  ;;  %v2648_v33 = vld [vmem:[#allocation3 + $0x44] sm:$0x1] }
 0x3ed   : > { %v2295_v40 = vsel %vm3772_vm1, %v2290_v38, %v2294_v25  ;;  %v2278_v44 = vshll.u32 %v2193_v19, 16  ;;  %v2304_v56 = vrot.slane %v2303_v30, 4  ;;  %v2579_v17 = vshrl.u32 %v2490_v57, 16  ;;  %v2646_v27 = vld [vmem:[#allocation3 + $0x3c] sm:$0x1] }
 0x3ee   : > { %2618 = vrot.lane.b32.xlu0 %v3099_v29, %s3406_s26  ;;  %v2261_v50 = vor.u32 %v2260_v2, %v2257_v24  ;;  %v2582_v53 = vshll.u32 %v2490_v57, 16  ;;  %v2266_v58 = vrot.slane %v2264_v1, 5  ;;  %v2274_v26 = vrot.slane %v2272_v18, 5  ;;  %v2643_v1 = vld [vmem:[#allocation3 + $0x30] sm:$0xe] }
 0x3ef   : > { %v2588_v59 = vshll.u32 %v2491_v41, 16  ;;  %v2551_v15 = vshrl.u32 %v2486_v22, 16  ;;  %v2309_v47 = vsel %vm3772_vm1, %v2304_v56, %v2308_v28  ;;  %v2581_v35 = vrot.slane %v2579_v17, 4  ;;  %v2644_v41 = vld [vmem:[#allocation3 + $0x34] sm:$0x1] }
 0x3f0   : > { %v2262_v34 = vrot.slane %v2261_v50, 4  ;;  %v2584_v32 = vrot.slane %v2582_v53, 5  ;;  %v3082_v6 = vcombine.low %v2295_v40, %v2309_v47  ;;  %v2275_v8 = vor.u32 %v2274_v26, %v2271_v43  ;;  %v2645_v24 = vld [vmem:[#allocation3 + $0x38] sm:$0xe] }
 0x3f1   : > { %v2280_v60 = vrot.slane %v2278_v44, 5  ;;  %v2590_v3 = vrot.slane %v2588_v59, 5  ;;  %v2553_v63 = vrot.slane %v2551_v15, 4  ;;  %v2554_v5 = vshll.u32 %v2486_v22, 16 }
 0x3f2   : > { %v2267_v12 = vsel %vm3772_vm1, %v2262_v34, %v2266_v58  ;;  %v2585_v9 = vor.u32 %v2584_v32, %v2581_v35  ;;  %2328 = vrot.lane.b32.xlu1 %v3082_v6, %s3399_s8  ;;  %v2276_v16 = vrot.slane %v2275_v8, 4  ;;  %v2560_v45 = vshll.u32 %v2487_v48, 16 }
 0x3f3   : > { %v2565_v36 = vshrl.u32 %v2488_v54, 16  ;;  %v2568_v19 = vshll.u32 %v2488_v54, 16  ;;  %v2556_v4 = vrot.slane %v2554_v5, 5  ;;  %v2574_v10 = vshll.u32 %v2489_v7, 16 }
 0x3f4   : > { %v2586_v39 = vrot.slane %v2585_v9, 4  ;;  %v3109_v57 = vrot.slane %v2647_v13, 9  ;;  %v2281_v25 = vsel %vm3772_vm1, %v2276_v16, %v2280_v60  ;;  %v2693_v38 = vrot.slane %v2648_v33, 5 }
 0x3f5   : > { %v2567_v20 = vrot.slane %v2565_v36, 4  ;;  %v2570_v21 = vrot.slane %v2568_v19, 5  ;;  %v3081_v22 = vcombine.low %v2267_v12, %v2281_v25  ;;  %v2557_v23 = vor.u32 %v2556_v4, %v2553_v63 }
 0x3f6   : > { %v2591_v14 = vsel %vm3772_vm1, %v2586_v39, %v2590_v3  ;;  %v2562_v30 = vrot.slane %v2560_v45, 5  ;;  %v2698_v2 = vsel %vm3760_vm0, %v3110_v31, %v2697_v52  ;;  %v2576_v40 = vrot.slane %v2574_v10, 5  ;;  %v3289_v31 = vld [vmem:[%s4427_s4 + $0x20] ss:$0 sps:$4 sm:$0xff]  }
 0x3f7   : > { %v3102_v29 = vcombine.low %v2591_v14, %v2605_v61  ;;  %v2571_v28 = vor.u32 %v2570_v21, %v2567_v20  ;;  %2326 = vrot.lane.b32.xlu0 %v3081_v22, %s3399_s8  ;;  %v2558_v42 = vrot.slane %v2557_v23, 4  ;;  %v2694_v43 = vsel %vm3760_vm0, %v3109_v57, %v2693_v38  ;;  %3188 = vmatprep.subr.msk.bf16.mxu1 %vm2781_vm7, %v3289_v31  ;;  %s4353_s8 = scalar_lea.vmem [#allocation9], %s2976_s25 }
 0x3f8   : > { %v3107_v18 = vrot.slane %v2643_v1, 9  ;;  %v2685_v0 = vrot.slane %v2644_v41, 5  ;;  %v3108_v61 = vrot.slane %v2645_v24, 9  ;;  %v2689_v44 = vrot.slane %v2646_v27, 5  ;;  %s2896_s25 = sshll.u32 %s4353_s8, 4  ;;  %s4365_s25 = int_to_ptr.vmem [resolvable:$true] %s2896_s25 }
 0x3f9   : > { %2624 = vrot.lane.b32.xlu1 %v3102_v29, %s3406_s26  ;;  %v2572_v51 = vrot.slane %v2571_v28, 4  ;;  %v2563_v37 = vsel %vm3772_vm1, %v2558_v42, %v2562_v30  ;;  %v3114_v52 = vcombine.low %v2694_v43, %v2698_v2  ;;  %v2783_v53 = vsel %vm2781_vm7, %v3289_v31, 0  ;;  %s3322_s17 = scalar_lea.vmem %s4365_s25, 1024 }
 0x3fa   : > { %v2686_v50 = vsel %vm3760_vm0, %v3107_v18, %v2685_v0  ;;  %v2690_v17 = vsel %vm3760_vm0, %v3108_v61, %v2689_v44  ;;  %3178 = vmatpush3.bf16.msra.mxu1 %v2783_v53  ;;  %vm2132_vm0 = vcmask 195712   ;;  %vm2630_vm8 = vcmask 523712   ;;  %p3323_p6 = scmp.ne.s32.totalorder %s4365_s25, %s3322_s17 }
 0x3fb   : > { %v2577_v46 = vsel %vm3772_vm1, %v2572_v51, %v2576_v40  ;;  %v3113_v48 = vcombine.low %v2686_v50, %v2690_v17  ;;  %vm2177_vm1 = vcmask 261312   ;;  %vm2723_vm3 = vcmask 589312  }
 0x3fc   : > { %v3101_v56 = vcombine.low %v2563_v37, %v2577_v46  ;;  %vm2768_vm4 = vcmask 588800   ;;  %p3324_p12 = pnand %p3323_p6, %p4451_p11 }
 0x3fd   : > { %2717 = vrot.lane.b32.xlu1 %v3114_v52, %s3405_s10 }
 0x3fe   : > { %2622 = vrot.lane.b32.xlu0 %v3101_v56, %s3406_s26  ;;  %p3325_p13 = pneg %p3324_p12  ;;  %s3407_s26 = smov [#allocation9]  }
 0x3ff   : > { %s3326_s28 = sshll.u32 %s3407_s26, 4  ;;  %s3327_s28 = int_to_ptr.vmem [resolvable:$false] %s3326_s28 }
 0x400   : > { %s3328_s29 = scalar_lea.vmem %s3327_s28, 2048  ;;  %p3329_p8 = scmp.lt.s32.totalorder %s4365_s25, %s3327_s28 }
 0x401   : > { %p3330_p10 = scmp.lt.s32.totalorder %s3328_s29, %s3322_s17 }
 0x402   : > { %2715 = vrot.lane.b32.xlu0 %v3113_v48, %s3405_s10  ;;  %s3138_s10 = sshll.u32 %s3460_s22, 10 }
 0x403   : > { %s4374_s13 = scalar_lea.hbm %s4428_s5, %s3138_s10  ;;  %p3331_p0 = por %p3330_p10, %p3329_p8 }
 0x405   : > { %p3332_p2 = pnand %p3331_p0, %p3325_p13 }
 0x41d   : > { %v2166_v49 = vpop.permute.xlu0 %2165 }
 0x420   : > { %v2168_v54 = vpop.permute.xlu1 %2167 }
 0x421   : > { %v2462_v55 = vpop.permute.xlu0 %2461 }
 0x424   : > { %v2464_v58 = vpop.permute.xlu1 %2463 }
 0x425   : > { %v2170_v26 = vpop.permute.xlu0 %2169 }
 0x428   : > { %v2172_v59 = vpop.permute.xlu1 %2171 }
 0x429   : > { %v4312_v7 = vpop.permute.xlu0 %2465 }
 0x42c   : > { %v2468_v15 = vpop.permute.xlu1 %2467 }
 0x42d   : > { %v2121_v11 = vpop.permute.xlu0 %2120 }
 0x430   : > { %v2123_v47 = vpop.permute.xlu1 %2122 }
 0x431   : > { %v2416_v34 = vpop.permute.xlu0 %2415 }
 0x434   : > { %v2418_v35 = vpop.permute.xlu1 %2417 }
 0x435   : > { %v2712_v32 = vpop.permute.xlu0 %2711 }
 0x438   : > { %v2127_v6 = vpop.permute.xlu1 %2126 }
 0x439   : > { %v2714_v60 = vpop.permute.xlu0 %2713 }
 0x43c   : > { %v2422_v8 = vpop.permute.xlu1 %2421 }
 0x43d   : > { %v2125_v13 = vpop.permute.xlu0 %2124 }
 0x440   : > { %v2030_v3 = vpop.permute.xlu1 %2029 }
 0x441   : > { %2041 = vst.msk [vmem:[#allocation5 + $0x8] sm:$0xff] %vm2039_vm11, %v2030_v3  ;;  %v2420_v12 = vpop.permute.xlu0 %2419 }
 0x442   : > { %2134 = vst.msk [vmem:[#allocation5 + $0x8] sm:$0xff] %vm2132_vm0, %v2123_v47 }
 0x443   : > { %2179 = vst.msk [vmem:[#allocation5 + $0x8] sm:$0xff] %vm2177_vm1, %v2168_v54 }
 0x444   : > { %v2325_v62 = vpop.permute.xlu1 %2324 }
 0x445   : > { %2336 = vst.msk [vmem:[#allocation5 + $0x8] sm:$0xff] %vm2334_vm13, %v2325_v62 }
 0x446   : > { %2429 = vst.msk [vmem:[#allocation5 + $0x8] sm:$0xff] %vm2427_vm14, %v2418_v35 }
 0x447   : > { %2475 = vst.msk [vmem:[#allocation5 + $0x8] sm:$0xff] %vm2473_vm15, %v2464_v58 }
 0x44b   : > { %v2621_v9 = vpop.permute.xlu1 %2620 }
 0x44c   : > { %2632 = vst.msk [vmem:[#allocation5 + $0x8] sm:$0xff] %vm2630_vm8, %v2621_v9  ;;  %v2028_v63 = vpop.permute.xlu0 %2027 }
 0x44d   : > { %2725 = vst.msk [vmem:[#allocation5 + $0x8] sm:$0xff] %vm2723_vm3, %v2714_v60 }
 0x44e   : > { %2040 = vst.msk [vmem:[#allocation5] sm:$0xff] %vm2039_vm11, %v2028_v63 }
 0x44f   : > { %2133 = vst.msk [vmem:[#allocation5] sm:$0xff] %vm2132_vm0, %v2121_v11 }
 0x450   : > { %2178 = vst.msk [vmem:[#allocation5] sm:$0xff] %vm2177_vm1, %v2166_v49  ;;  %v2032_v5 = vpop.permute.xlu1 %2031 }
 0x451   : > { %2042 = vst.msk [vmem:[#allocation5 + $0x10] sm:$0xff] %vm2039_vm11, %v2032_v5 }
 0x452   : > { %2135 = vst.msk [vmem:[#allocation5 + $0x10] sm:$0xff] %vm2132_vm0, %v2125_v13 }
 0x453   : > { %2180 = vst.msk [vmem:[#allocation5 + $0x10] sm:$0xff] %vm2177_vm1, %v2170_v26 }
 0x454   : > { %v2729_v4 = vld [vmem:[#allocation5 + $0x8] sm:$0xff] }
 0x456   : > { %v2323_v16 = vpop.permute.xlu0 %2322 }
 0x457   : > { %2335 = vst.msk [vmem:[#allocation5] sm:$0xff] %vm2334_vm13, %v2323_v16 }
 0x458   : > { %2428 = vst.msk [vmem:[#allocation5] sm:$0xff] %vm2427_vm14, %v2416_v34 }
 0x459   : > { %2474 = vst.msk [vmem:[#allocation5] sm:$0xff] %vm2473_vm15, %v2462_v55 }
 0x45b   : > { %v2034_v45 = vpop.permute.xlu1 %2033 }
 0x45c   : > { %2043 = vst.msk [vmem:[#allocation5 + $0x18] sm:$0xff] %vm2039_vm11, %v2034_v45 }
 0x45d   : > { %2136 = vst.msk [vmem:[#allocation5 + $0x18] sm:$0xff] %vm2132_vm0, %v2127_v6 }
 0x45e   : > { %2181 = vst.msk [vmem:[#allocation5 + $0x18] sm:$0xff] %vm2177_vm1, %v2172_v59 }
 0x460   : > { %v2619_v36 = vpop.permute.xlu0 %2618 }
 0x461   : > { %2631 = vst.msk [vmem:[#allocation5] sm:$0xff] %vm2630_vm8, %v2619_v36 }
 0x462   : > { %2724 = vst.msk [vmem:[#allocation5] sm:$0xff] %vm2723_vm3, %v2712_v32 }
 0x464   : > { %v2329_v19 = vpop.permute.xlu1 %2328 }
 0x465   : > { %2338 = vst.msk [vmem:[#allocation5 + $0x18] sm:$0xff] %vm2334_vm13, %v2329_v19 }
 0x466   : > { %2431 = vst.msk [vmem:[#allocation5 + $0x18] sm:$0xff] %vm2427_vm14, %v2422_v8 }
 0x467   : > { %2477 = vst.msk [vmem:[#allocation5 + $0x18] sm:$0xff] %vm2473_vm15, %v2468_v15 }
 0x469   : > { %v2728_v33 = vld [vmem:[#allocation5] sm:$0xff]  ;;  %v2327_v39 = vpop.permute.xlu0 %2326 }
 0x46a   : > { %3179 = vmatprep.mubr.msk.bf16.mxu1 %vm2768_vm4, %v2728_v33  ;;  %2337 = vst.msk [vmem:[#allocation5 + $0x10] sm:$0xff] %vm2334_vm13, %v2327_v39 }
 0x46b   : > { %v2625_v10 = vpop.permute.xlu1 %2624  ;;  %3180 = vmatmul.mubr.msk.bf16.vlgmr.msra.gmra.mrb[0].mxu1 %vm2768_vm4, %v2729_v4  ;;  %2430 = vst.msk [vmem:[#allocation5 + $0x10] sm:$0xff] %vm2427_vm14, %v2420_v12 }
 0x46c   : > { %2634 = vst.msk [vmem:[#allocation5 + $0x18] sm:$0xff] %vm2630_vm8, %v2625_v10 }
 0x46d   : > { %2476 = vst.msk [vmem:[#allocation5 + $0x10] sm:$0xff] %vm2473_vm15, %v4312_v7 }
 0x46f   : > { %v2718_v57 = vpop.permute.xlu1 %2717 }
 0x470   : > { %v2623_v25 = vpop.permute.xlu0 %2622  ;;  %2727 = vst.msk [vmem:[#allocation5 + $0x18] sm:$0xff] %vm2723_vm3, %v2718_v57 }
 0x471   : > { %2633 = vst.msk [vmem:[#allocation5 + $0x10] sm:$0xff] %vm2630_vm8, %v2623_v25 }
 0x474   : > { %v2716_v20 = vpop.permute.xlu0 %2715 }
 0x475   : > { %2726 = vst.msk [vmem:[#allocation5 + $0x10] sm:$0xff] %vm2723_vm3, %v2716_v20 }
 0x477   : > { %v2731_v21 = vld [vmem:[#allocation5 + $0x18] sm:$0xff] }
 0x47c   : > { %v2730_v1 = vld [vmem:[#allocation5 + $0x10] sm:$0xff] }
 0x47d   : > { %3183 = vmatprep.mubr.msk.bf16.mxu1 %vm2768_vm4, %v2730_v1 }
 0x47e   : > { %3184 = vmatmul.mubr.msk.bf16.gmra.mrb[4].mxu1 %vm2768_vm4, %v2731_v21 }
 0x53e   : > { %v3181_v41 = vpop.f32.mrb[0].mxu1 }
 0x53f   : > { %vm2852_vm5 = vcmp.ge.f32.partialorder %v3181_v41, 0.0  ;;  %v2860_v22 = vmul.f32 0.01, %v3181_v41  ;;  %v2819_v14 = vpop.f32.mrb[1].mxu1 }
 0x540   : > { %vm2850_vm6 = vcmp.ge.f32.partialorder %v2819_v14, 0.0  ;;  %v2858_v23 = vmul.f32 0.01, %v2819_v14  ;;  %v3182_v38 = vpop.f32.mrb[2].mxu1 }
 0x541   : > { %v2868_v24 = vsel %vm2852_vm5, %v3181_v41, %v2860_v22  ;;  %vm2853_vm9 = vcmp.ge.f32.partialorder %v3182_v38, 0.0  ;;  %v2861_v27 = vmul.f32 0.01, %v3182_v38  ;;  %v2822_v29 = vpop.f32.mrb[3].mxu1 }
 0x542   : > { %2876 = vst.msk [vmem:[%s4353_s8 + $0x10] sm:$0xff] %vm1489_vm2, %v2868_v24  ;;  %v2866_v30 = vsel %vm2850_vm6, %v2819_v14, %v2858_v23  ;;  %vm2851_vm10 = vcmp.ge.f32.partialorder %v2822_v29, 0.0  ;;  %v2859_v28 = vmul.f32 0.01, %v2822_v29 }
 0x543   : > { %2874 = vst.msk [vmem:[%s4353_s8] sm:$0xff] %vm1489_vm2, %v2866_v30  ;;  %v2869_v2 = vsel %vm2853_vm9, %v3182_v38, %v2861_v27 }
 0x544   : > { %2877 = vst.msk [vmem:[%s4353_s8 + $0x18] sm:$0xff] %vm1489_vm2, %v2869_v2  ;;  %v2867_v42 = vsel %vm2851_vm10, %v2822_v29, %v2859_v28 }
 0x545   : > { %2875 = vst.msk [vmem:[%s4353_s8 + $0x8] sm:$0xff] %vm1489_vm2, %v2867_v42 }
 0x551   : > { %v3185_v40 = vpop.f32.mrb[4].mxu1 }
 0x552   : > { %vm2856_vm12 = vcmp.ge.f32.partialorder %v3185_v40, 0.0  ;;  %v2864_v43 = vmul.f32 0.01, %v3185_v40  ;;  %v2835_v18 = vpop.f32.mrb[5].mxu1 }
 0x553   : > { %vm2854_vm7 = vcmp.ge.f32.partialorder %v2835_v18, 0.0  ;;  %v2862_v51 = vmul.f32 0.01, %v2835_v18  ;;  %v3186_v0 = vpop.f32.mrb[6].mxu1 }
 0x554   : > { %v2872_v61 = vsel %vm2856_vm12, %v3185_v40, %v2864_v43  ;;  %vm2857_vm11 = vcmp.ge.f32.partialorder %v3186_v0, 0.0  ;;  %v2865_v44 = vmul.f32 0.01, %v3186_v0  ;;  %v2838_v37 = vpop.f32.mrb[7].mxu1 }
 0x555   : > { %2880 = vst.msk [vmem:[%s4353_s8 + $0x30] sm:$0xff] %vm1489_vm2, %v2872_v61  ;;  %v2870_v31 = vsel %vm2854_vm7, %v2835_v18, %v2862_v51  ;;  %vm2855_vm0 = vcmp.ge.f32.partialorder %v2838_v37, 0.0  ;;  %v2863_v46 = vmul.f32 0.01, %v2838_v37 }
 0x556   : > { %2878 = vst.msk [vmem:[%s4353_s8 + $0x20] sm:$0xff] %vm1489_vm2, %v2870_v31  ;;  %v2873_v52 = vsel %vm2857_vm11, %v3186_v0, %v2865_v44 }
 0x557   : > { %2881 = vst.msk [vmem:[%s4353_s8 + $0x38] sm:$0xff] %vm1489_vm2, %v2873_v52  ;;  %v2871_v56 = vsel %vm2855_vm0, %v2838_v37, %v2863_v46 }
 0x558   : > { %2879 = vst.msk [vmem:[%s4353_s8 + $0x28] sm:$0xff] %vm1489_vm2, %v2871_v56 }
 0x559   : > { %3335 = shalt.err (!%p3332_p2)
}
 0x55a   : > { %s3336_s12 = scalar_lea.hbm %s4374_s13, 1024  ;;  %s3340_s14 = scalar_lea.hbm %s4428_s5, 2048 }
 0x55b   : > { %p3337_p4 = scmp.ne.s32.totalorder %s4374_s13, %s3336_s12  ;;  %p3341_p9 = scmp.lt.u32.totalorder %s4374_s13, %s4428_s5 }
 0x55c   : > { %p3342_p1 = scmp.lt.u32.totalorder %s3340_s14, %s3336_s12  ;;  %p3344_p6 = scmp.lt.u32.totalorder %s3336_s12, %s4374_s13 }
 0x55d   : > { %p3338_p5 = pnand %p3337_p4, %p4451_p11 }
 0x55e   : > { %p3343_p3 = por %p3342_p1, %p3341_p9 }
 0x55f   : > { %p3339_p7 = pneg %p3338_p5 }
 0x560   : > { %p3345_p12 = por %p3344_p6, %p3343_p3 }
 0x562   : > { %p3346_p13 = pnand %p3345_p12, %p3339_p7 }
 0x564   : > { %3349 = shalt.err (!%p3346_p13)
}
 0x565   : > { %s3408_s22 = smov 128  }
 0x566   : > { %3197 = dma.vmem_to_hbm [thread:$0]  (%p4451_p11), %s4365_s25, 1024, %s4374_s13, %s2883_s9, %s3408_s22, %s3408_s22, %s3397_s15  }
 0x567 PF: > { %s2911_s11 = sand.u32 1, %s3376_s18   ;;  %p4452_p8 = scmp.ne.s32.totalorder %s4433_s6, 0 }
 0x568   : > { %p4453_p10 = scmp.ge.s32.totalorder %s3388_s21, 2  ;;  %s2912_s17 = scalar_lea.sflag [#allocation8], %s2911_s11 }
 0x56a   : > { %p3204_p0 = pnand %p4453_p10, %p4452_p8 }
 0x56c   : > { %3371 = dma.done.wait (!%p3204_p0), %s2912_s17, 1024  }
 0x56d   : > { %3373 = vsyncadd (!%p3204_p0), %s2912_s17, 4294966272  ;;  %p18_p2 = scmp.ge.s32.totalorder %s3464_s24, 4   ;;  %s4454_s18 = smov %s3380_s19 }
 0x56e   : > { %s4455_s19 = smov %s3384_s20  ;;  %s4456_s20 = smov %s3476_s27 }
 0x56f   : > { %s4457_s21 = smov %s3464_s24  ;;  %20 = sbr.rel (!%p18_p2) target bundleno = 5 (0x5), region = 91 }
 0x576   :  { %2917 = vsyncpa [#allocation7], 1 }
 0x577   :  { %2919 = vsyncpa [#allocation7 + $0x1], 1 }
 0x578   :  { %2920 = vsyncpa [#allocation8], 1 }
 0x579   :  { %2922 = vsyncpa [#allocation8 + $0x1], 1 }

</bundles_post_ra>
